<compile_context>
chip_gen: v6e
topology: v6e:2x2x1
jax: 0.10.0
libtpu: 0.0.40
codegen_flags: <defaults>
</compile_context>

<pallas_src>
import math

import numpy as np
import jax
import jax.numpy as jnp
from jax import lax
from jax.experimental import pallas as pl
from jax.experimental.pallas import tpu as pltpu

_WIN = 8      # time-window size (one aligned (8, P*d) load/store per window)
_PAD_B = 8    # beta segment padded 4 -> 8 columns per problem (was 4 -> d in v2)


# ----------------------------------------------------------------------------
# Kernel 1: the SRWM recurrence (hot path).  One grid point per batch group.
# ----------------------------------------------------------------------------
def _srwm_kernel(x_ref, w_ref, seg2_ref, sbeta_ref, mbd_ref, y_ref, w_scr):
    # x_ref   : (T_pad, Pd)  bf16   packed rows (G batch elems x H heads x d)
    # w_ref   : (Pd, C)      f32    block-diagonal [Y|Q|K|B] initial weights
    # seg2_ref: (2Pd, 2Pd)   f32    block-ones matrix for per-d-segment sums
    # sbeta_ref:(Pb, C)      f32    0/1 selection: sigmoid(b) lanes -> per-column beta
    # mbd_ref : (Pd, C)      f32    block-diagonal mask for the rank-1 update
    # y_ref   : (T_pad, Pd)  bf16   per-step outputs (pre-update weights)
    # w_scr   : (Pd, C)      f32    persistent VMEM scratch holding the evolving W
    T_pad, Pd = x_ref.shape
    C = w_ref.shape[1]
    nwin = T_pad // _WIN

    # Fresh weight state per grid step (stateful=False: every batch group starts
    # from the shared module parameters).
    w_scr[...] = w_ref[...]

    def fdot(a, b):  # (m,K)@(K,N) -> (m,N), f32 accumulate
        return lax.dot_general(a, b, (((1,), (0,)), ((), ())),
                               preferred_element_type=jnp.float32)

    @pl.loop(0, nwin)
    def _window(w):
        t0 = pl.multiple_of(w * _WIN, _WIN)
        xwin = x_ref[pl.ds(t0, _WIN), :]              # one aligned (8, Pd) load
        y_rows = []
        for i in range(_WIN):                         # static unroll inside window
            W = w_scr[...]                            # (Pd, C) f32, pre-update
            Wb = W.astype(jnp.bfloat16)               # one cast, reused by 3 matmuls
            xt = xwin[i:i + 1, :]                     # (1, Pd) bf16, static row slice

            out = fdot(xt, Wb)                        # (1, C) f32 = [y | q | k | b]
            y_rows.append(out[:, 0:Pd])               # pre-update output row

            # Per-d-segment softmax over the q|k logits.  Stabilize with the
            # row-global max (softmax is invariant to any shift that is uniform
            # within a segment; fine here since logits stay O(1)).
            qk_logits = out[:, Pd:3 * Pd]
            qk = jnp.exp(qk_logits - jnp.max(qk_logits))
            seg_sum = fdot(qk, seg2_ref[...])         # (1, 2Pd) per-segment sums
            qk = qk / seg_sum
            q16 = qk[:, 0:Pd].astype(jnp.bfloat16)
            k_f32 = qk[:, Pd:2 * Pd]                  # kept f32 for the update
            k16 = k_f32.astype(jnp.bfloat16)

            v_q = fdot(q16, Wb)                       # (1, C) f32
            v_k = fdot(k16, Wb)                       # (1, C) f32

            beta = jax.nn.sigmoid(out[:, 3 * Pd:C])   # (1, Pb)
            beta_cols = fdot(beta, sbeta_ref[...])    # (1, C) per-column learning rate
            scaled = (v_q - v_k) * beta_cols          # f32

            # Rank-1 update with f32 operands (small K=1 matmul; avoids compounding
            # bf16 rounding in the W state), masked to the per-problem diagonal blocks.
            upd = lax.dot_general(k_f32, scaled, (((0,), (0,)), ((), ())),
                                  preferred_element_type=jnp.float32)   # (Pd, C)
            w_scr[...] = W + upd * mbd_ref[...]

        # One aligned, lane-dense (8, Pd) store per window.
        y_ref[pl.ds(t0, _WIN), :] = jnp.concatenate(y_rows, axis=0).astype(jnp.bfloat16)
    # TODO(synk): for very long T, add an innermost 'arbitrary' T-chunk grid axis
    # (W already lives in persistent scratch), sizing the chunk per generation
    # (larger on v5e/v6e 128 MiB VMEM, smaller on v7x 64 MiB).


def srwm_core_pallas(x2, w_cat, seg2, sbeta, mbd, num_groups, packed_dim):
    T_pad = x2.shape[0]
    Pd = packed_dim
    C = w_cat.shape[1]
    Pb = sbeta.shape[0]
    return pl.pallas_call(
        _srwm_kernel,
        out_shape=jax.ShapeDtypeStruct((T_pad, num_groups * Pd), jnp.bfloat16),
        grid=(num_groups,),
        in_specs=[
            pl.BlockSpec((T_pad, Pd), lambda g: (0, g)),        # packed activations
            pl.BlockSpec((Pd, C), lambda g: (0, 0)),            # weights: constant index,
            pl.BlockSpec((2 * Pd, 2 * Pd), lambda g: (0, 0)),   #  no re-DMA across groups
            pl.BlockSpec((Pb, C), lambda g: (0, 0)),
            pl.BlockSpec((Pd, C), lambda g: (0, 0)),
        ],
        out_specs=pl.BlockSpec((T_pad, Pd), lambda g: (0, g)),
        scratch_shapes=[pltpu.VMEM((Pd, C), jnp.float32)],
        compiler_params=pltpu.CompilerParams(
            dimension_semantics=("parallel",)),                  # groups independent (v7x 2 TCs)
    )(x2, w_cat, seg2, sbeta, mbd)


# ----------------------------------------------------------------------------
# Kernel 2: fused output projection + LayerNorm(h) residual, tiled over rows.
# ----------------------------------------------------------------------------
def _outproj_ln_kernel(h_ref, s_ref, w_ref, g_ref, b_ref, y_ref):
    # h_ref: (tn, in_dim) f32; s_ref: (tn, HD) bf16; w_ref: (HD, in_dim) bf16 (pre-T, pre-cast)
    proj = lax.dot_general(s_ref[...], w_ref[...], (((1,), (0,)), ((), ())),
                           preferred_element_type=jnp.float32)
    h = h_ref[...]
    mean = jnp.mean(h, axis=-1, keepdims=True)
    c = h - mean
    var = jnp.mean(c * c, axis=-1, keepdims=True)
    ln = c * lax.rsqrt(var + 1e-5) * g_ref[...] + b_ref[...]
    y_ref[...] = ln + proj


def outproj_ln_pallas(h2d, s2d, w_out_t, gamma, beta):
    N, in_dim = h2d.shape
    HD = s2d.shape[1]
    tile_n = min(N, 256)                       # sized for v7x's 32 MiB default scoped VMEM
    g2 = gamma.reshape(1, in_dim).astype(jnp.float32)
    b2 = beta.reshape(1, in_dim).astype(jnp.float32)
    return pl.pallas_call(
        _outproj_ln_kernel,
        out_shape=jax.ShapeDtypeStruct((N, in_dim), jnp.float32),
        grid=(pl.cdiv(N, tile_n),),
        in_specs=[
            pl.BlockSpec((tile_n, in_dim), lambda i: (i, 0)),
            pl.BlockSpec((tile_n, HD), lambda i: (i, 0)),
            pl.BlockSpec((HD, in_dim), lambda i: (0, 0)),     # W_out^T resident (bf16)
            pl.BlockSpec((1, in_dim), lambda i: (0, 0)),
            pl.BlockSpec((1, in_dim), lambda i: (0, 0)),
        ],
        out_specs=pl.BlockSpec((tile_n, in_dim), lambda i: (i, 0)),
        compiler_params=pltpu.CompilerParams(
            dimension_semantics=("parallel",)),
    )(h2d, s2d, w_out_t, g2, b2)


# ----------------------------------------------------------------------------
# Wrapper-side packing helpers (all static / one-time).
# ----------------------------------------------------------------------------
def _choose_group(bsz, packed_unit):
    """Number of consecutive batch elements packed per grid step.

    Targets a packed contraction width of ~128-512 lanes (fills the 128-wide
    v5e / 256-wide v6e+v7x MXU) while keeping the lane-dim block legal (full
    array or 128-aligned) when the batch axis is actually tiled.
    """
    best = 1
    for g in range(1, bsz + 1):
        if bsz % g:
            continue
        width = g * packed_unit
        if width > 512:
            break
        if bsz // g == 1 or width % 128 == 0:
            best = g
    if best == 1 and bsz > 1 and packed_unit % 128 != 0 and bsz * packed_unit <= 1024:
        best = bsz                      # fall back: whole batch in one group
    return best


def _build_constants(G, H, d, pad_b):
    """Static 0/1 matrices: segment-sum, beta-selection, block-diagonal mask."""
    P = G * H
    Pd = P * d
    Pb = P * pad_b
    C = 3 * Pd + Pb
    col_prob = np.empty(C, np.int64)
    col_seg = np.empty(C, np.int64)
    for s in range(3):
        col_prob[s * Pd:(s + 1) * Pd] = np.arange(Pd) // d
        col_seg[s * Pd:(s + 1) * Pd] = s
    col_prob[3 * Pd:] = np.arange(Pb) // pad_b
    col_seg[3 * Pd:] = 3

    qk_blk = np.arange(2 * Pd) // d
    seg2 = (qk_blk[:, None] == qk_blk[None, :]).astype(np.float32)

    r_prob = np.arange(Pb) // pad_b
    r_sub = np.arange(Pb) % pad_b
    sbeta = ((r_prob[:, None] == col_prob[None, :]) &
             (r_sub[:, None] == col_seg[None, :])).astype(np.float32)

    row_prob = np.arange(Pd) // d
    mbd = (row_prob[:, None] == col_prob[None, :]).astype(np.float32)
    return jnp.asarray(seg2), jnp.asarray(sbeta), jnp.asarray(mbd)


def _build_w_cat(params, G, H, d, pad_b):
    """Block-diagonal (Pd, C) initial weight in (d_in, d_out) convention."""
    P = G * H
    Pd = P * d
    C = 3 * Pd + P * pad_b
    WyT = jnp.swapaxes(params["W_y"][0], -1, -2).astype(jnp.float32)   # (H, d, d)
    WqT = jnp.swapaxes(params["W_q"][0], -1, -2).astype(jnp.float32)
    WkT = jnp.swapaxes(params["W_k"][0], -1, -2).astype(jnp.float32)
    Wb = params["w_b"][0].astype(jnp.float32)                          # (H, d, 4)
    w = jnp.zeros((Pd, C), jnp.float32)
    for p in range(P):
        hh = p % H
        r = slice(p * d, (p + 1) * d)
        w = w.at[r, 0 * Pd + p * d:0 * Pd + (p + 1) * d].set(WyT[hh])
        w = w.at[r, 1 * Pd + p * d:1 * Pd + (p + 1) * d].set(WqT[hh])
        w = w.at[r, 2 * Pd + p * d:2 * Pd + (p + 1) * d].set(WkT[hh])
        w = w.at[r, 3 * Pd + p * pad_b:3 * Pd + p * pad_b + 4].set(Wb[hh])
    return w


# ----------------------------------------------------------------------------
# Full layer forward (glue in plain JAX; no activation transposes).
# ----------------------------------------------------------------------------
def srwm_layer_forward(h, params, num_head, dim_head, use_input_softmax=False):
    slen, bsz, in_dim = h.shape
    H, d = num_head, dim_head
    assert in_dim == H * d, "module requires in_dim == num_head * dim_head"

    G = _choose_group(bsz, H * d)
    num_groups = bsz // G
    Pd = G * H * d
    assert num_groups == 1 or Pd % 128 == 0, "packed lane width must be 128-aligned when tiling batch"

    x = h
    if use_input_softmax:
        x = jax.nn.softmax(h.reshape(slen, bsz, H, d), axis=-1).reshape(slen, bsz, in_dim)

    # Natural layout in, natural layout out: (T, B, H*d) -> (T_pad, B*H*d).
    T_pad = ((slen + _WIN - 1) // _WIN) * _WIN
    x2 = x.astype(jnp.bfloat16).reshape(slen, bsz * in_dim)
    if T_pad != slen:
        # Zero rows: softmax(0)-rows give q == k exactly -> W update is exactly 0,
        # and the corresponding y rows are sliced off below.
        x2 = jnp.pad(x2, ((0, T_pad - slen), (0, 0)))

    w_cat = _build_w_cat(params, G, H, d, _PAD_B)
    seg2, sbeta, mbd = _build_constants(G, H, d, _PAD_B)

    y2 = srwm_core_pallas(x2, w_cat, seg2, sbeta, mbd, num_groups, Pd)  # (T_pad, B*H*d) bf16
    s2d = y2[:slen].reshape(slen * bsz, H * d)                          # contiguous reshape only

    h2d = h.reshape(slen * bsz, in_dim).astype(jnp.float32)
    w_out_t = jnp.transpose(params["W_out"]).astype(jnp.bfloat16)       # one-time (H*d, in_dim) bf16
    y2d = outproj_ln_pallas(h2d, s2d, w_out_t, params["ln_gamma"], params["ln_beta"])
    # Dropout is identity (inference).
    # TODO(synk): stateful=True / get_state=True paths (state carry in/out) not implemented.
    return y2d.reshape(slen, bsz, in_dim)


# ----------------------------------------------------------------------------
# Pure-JAX reference (mirrors the PyTorch forward), used for verification.
# ----------------------------------------------------------------------------
def _srwm_core_ref(x, WyT, WqT, WkT, Wb):
    xT = jnp.transpose(x, (2, 0, 1, 3))                 # (T, B, H, d)

    def mv(v, W):
        return jnp.einsum("bhi,bhio->bho", v, W, precision="highest")

    def step(carry, xt):
        WyT, WqT, WkT, Wb = carry
        y, q, k, b = mv(xt, WyT), mv(xt, WqT), mv(xt, WkT), mv(xt, Wb)
        q = jax.nn.softmax(q, -1)
        k = jax.nn.softmax(k, -1)
        beta = jax.nn.sigmoid(b)
        yq, qq, kq, bq = mv(q, WyT), mv(q, WqT), mv(q, WkT), mv(q, Wb)
        yk, qk, kk, bk = mv(k, WyT), mv(k, WqT), mv(k, WkT), mv(k, Wb)

        def upd(W, i, diff):
            return W + beta[..., i][..., None, None] * k[..., :, None] * diff[..., None, :]

        carry = (upd(WyT, 0, yq - yk), upd(WqT, 1, qq - qk),
                 upd(WkT, 2, kq - kk), upd(Wb, 3, bq - bk))
        return carry, y

    _, ys = lax.scan(step, (WyT, WqT, WkT, Wb), xT)
    return jnp.transpose(ys, (1, 2, 0, 3))              # (B, H, T, d)


def srwm_layer_ref(h, params, num_head, dim_head, use_input_softmax=False):
    slen, bsz, in_dim = h.shape
    H, d = num_head, dim_head
    x = h.reshape(slen, bsz, H, d)
    if use_input_softmax:
        x = jax.nn.softmax(x, axis=-1)
    x = jnp.transpose(x, (1, 2, 0, 3))
    WyT = jnp.broadcast_to(jnp.swapaxes(params["W_y"], -1, -2), (bsz, H, d, d))
    WqT = jnp.broadcast_to(jnp.swapaxes(params["W_q"], -1, -2), (bsz, H, d, d))
    WkT = jnp.broadcast_to(jnp.swapaxes(params["W_k"], -1, -2), (bsz, H, d, d))
    Wb = jnp.broadcast_to(params["w_b"], (bsz, H, d, 4))
    out = _srwm_core_ref(x, WyT, WqT, WkT, Wb)
    out = jnp.transpose(out, (0, 2, 1, 3)).reshape(bsz, slen, H * d)
    out = jnp.transpose(out, (1, 0, 2))
    proj = jnp.einsum("sbf,of->sbo", out, params["W_out"], precision="highest")
    mean = jnp.mean(h, -1, keepdims=True)
    var = jnp.mean((h - mean) ** 2, -1, keepdims=True)
    ln = (h - mean) / jnp.sqrt(var + 1e-5) * params["ln_gamma"] + params["ln_beta"]
    return ln + proj


# ----------------------------------------------------------------------------
def init_params(key, num_head, dim_head, in_dim, beta_init=-1.0):
    H, d = num_head, dim_head
    std = 1.0 / math.sqrt(d)
    k1, k2, k3, k4, k5 = jax.random.split(key, 5)
    params = {
        "W_y": std * jax.random.normal(k1, (1, H, d, d), jnp.float32),
        "W_q": std * jax.random.normal(k2, (1, H, d, d), jnp.float32),
        "W_k": std * jax.random.normal(k3, (1, H, d, d), jnp.float32),
        "w_b": beta_init + std * jax.random.normal(k4, (1, H, d, 4), jnp.float32),
    }
    bound = 1.0 / math.sqrt(H * d)
    params["W_out"] = jax.random.uniform(
        k5, (in_dim, H * d), jnp.float32, minval=-bound, maxval=bound)
    params["ln_gamma"] = jnp.ones((in_dim,), jnp.float32)
    params["ln_beta"] = jnp.zeros((in_dim,), jnp.float32)
    return params


if __name__ == "__main__":
    num_head, dim_head = 2, 16
    in_dim = num_head * dim_head                        # 32
    slen, bsz = 8, 2

    key = jax.random.PRNGKey(0)
    kp, kh = jax.random.split(key)
    params = init_params(kp, num_head, dim_head, in_dim, beta_init=-1.0)
    h = jax.random.normal(kh, (slen, bsz, in_dim), jnp.float32)

    out = srwm_layer_forward(h, params, num_head, dim_head)
    out = jax.block_until_ready(out)

    ref = srwm_layer_ref(h, params, num_head, dim_head)
    assert out.shape == (slen, bsz, in_dim)
    # bf16 streamed operands (x, q, k, y, W_out) with f32 accumulation and an f32
    # weight-state update; tolerance sized for bf16 rounding over the T-step recurrence.
    assert bool(jnp.allclose(out, ref, atol=3e-2, rtol=3e-2)), "mismatch vs reference"
    print("KERNEL_OK")
</pallas_src>

<mosaic_0001>
module attributes {stable_mosaic.version = 11 : i64} {
  func.func @_srwm_kernel(%arg0: i32, %arg1: memref<8x64xbf16, #tpu.memory_space<vmem>>, %arg2: memref<64x224xf32, #tpu.memory_space<vmem>>, %arg3: memref<128x128xf32, #tpu.memory_space<vmem>>, %arg4: memref<32x224xf32, #tpu.memory_space<vmem>>, %arg5: memref<64x224xf32, #tpu.memory_space<vmem>>, %arg6: memref<8x64xbf16, #tpu.memory_space<vmem>>, %arg7: memref<64x224xf32, #tpu.memory_space<vmem>>) attributes {dimension_semantics = [#tpu.dimension_semantics<parallel>], iteration_bounds = array<i64: 1>, scalar_prefetch = 0 : i64, scratch_operands = 1 : i64, tpu.core_type = #tpu.core_type<tc>, window_params = [{transform_indices = @transform_0, window_bounds = array<i64: 8, 64>}, {pipeline_mode = #tpu.pipeline_mode<synchronous>, transform_indices = @transform_1, window_bounds = array<i64: 64, 224>}, {pipeline_mode = #tpu.pipeline_mode<synchronous>, transform_indices = @transform_2, window_bounds = array<i64: 128, 128>}, {pipeline_mode = #tpu.pipeline_mode<synchronous>, transform_indices = @transform_3, window_bounds = array<i64: 32, 224>}, {pipeline_mode = #tpu.pipeline_mode<synchronous>, transform_indices = @transform_4, window_bounds = array<i64: 64, 224>}, {transform_indices = @transform_5, window_bounds = array<i64: 8, 64>}]} {
    %c0 = arith.constant 0 : index
    %c0_0 = arith.constant 0 : index
    %0 = vector.load %arg2[%c0, %c0_0] : memref<64x224xf32, #tpu.memory_space<vmem>>, vector<64x224xf32>
    %c0_1 = arith.constant 0 : index
    %c0_2 = arith.constant 0 : index
    %1 = vector.load %arg7[%c0_1, %c0_2] : memref<64x224xf32, #tpu.memory_space<vmem>>, vector<64x224xf32>
    tpu.vector_store %arg7[%c0_1, %c0_2], %0 {strides = array<i32>} : memref<64x224xf32, #tpu.memory_space<vmem>>, vector<64x224xf32>,
    %c0_i32 = arith.constant 0 : i32
    %c1_i32 = arith.constant 1 : i32
    %2 = arith.muli %c0_i32, %c1_i32 : i32
    %c0_i32_3 = arith.constant 0 : i32
    %3 = arith.addi %c0_i32_3, %2 : i32
    %c8_i32 = arith.constant 8 : i32
    %4 = arith.muli %3, %c8_i32 : i32
    %5 = tpu.assume_multiple %4, 8 : i32
    %6 = arith.index_cast %5 : i32 to index
    %c0_4 = arith.constant 0 : index
    %7 = vector.load %arg1[%6, %c0_4] : memref<8x64xbf16, #tpu.memory_space<vmem>>, vector<8x64xbf16>
    %c0_5 = arith.constant 0 : index
    %c0_6 = arith.constant 0 : index
    %8 = vector.load %arg7[%c0_5, %c0_6] : memref<64x224xf32, #tpu.memory_space<vmem>>, vector<64x224xf32>
    %9 = arith.truncf %8 : vector<64x224xf32> to vector<64x224xbf16>
    %10 = vector.extract_strided_slice %7 {offsets = [0, 0], sizes = [1, 64], strides = [1, 1]} : vector<8x64xbf16> to vector<1x64xbf16>
    %cst = arith.constant dense<0.000000e+00> : vector<1x224xf32>
    %11 = tpu.matmul %10, %9, %cst {dimension_numbers = #tpu.dot_dimension_numbers<[1], [0], [0], [1], [0, 0, 1, 1], [], []>} : vector<1x64xbf16>, vector<64x224xbf16>, vector<1x224xf32> -> vector<1x224xf32>
    %12 = vector.extract_strided_slice %11 {offsets = [0, 0], sizes = [1, 64], strides = [1, 1]} : vector<1x224xf32> to vector<1x64xf32>
    %13 = vector.extract_strided_slice %11 {offsets = [0, 64], sizes = [1, 128], strides = [1, 1]} : vector<1x224xf32> to vector<1x128xf32>
    %14 = vector.shape_cast %13 : vector<1x128xf32> to vector<1x1x128xf32>
    %cst_7 = arith.constant dense<0xFF800000> : vector<1xf32>
    %15 = vector.multi_reduction <maximumf>, %14, %cst_7 [1, 2] : vector<1x1x128xf32> to vector<1xf32>
    %16 = vector.shape_cast %15 : vector<1xf32> to vector<1x1x1xf32>
    %17 = vector.extract %16[0, 0, 0] : f32 from vector<1x1x1xf32>
    %18 = vector.broadcast %17 : f32 to vector<1x128xf32>
    %19 = arith.subf %13, %18 : vector<1x128xf32>
    %20 = math.exp %19 : vector<1x128xf32>
    %c0_8 = arith.constant 0 : index
    %c0_9 = arith.constant 0 : index
    %21 = vector.load %arg3[%c0_8, %c0_9] : memref<128x128xf32, #tpu.memory_space<vmem>>, vector<128x128xf32>
    %cst_10 = arith.constant dense<0.000000e+00> : vector<1x128xf32>
    %22 = tpu.matmul %20, %21, %cst_10 {dimension_numbers = #tpu.dot_dimension_numbers<[1], [0], [0], [1], [0, 0, 1, 1], [], []>} : vector<1x128xf32>, vector<128x128xf32>, vector<1x128xf32> -> vector<1x128xf32>
    %23 = arith.divf %20, %22 : vector<1x128xf32>
    %24 = vector.extract_strided_slice %23 {offsets = [0, 0], sizes = [1, 64], strides = [1, 1]} : vector<1x128xf32> to vector<1x64xf32>
    %25 = arith.truncf %24 : vector<1x64xf32> to vector<1x64xbf16>
    %26 = vector.extract_strided_slice %23 {offsets = [0, 64], sizes = [1, 64], strides = [1, 1]} : vector<1x128xf32> to vector<1x64xf32>
    %27 = arith.truncf %26 : vector<1x64xf32> to vector<1x64xbf16>
    %cst_11 = arith.constant dense<0.000000e+00> : vector<1x224xf32>
    %28 = tpu.matmul %25, %9, %cst_11 {dimension_numbers = #tpu.dot_dimension_numbers<[1], [0], [0], [1], [0, 0, 1, 1], [], []>} : vector<1x64xbf16>, vector<64x224xbf16>, vector<1x224xf32> -> vector<1x224xf32>
    %cst_12 = arith.constant dense<0.000000e+00> : vector<1x224xf32>
    %29 = tpu.matmul %27, %9, %cst_12 {dimension_numbers = #tpu.dot_dimension_numbers<[1], [0], [0], [1], [0, 0, 1, 1], [], []>} : vector<1x64xbf16>, vector<64x224xbf16>, vector<1x224xf32> -> vector<1x224xf32>
    %30 = vector.extract_strided_slice %11 {offsets = [0, 192], sizes = [1, 32], strides = [1, 1]} : vector<1x224xf32> to vector<1x32xf32>
    %31 = arith.negf %30 : vector<1x32xf32>
    %32 = math.exp %31 : vector<1x32xf32>
    %cst_13 = arith.constant 1.000000e+00 : f32
    %33 = vector.broadcast %cst_13 : f32 to vector<1x32xf32>
    %34 = arith.addf %33, %32 : vector<1x32xf32>
    %35 = arith.divf %33, %34 : vector<1x32xf32>
    %c0_14 = arith.constant 0 : index
    %c0_15 = arith.constant 0 : index
    %36 = vector.load %arg4[%c0_14, %c0_15] : memref<32x224xf32, #tpu.memory_space<vmem>>, vector<32x224xf32>
    %cst_16 = arith.constant dense<0.000000e+00> : vector<1x224xf32>
    %37 = tpu.matmul %35, %36, %cst_16 {dimension_numbers = #tpu.dot_dimension_numbers<[1], [0], [0], [1], [0, 0, 1, 1], [], []>} : vector<1x32xf32>, vector<32x224xf32>, vector<1x224xf32> -> vector<1x224xf32>
    %38 = arith.subf %28, %29 : vector<1x224xf32>
    %39 = arith.mulf %38, %37 : vector<1x224xf32>
    %cst_17 = arith.constant dense<0.000000e+00> : vector<64x224xf32>
    %40 = tpu.matmul %26, %39, %cst_17 {dimension_numbers = #tpu.dot_dimension_numbers<[0], [0], [1], [1], [0, 1, 1, 1], [], []>} : vector<1x64xf32>, vector<1x224xf32>, vector<64x224xf32> -> vector<64x224xf32>
    %c0_18 = arith.constant 0 : index
    %c0_19 = arith.constant 0 : index
    %41 = vector.load %arg5[%c0_18, %c0_19] : memref<64x224xf32, #tpu.memory_space<vmem>>, vector<64x224xf32>
    %42 = arith.mulf %40, %41 : vector<64x224xf32>
    %43 = arith.addf %8, %42 : vector<64x224xf32>
    %c0_20 = arith.constant 0 : index
    %c0_21 = arith.constant 0 : index
    %44 = vector.load %arg7[%c0_20, %c0_21] : memref<64x224xf32, #tpu.memory_space<vmem>>, vector<64x224xf32>
    tpu.vector_store %arg7[%c0_20, %c0_21], %43 {strides = array<i32>} : memref<64x224xf32, #tpu.memory_space<vmem>>, vector<64x224xf32>,
    %c0_22 = arith.constant 0 : index
    %c0_23 = arith.constant 0 : index
    %45 = vector.load %arg7[%c0_22, %c0_23] : memref<64x224xf32, #tpu.memory_space<vmem>>, vector<64x224xf32>
    %46 = arith.truncf %45 : vector<64x224xf32> to vector<64x224xbf16>
    %47 = vector.extract_strided_slice %7 {offsets = [1, 0], sizes = [1, 64], strides = [1, 1]} : vector<8x64xbf16> to vector<1x64xbf16>
    %cst_24 = arith.constant dense<0.000000e+00> : vector<1x224xf32>
    %48 = tpu.matmul %47, %46, %cst_24 {dimension_numbers = #tpu.dot_dimension_numbers<[1], [0], [0], [1], [0, 0, 1, 1], [], []>} : vector<1x64xbf16>, vector<64x224xbf16>, vector<1x224xf32> -> vector<1x224xf32>
    %49 = vector.extract_strided_slice %48 {offsets = [0, 0], sizes = [1, 64], strides = [1, 1]} : vector<1x224xf32> to vector<1x64xf32>
    %50 = vector.extract_strided_slice %48 {offsets = [0, 64], sizes = [1, 128], strides = [1, 1]} : vector<1x224xf32> to vector<1x128xf32>
    %51 = vector.shape_cast %50 : vector<1x128xf32> to vector<1x1x128xf32>
    %cst_25 = arith.constant dense<0xFF800000> : vector<1xf32>
    %52 = vector.multi_reduction <maximumf>, %51, %cst_25 [1, 2] : vector<1x1x128xf32> to vector<1xf32>
    %53 = vector.shape_cast %52 : vector<1xf32> to vector<1x1x1xf32>
    %54 = vector.extract %53[0, 0, 0] : f32 from vector<1x1x1xf32>
    %55 = vector.broadcast %54 : f32 to vector<1x128xf32>
    %56 = arith.subf %50, %55 : vector<1x128xf32>
    %57 = math.exp %56 : vector<1x128xf32>
    %c0_26 = arith.constant 0 : index
    %c0_27 = arith.constant 0 : index
    %58 = vector.load %arg3[%c0_26, %c0_27] : memref<128x128xf32, #tpu.memory_space<vmem>>, vector<128x128xf32>
    %cst_28 = arith.constant dense<0.000000e+00> : vector<1x128xf32>
    %59 = tpu.matmul %57, %58, %cst_28 {dimension_numbers = #tpu.dot_dimension_numbers<[1], [0], [0], [1], [0, 0, 1, 1], [], []>} : vector<1x128xf32>, vector<128x128xf32>, vector<1x128xf32> -> vector<1x128xf32>
    %60 = arith.divf %57, %59 : vector<1x128xf32>
    %61 = vector.extract_strided_slice %60 {offsets = [0, 0], sizes = [1, 64], strides = [1, 1]} : vector<1x128xf32> to vector<1x64xf32>
    %62 = arith.truncf %61 : vector<1x64xf32> to vector<1x64xbf16>
    %63 = vector.extract_strided_slice %60 {offsets = [0, 64], sizes = [1, 64], strides = [1, 1]} : vector<1x128xf32> to vector<1x64xf32>
    %64 = arith.truncf %63 : vector<1x64xf32> to vector<1x64xbf16>
    %cst_29 = arith.constant dense<0.000000e+00> : vector<1x224xf32>
    %65 = tpu.matmul %62, %46, %cst_29 {dimension_numbers = #tpu.dot_dimension_numbers<[1], [0], [0], [1], [0, 0, 1, 1], [], []>} : vector<1x64xbf16>, vector<64x224xbf16>, vector<1x224xf32> -> vector<1x224xf32>
    %cst_30 = arith.constant dense<0.000000e+00> : vector<1x224xf32>
    %66 = tpu.matmul %64, %46, %cst_30 {dimension_numbers = #tpu.dot_dimension_numbers<[1], [0], [0], [1], [0, 0, 1, 1], [], []>} : vector<1x64xbf16>, vector<64x224xbf16>, vector<1x224xf32> -> vector<1x224xf32>
    %67 = vector.extract_strided_slice %48 {offsets = [0, 192], sizes = [1, 32], strides = [1, 1]} : vector<1x224xf32> to vector<1x32xf32>
    %68 = arith.negf %67 : vector<1x32xf32>
    %69 = math.exp %68 : vector<1x32xf32>
    %cst_31 = arith.constant 1.000000e+00 : f32
    %70 = vector.broadcast %cst_31 : f32 to vector<1x32xf32>
    %71 = arith.addf %70, %69 : vector<1x32xf32>
    %72 = arith.divf %70, %71 : vector<1x32xf32>
    %c0_32 = arith.constant 0 : index
    %c0_33 = arith.constant 0 : index
    %73 = vector.load %arg4[%c0_32, %c0_33] : memref<32x224xf32, #tpu.memory_space<vmem>>, vector<32x224xf32>
    %cst_34 = arith.constant dense<0.000000e+00> : vector<1x224xf32>
    %74 = tpu.matmul %72, %73, %cst_34 {dimension_numbers = #tpu.dot_dimension_numbers<[1], [0], [0], [1], [0, 0, 1, 1], [], []>} : vector<1x32xf32>, vector<32x224xf32>, vector<1x224xf32> -> vector<1x224xf32>
    %75 = arith.subf %65, %66 : vector<1x224xf32>
    %76 = arith.mulf %75, %74 : vector<1x224xf32>
    %cst_35 = arith.constant dense<0.000000e+00> : vector<64x224xf32>
    %77 = tpu.matmul %63, %76, %cst_35 {dimension_numbers = #tpu.dot_dimension_numbers<[0], [0], [1], [1], [0, 1, 1, 1], [], []>} : vector<1x64xf32>, vector<1x224xf32>, vector<64x224xf32> -> vector<64x224xf32>
    %c0_36 = arith.constant 0 : index
    %c0_37 = arith.constant 0 : index
    %78 = vector.load %arg5[%c0_36, %c0_37] : memref<64x224xf32, #tpu.memory_space<vmem>>, vector<64x224xf32>
    %79 = arith.mulf %77, %78 : vector<64x224xf32>
    %80 = arith.addf %45, %79 : vector<64x224xf32>
    %c0_38 = arith.constant 0 : index
    %c0_39 = arith.constant 0 : index
    %81 = vector.load %arg7[%c0_38, %c0_39] : memref<64x224xf32, #tpu.memory_space<vmem>>, vector<64x224xf32>
    tpu.vector_store %arg7[%c0_38, %c0_39], %80 {strides = array<i32>} : memref<64x224xf32, #tpu.memory_space<vmem>>, vector<64x224xf32>,
    %c0_40 = arith.constant 0 : index
    %c0_41 = arith.constant 0 : index
    %82 = vector.load %arg7[%c0_40, %c0_41] : memref<64x224xf32, #tpu.memory_space<vmem>>, vector<64x224xf32>
    %83 = arith.truncf %82 : vector<64x224xf32> to vector<64x224xbf16>
    %84 = vector.extract_strided_slice %7 {offsets = [2, 0], sizes = [1, 64], strides = [1, 1]} : vector<8x64xbf16> to vector<1x64xbf16>
    %cst_42 = arith.constant dense<0.000000e+00> : vector<1x224xf32>
    %85 = tpu.matmul %84, %83, %cst_42 {dimension_numbers = #tpu.dot_dimension_numbers<[1], [0], [0], [1], [0, 0, 1, 1], [], []>} : vector<1x64xbf16>, vector<64x224xbf16>, vector<1x224xf32> -> vector<1x224xf32>
    %86 = vector.extract_strided_slice %85 {offsets = [0, 0], sizes = [1, 64], strides = [1, 1]} : vector<1x224xf32> to vector<1x64xf32>
    %87 = vector.extract_strided_slice %85 {offsets = [0, 64], sizes = [1, 128], strides = [1, 1]} : vector<1x224xf32> to vector<1x128xf32>
    %88 = vector.shape_cast %87 : vector<1x128xf32> to vector<1x1x128xf32>
    %cst_43 = arith.constant dense<0xFF800000> : vector<1xf32>
    %89 = vector.multi_reduction <maximumf>, %88, %cst_43 [1, 2] : vector<1x1x128xf32> to vector<1xf32>
    %90 = vector.shape_cast %89 : vector<1xf32> to vector<1x1x1xf32>
    %91 = vector.extract %90[0, 0, 0] : f32 from vector<1x1x1xf32>
    %92 = vector.broadcast %91 : f32 to vector<1x128xf32>
    %93 = arith.subf %87, %92 : vector<1x128xf32>
    %94 = math.exp %93 : vector<1x128xf32>
    %c0_44 = arith.constant 0 : index
    %c0_45 = arith.constant 0 : index
    %95 = vector.load %arg3[%c0_44, %c0_45] : memref<128x128xf32, #tpu.memory_space<vmem>>, vector<128x128xf32>
    %cst_46 = arith.constant dense<0.000000e+00> : vector<1x128xf32>
    %96 = tpu.matmul %94, %95, %cst_46 {dimension_numbers = #tpu.dot_dimension_numbers<[1], [0], [0], [1], [0, 0, 1, 1], [], []>} : vector<1x128xf32>, vector<128x128xf32>, vector<1x128xf32> -> vector<1x128xf32>
    %97 = arith.divf %94, %96 : vector<1x128xf32>
    %98 = vector.extract_strided_slice %97 {offsets = [0, 0], sizes = [1, 64], strides = [1, 1]} : vector<1x128xf32> to vector<1x64xf32>
    %99 = arith.truncf %98 : vector<1x64xf32> to vector<1x64xbf16>
    %100 = vector.extract_strided_slice %97 {offsets = [0, 64], sizes = [1, 64], strides = [1, 1]} : vector<1x128xf32> to vector<1x64xf32>
    %101 = arith.truncf %100 : vector<1x64xf32> to vector<1x64xbf16>
    %cst_47 = arith.constant dense<0.000000e+00> : vector<1x224xf32>
    %102 = tpu.matmul %99, %83, %cst_47 {dimension_numbers = #tpu.dot_dimension_numbers<[1], [0], [0], [1], [0, 0, 1, 1], [], []>} : vector<1x64xbf16>, vector<64x224xbf16>, vector<1x224xf32> -> vector<1x224xf32>
    %cst_48 = arith.constant dense<0.000000e+00> : vector<1x224xf32>
    %103 = tpu.matmul %101, %83, %cst_48 {dimension_numbers = #tpu.dot_dimension_numbers<[1], [0], [0], [1], [0, 0, 1, 1], [], []>} : vector<1x64xbf16>, vector<64x224xbf16>, vector<1x224xf32> -> vector<1x224xf32>
    %104 = vector.extract_strided_slice %85 {offsets = [0, 192], sizes = [1, 32], strides = [1, 1]} : vector<1x224xf32> to vector<1x32xf32>
    %105 = arith.negf %104 : vector<1x32xf32>
    %106 = math.exp %105 : vector<1x32xf32>
    %cst_49 = arith.constant 1.000000e+00 : f32
    %107 = vector.broadcast %cst_49 : f32 to vector<1x32xf32>
    %108 = arith.addf %107, %106 : vector<1x32xf32>
    %109 = arith.divf %107, %108 : vector<1x32xf32>
    %c0_50 = arith.constant 0 : index
    %c0_51 = arith.constant 0 : index
    %110 = vector.load %arg4[%c0_50, %c0_51] : memref<32x224xf32, #tpu.memory_space<vmem>>, vector<32x224xf32>
    %cst_52 = arith.constant dense<0.000000e+00> : vector<1x224xf32>
    %111 = tpu.matmul %109, %110, %cst_52 {dimension_numbers = #tpu.dot_dimension_numbers<[1], [0], [0], [1], [0, 0, 1, 1], [], []>} : vector<1x32xf32>, vector<32x224xf32>, vector<1x224xf32> -> vector<1x224xf32>
    %112 = arith.subf %102, %103 : vector<1x224xf32>
    %113 = arith.mulf %112, %111 : vector<1x224xf32>
    %cst_53 = arith.constant dense<0.000000e+00> : vector<64x224xf32>
    %114 = tpu.matmul %100, %113, %cst_53 {dimension_numbers = #tpu.dot_dimension_numbers<[0], [0], [1], [1], [0, 1, 1, 1], [], []>} : vector<1x64xf32>, vector<1x224xf32>, vector<64x224xf32> -> vector<64x224xf32>
    %c0_54 = arith.constant 0 : index
    %c0_55 = arith.constant 0 : index
    %115 = vector.load %arg5[%c0_54, %c0_55] : memref<64x224xf32, #tpu.memory_space<vmem>>, vector<64x224xf32>
    %116 = arith.mulf %114, %115 : vector<64x224xf32>
    %117 = arith.addf %82, %116 : vector<64x224xf32>
    %c0_56 = arith.constant 0 : index
    %c0_57 = arith.constant 0 : index
    %118 = vector.load %arg7[%c0_56, %c0_57] : memref<64x224xf32, #tpu.memory_space<vmem>>, vector<64x224xf32>
    tpu.vector_store %arg7[%c0_56, %c0_57], %117 {strides = array<i32>} : memref<64x224xf32, #tpu.memory_space<vmem>>, vector<64x224xf32>,
    %c0_58 = arith.constant 0 : index
    %c0_59 = arith.constant 0 : index
    %119 = vector.load %arg7[%c0_58, %c0_59] : memref<64x224xf32, #tpu.memory_space<vmem>>, vector<64x224xf32>
    %120 = arith.truncf %119 : vector<64x224xf32> to vector<64x224xbf16>
    %121 = vector.extract_strided_slice %7 {offsets = [3, 0], sizes = [1, 64], strides = [1, 1]} : vector<8x64xbf16> to vector<1x64xbf16>
    %cst_60 = arith.constant dense<0.000000e+00> : vector<1x224xf32>
    %122 = tpu.matmul %121, %120, %cst_60 {dimension_numbers = #tpu.dot_dimension_numbers<[1], [0], [0], [1], [0, 0, 1, 1], [], []>} : vector<1x64xbf16>, vector<64x224xbf16>, vector<1x224xf32> -> vector<1x224xf32>
    %123 = vector.extract_strided_slice %122 {offsets = [0, 0], sizes = [1, 64], strides = [1, 1]} : vector<1x224xf32> to vector<1x64xf32>
    %124 = vector.extract_strided_slice %122 {offsets = [0, 64], sizes = [1, 128], strides = [1, 1]} : vector<1x224xf32> to vector<1x128xf32>
    %125 = vector.shape_cast %124 : vector<1x128xf32> to vector<1x1x128xf32>
    %cst_61 = arith.constant dense<0xFF800000> : vector<1xf32>
    %126 = vector.multi_reduction <maximumf>, %125, %cst_61 [1, 2] : vector<1x1x128xf32> to vector<1xf32>
    %127 = vector.shape_cast %126 : vector<1xf32> to vector<1x1x1xf32>
    %128 = vector.extract %127[0, 0, 0] : f32 from vector<1x1x1xf32>
    %129 = vector.broadcast %128 : f32 to vector<1x128xf32>
    %130 = arith.subf %124, %129 : vector<1x128xf32>
    %131 = math.exp %130 : vector<1x128xf32>
    %c0_62 = arith.constant 0 : index
    %c0_63 = arith.constant 0 : index
    %132 = vector.load %arg3[%c0_62, %c0_63] : memref<128x128xf32, #tpu.memory_space<vmem>>, vector<128x128xf32>
    %cst_64 = arith.constant dense<0.000000e+00> : vector<1x128xf32>
    %133 = tpu.matmul %131, %132, %cst_64 {dimension_numbers = #tpu.dot_dimension_numbers<[1], [0], [0], [1], [0, 0, 1, 1], [], []>} : vector<1x128xf32>, vector<128x128xf32>, vector<1x128xf32> -> vector<1x128xf32>
    %134 = arith.divf %131, %133 : vector<1x128xf32>
    %135 = vector.extract_strided_slice %134 {offsets = [0, 0], sizes = [1, 64], strides = [1, 1]} : vector<1x128xf32> to vector<1x64xf32>
    %136 = arith.truncf %135 : vector<1x64xf32> to vector<1x64xbf16>
    %137 = vector.extract_strided_slice %134 {offsets = [0, 64], sizes = [1, 64], strides = [1, 1]} : vector<1x128xf32> to vector<1x64xf32>
    %138 = arith.truncf %137 : vector<1x64xf32> to vector<1x64xbf16>
    %cst_65 = arith.constant dense<0.000000e+00> : vector<1x224xf32>
    %139 = tpu.matmul %136, %120, %cst_65 {dimension_numbers = #tpu.dot_dimension_numbers<[1], [0], [0], [1], [0, 0, 1, 1], [], []>} : vector<1x64xbf16>, vector<64x224xbf16>, vector<1x224xf32> -> vector<1x224xf32>
    %cst_66 = arith.constant dense<0.000000e+00> : vector<1x224xf32>
    %140 = tpu.matmul %138, %120, %cst_66 {dimension_numbers = #tpu.dot_dimension_numbers<[1], [0], [0], [1], [0, 0, 1, 1], [], []>} : vector<1x64xbf16>, vector<64x224xbf16>, vector<1x224xf32> -> vector<1x224xf32>
    %141 = vector.extract_strided_slice %122 {offsets = [0, 192], sizes = [1, 32], strides = [1, 1]} : vector<1x224xf32> to vector<1x32xf32>
    %142 = arith.negf %141 : vector<1x32xf32>
    %143 = math.exp %142 : vector<1x32xf32>
    %cst_67 = arith.constant 1.000000e+00 : f32
    %144 = vector.broadcast %cst_67 : f32 to vector<1x32xf32>
    %145 = arith.addf %144, %143 : vector<1x32xf32>
    %146 = arith.divf %144, %145 : vector<1x32xf32>
    %c0_68 = arith.constant 0 : index
    %c0_69 = arith.constant 0 : index
    %147 = vector.load %arg4[%c0_68, %c0_69] : memref<32x224xf32, #tpu.memory_space<vmem>>, vector<32x224xf32>
    %cst_70 = arith.constant dense<0.000000e+00> : vector<1x224xf32>
    %148 = tpu.matmul %146, %147, %cst_70 {dimension_numbers = #tpu.dot_dimension_numbers<[1], [0], [0], [1], [0, 0, 1, 1], [], []>} : vector<1x32xf32>, vector<32x224xf32>, vector<1x224xf32> -> vector<1x224xf32>
    %149 = arith.subf %139, %140 : vector<1x224xf32>
    %150 = arith.mulf %149, %148 : vector<1x224xf32>
    %cst_71 = arith.constant dense<0.000000e+00> : vector<64x224xf32>
    %151 = tpu.matmul %137, %150, %cst_71 {dimension_numbers = #tpu.dot_dimension_numbers<[0], [0], [1], [1], [0, 1, 1, 1], [], []>} : vector<1x64xf32>, vector<1x224xf32>, vector<64x224xf32> -> vector<64x224xf32>
    %c0_72 = arith.constant 0 : index
    %c0_73 = arith.constant 0 : index
    %152 = vector.load %arg5[%c0_72, %c0_73] : memref<64x224xf32, #tpu.memory_space<vmem>>, vector<64x224xf32>
    %153 = arith.mulf %151, %152 : vector<64x224xf32>
    %154 = arith.addf %119, %153 : vector<64x224xf32>
    %c0_74 = arith.constant 0 : index
    %c0_75 = arith.constant 0 : index
    %155 = vector.load %arg7[%c0_74, %c0_75] : memref<64x224xf32, #tpu.memory_space<vmem>>, vector<64x224xf32>
    tpu.vector_store %arg7[%c0_74, %c0_75], %154 {strides = array<i32>} : memref<64x224xf32, #tpu.memory_space<vmem>>, vector<64x224xf32>,
    %c0_76 = arith.constant 0 : index
    %c0_77 = arith.constant 0 : index
    %156 = vector.load %arg7[%c0_76, %c0_77] : memref<64x224xf32, #tpu.memory_space<vmem>>, vector<64x224xf32>
    %157 = arith.truncf %156 : vector<64x224xf32> to vector<64x224xbf16>
    %158 = vector.extract_strided_slice %7 {offsets = [4, 0], sizes = [1, 64], strides = [1, 1]} : vector<8x64xbf16> to vector<1x64xbf16>
    %cst_78 = arith.constant dense<0.000000e+00> : vector<1x224xf32>
    %159 = tpu.matmul %158, %157, %cst_78 {dimension_numbers = #tpu.dot_dimension_numbers<[1], [0], [0], [1], [0, 0, 1, 1], [], []>} : vector<1x64xbf16>, vector<64x224xbf16>, vector<1x224xf32> -> vector<1x224xf32>
    %160 = vector.extract_strided_slice %159 {offsets = [0, 0], sizes = [1, 64], strides = [1, 1]} : vector<1x224xf32> to vector<1x64xf32>
    %161 = vector.extract_strided_slice %159 {offsets = [0, 64], sizes = [1, 128], strides = [1, 1]} : vector<1x224xf32> to vector<1x128xf32>
    %162 = vector.shape_cast %161 : vector<1x128xf32> to vector<1x1x128xf32>
    %cst_79 = arith.constant dense<0xFF800000> : vector<1xf32>
    %163 = vector.multi_reduction <maximumf>, %162, %cst_79 [1, 2] : vector<1x1x128xf32> to vector<1xf32>
    %164 = vector.shape_cast %163 : vector<1xf32> to vector<1x1x1xf32>
    %165 = vector.extract %164[0, 0, 0] : f32 from vector<1x1x1xf32>
    %166 = vector.broadcast %165 : f32 to vector<1x128xf32>
    %167 = arith.subf %161, %166 : vector<1x128xf32>
    %168 = math.exp %167 : vector<1x128xf32>
    %c0_80 = arith.constant 0 : index
    %c0_81 = arith.constant 0 : index
    %169 = vector.load %arg3[%c0_80, %c0_81] : memref<128x128xf32, #tpu.memory_space<vmem>>, vector<128x128xf32>
    %cst_82 = arith.constant dense<0.000000e+00> : vector<1x128xf32>
    %170 = tpu.matmul %168, %169, %cst_82 {dimension_numbers = #tpu.dot_dimension_numbers<[1], [0], [0], [1], [0, 0, 1, 1], [], []>} : vector<1x128xf32>, vector<128x128xf32>, vector<1x128xf32> -> vector<1x128xf32>
    %171 = arith.divf %168, %170 : vector<1x128xf32>
    %172 = vector.extract_strided_slice %171 {offsets = [0, 0], sizes = [1, 64], strides = [1, 1]} : vector<1x128xf32> to vector<1x64xf32>
    %173 = arith.truncf %172 : vector<1x64xf32> to vector<1x64xbf16>
    %174 = vector.extract_strided_slice %171 {offsets = [0, 64], sizes = [1, 64], strides = [1, 1]} : vector<1x128xf32> to vector<1x64xf32>
    %175 = arith.truncf %174 : vector<1x64xf32> to vector<1x64xbf16>
    %cst_83 = arith.constant dense<0.000000e+00> : vector<1x224xf32>
    %176 = tpu.matmul %173, %157, %cst_83 {dimension_numbers = #tpu.dot_dimension_numbers<[1], [0], [0], [1], [0, 0, 1, 1], [], []>} : vector<1x64xbf16>, vector<64x224xbf16>, vector<1x224xf32> -> vector<1x224xf32>
    %cst_84 = arith.constant dense<0.000000e+00> : vector<1x224xf32>
    %177 = tpu.matmul %175, %157, %cst_84 {dimension_numbers = #tpu.dot_dimension_numbers<[1], [0], [0], [1], [0, 0, 1, 1], [], []>} : vector<1x64xbf16>, vector<64x224xbf16>, vector<1x224xf32> -> vector<1x224xf32>
    %178 = vector.extract_strided_slice %159 {offsets = [0, 192], sizes = [1, 32], strides = [1, 1]} : vector<1x224xf32> to vector<1x32xf32>
    %179 = arith.negf %178 : vector<1x32xf32>
    %180 = math.exp %179 : vector<1x32xf32>
    %cst_85 = arith.constant 1.000000e+00 : f32
    %181 = vector.broadcast %cst_85 : f32 to vector<1x32xf32>
    %182 = arith.addf %181, %180 : vector<1x32xf32>
    %183 = arith.divf %181, %182 : vector<1x32xf32>
    %c0_86 = arith.constant 0 : index
    %c0_87 = arith.constant 0 : index
    %184 = vector.load %arg4[%c0_86, %c0_87] : memref<32x224xf32, #tpu.memory_space<vmem>>, vector<32x224xf32>
    %cst_88 = arith.constant dense<0.000000e+00> : vector<1x224xf32>
    %185 = tpu.matmul %183, %184, %cst_88 {dimension_numbers = #tpu.dot_dimension_numbers<[1], [0], [0], [1], [0, 0, 1, 1], [], []>} : vector<1x32xf32>, vector<32x224xf32>, vector<1x224xf32> -> vector<1x224xf32>
    %186 = arith.subf %176, %177 : vector<1x224xf32>
    %187 = arith.mulf %186, %185 : vector<1x224xf32>
    %cst_89 = arith.constant dense<0.000000e+00> : vector<64x224xf32>
    %188 = tpu.matmul %174, %187, %cst_89 {dimension_numbers = #tpu.dot_dimension_numbers<[0], [0], [1], [1], [0, 1, 1, 1], [], []>} : vector<1x64xf32>, vector<1x224xf32>, vector<64x224xf32> -> vector<64x224xf32>
    %c0_90 = arith.constant 0 : index
    %c0_91 = arith.constant 0 : index
    %189 = vector.load %arg5[%c0_90, %c0_91] : memref<64x224xf32, #tpu.memory_space<vmem>>, vector<64x224xf32>
    %190 = arith.mulf %188, %189 : vector<64x224xf32>
    %191 = arith.addf %156, %190 : vector<64x224xf32>
    %c0_92 = arith.constant 0 : index
    %c0_93 = arith.constant 0 : index
    %192 = vector.load %arg7[%c0_92, %c0_93] : memref<64x224xf32, #tpu.memory_space<vmem>>, vector<64x224xf32>
    tpu.vector_store %arg7[%c0_92, %c0_93], %191 {strides = array<i32>} : memref<64x224xf32, #tpu.memory_space<vmem>>, vector<64x224xf32>,
    %c0_94 = arith.constant 0 : index
    %c0_95 = arith.constant 0 : index
    %193 = vector.load %arg7[%c0_94, %c0_95] : memref<64x224xf32, #tpu.memory_space<vmem>>, vector<64x224xf32>
    %194 = arith.truncf %193 : vector<64x224xf32> to vector<64x224xbf16>
    %195 = vector.extract_strided_slice %7 {offsets = [5, 0], sizes = [1, 64], strides = [1, 1]} : vector<8x64xbf16> to vector<1x64xbf16>
    %cst_96 = arith.constant dense<0.000000e+00> : vector<1x224xf32>
    %196 = tpu.matmul %195, %194, %cst_96 {dimension_numbers = #tpu.dot_dimension_numbers<[1], [0], [0], [1], [0, 0, 1, 1], [], []>} : vector<1x64xbf16>, vector<64x224xbf16>, vector<1x224xf32> -> vector<1x224xf32>
    %197 = vector.extract_strided_slice %196 {offsets = [0, 0], sizes = [1, 64], strides = [1, 1]} : vector<1x224xf32> to vector<1x64xf32>
    %198 = vector.extract_strided_slice %196 {offsets = [0, 64], sizes = [1, 128], strides = [1, 1]} : vector<1x224xf32> to vector<1x128xf32>
    %199 = vector.shape_cast %198 : vector<1x128xf32> to vector<1x1x128xf32>
    %cst_97 = arith.constant dense<0xFF800000> : vector<1xf32>
    %200 = vector.multi_reduction <maximumf>, %199, %cst_97 [1, 2] : vector<1x1x128xf32> to vector<1xf32>
    %201 = vector.shape_cast %200 : vector<1xf32> to vector<1x1x1xf32>
    %202 = vector.extract %201[0, 0, 0] : f32 from vector<1x1x1xf32>
    %203 = vector.broadcast %202 : f32 to vector<1x128xf32>
    %204 = arith.subf %198, %203 : vector<1x128xf32>
    %205 = math.exp %204 : vector<1x128xf32>
    %c0_98 = arith.constant 0 : index
    %c0_99 = arith.constant 0 : index
    %206 = vector.load %arg3[%c0_98, %c0_99] : memref<128x128xf32, #tpu.memory_space<vmem>>, vector<128x128xf32>
    %cst_100 = arith.constant dense<0.000000e+00> : vector<1x128xf32>
    %207 = tpu.matmul %205, %206, %cst_100 {dimension_numbers = #tpu.dot_dimension_numbers<[1], [0], [0], [1], [0, 0, 1, 1], [], []>} : vector<1x128xf32>, vector<128x128xf32>, vector<1x128xf32> -> vector<1x128xf32>
    %208 = arith.divf %205, %207 : vector<1x128xf32>
    %209 = vector.extract_strided_slice %208 {offsets = [0, 0], sizes = [1, 64], strides = [1, 1]} : vector<1x128xf32> to vector<1x64xf32>
    %210 = arith.truncf %209 : vector<1x64xf32> to vector<1x64xbf16>
    %211 = vector.extract_strided_slice %208 {offsets = [0, 64], sizes = [1, 64], strides = [1, 1]} : vector<1x128xf32> to vector<1x64xf32>
    %212 = arith.truncf %211 : vector<1x64xf32> to vector<1x64xbf16>
    %cst_101 = arith.constant dense<0.000000e+00> : vector<1x224xf32>
    %213 = tpu.matmul %210, %194, %cst_101 {dimension_numbers = #tpu.dot_dimension_numbers<[1], [0], [0], [1], [0, 0, 1, 1], [], []>} : vector<1x64xbf16>, vector<64x224xbf16>, vector<1x224xf32> -> vector<1x224xf32>
    %cst_102 = arith.constant dense<0.000000e+00> : vector<1x224xf32>
    %214 = tpu.matmul %212, %194, %cst_102 {dimension_numbers = #tpu.dot_dimension_numbers<[1], [0], [0], [1], [0, 0, 1, 1], [], []>} : vector<1x64xbf16>, vector<64x224xbf16>, vector<1x224xf32> -> vector<1x224xf32>
    %215 = vector.extract_strided_slice %196 {offsets = [0, 192], sizes = [1, 32], strides = [1, 1]} : vector<1x224xf32> to vector<1x32xf32>
    %216 = arith.negf %215 : vector<1x32xf32>
    %217 = math.exp %216 : vector<1x32xf32>
    %cst_103 = arith.constant 1.000000e+00 : f32
    %218 = vector.broadcast %cst_103 : f32 to vector<1x32xf32>
    %219 = arith.addf %218, %217 : vector<1x32xf32>
    %220 = arith.divf %218, %219 : vector<1x32xf32>
    %c0_104 = arith.constant 0 : index
    %c0_105 = arith.constant 0 : index
    %221 = vector.load %arg4[%c0_104, %c0_105] : memref<32x224xf32, #tpu.memory_space<vmem>>, vector<32x224xf32>
    %cst_106 = arith.constant dense<0.000000e+00> : vector<1x224xf32>
    %222 = tpu.matmul %220, %221, %cst_106 {dimension_numbers = #tpu.dot_dimension_numbers<[1], [0], [0], [1], [0, 0, 1, 1], [], []>} : vector<1x32xf32>, vector<32x224xf32>, vector<1x224xf32> -> vector<1x224xf32>
    %223 = arith.subf %213, %214 : vector<1x224xf32>
    %224 = arith.mulf %223, %222 : vector<1x224xf32>
    %cst_107 = arith.constant dense<0.000000e+00> : vector<64x224xf32>
    %225 = tpu.matmul %211, %224, %cst_107 {dimension_numbers = #tpu.dot_dimension_numbers<[0], [0], [1], [1], [0, 1, 1, 1], [], []>} : vector<1x64xf32>, vector<1x224xf32>, vector<64x224xf32> -> vector<64x224xf32>
    %c0_108 = arith.constant 0 : index
    %c0_109 = arith.constant 0 : index
    %226 = vector.load %arg5[%c0_108, %c0_109] : memref<64x224xf32, #tpu.memory_space<vmem>>, vector<64x224xf32>
    %227 = arith.mulf %225, %226 : vector<64x224xf32>
    %228 = arith.addf %193, %227 : vector<64x224xf32>
    %c0_110 = arith.constant 0 : index
    %c0_111 = arith.constant 0 : index
    %229 = vector.load %arg7[%c0_110, %c0_111] : memref<64x224xf32, #tpu.memory_space<vmem>>, vector<64x224xf32>
    tpu.vector_store %arg7[%c0_110, %c0_111], %228 {strides = array<i32>} : memref<64x224xf32, #tpu.memory_space<vmem>>, vector<64x224xf32>,
    %c0_112 = arith.constant 0 : index
    %c0_113 = arith.constant 0 : index
    %230 = vector.load %arg7[%c0_112, %c0_113] : memref<64x224xf32, #tpu.memory_space<vmem>>, vector<64x224xf32>
    %231 = arith.truncf %230 : vector<64x224xf32> to vector<64x224xbf16>
    %232 = vector.extract_strided_slice %7 {offsets = [6, 0], sizes = [1, 64], strides = [1, 1]} : vector<8x64xbf16> to vector<1x64xbf16>
    %cst_114 = arith.constant dense<0.000000e+00> : vector<1x224xf32>
    %233 = tpu.matmul %232, %231, %cst_114 {dimension_numbers = #tpu.dot_dimension_numbers<[1], [0], [0], [1], [0, 0, 1, 1], [], []>} : vector<1x64xbf16>, vector<64x224xbf16>, vector<1x224xf32> -> vector<1x224xf32>
    %234 = vector.extract_strided_slice %233 {offsets = [0, 0], sizes = [1, 64], strides = [1, 1]} : vector<1x224xf32> to vector<1x64xf32>
    %235 = vector.extract_strided_slice %233 {offsets = [0, 64], sizes = [1, 128], strides = [1, 1]} : vector<1x224xf32> to vector<1x128xf32>
    %236 = vector.shape_cast %235 : vector<1x128xf32> to vector<1x1x128xf32>
    %cst_115 = arith.constant dense<0xFF800000> : vector<1xf32>
    %237 = vector.multi_reduction <maximumf>, %236, %cst_115 [1, 2] : vector<1x1x128xf32> to vector<1xf32>
    %238 = vector.shape_cast %237 : vector<1xf32> to vector<1x1x1xf32>
    %239 = vector.extract %238[0, 0, 0] : f32 from vector<1x1x1xf32>
    %240 = vector.broadcast %239 : f32 to vector<1x128xf32>
    %241 = arith.subf %235, %240 : vector<1x128xf32>
    %242 = math.exp %241 : vector<1x128xf32>
    %c0_116 = arith.constant 0 : index
    %c0_117 = arith.constant 0 : index
    %243 = vector.load %arg3[%c0_116, %c0_117] : memref<128x128xf32, #tpu.memory_space<vmem>>, vector<128x128xf32>
    %cst_118 = arith.constant dense<0.000000e+00> : vector<1x128xf32>
    %244 = tpu.matmul %242, %243, %cst_118 {dimension_numbers = #tpu.dot_dimension_numbers<[1], [0], [0], [1], [0, 0, 1, 1], [], []>} : vector<1x128xf32>, vector<128x128xf32>, vector<1x128xf32> -> vector<1x128xf32>
    %245 = arith.divf %242, %244 : vector<1x128xf32>
    %246 = vector.extract_strided_slice %245 {offsets = [0, 0], sizes = [1, 64], strides = [1, 1]} : vector<1x128xf32> to vector<1x64xf32>
    %247 = arith.truncf %246 : vector<1x64xf32> to vector<1x64xbf16>
    %248 = vector.extract_strided_slice %245 {offsets = [0, 64], sizes = [1, 64], strides = [1, 1]} : vector<1x128xf32> to vector<1x64xf32>
    %249 = arith.truncf %248 : vector<1x64xf32> to vector<1x64xbf16>
    %cst_119 = arith.constant dense<0.000000e+00> : vector<1x224xf32>
    %250 = tpu.matmul %247, %231, %cst_119 {dimension_numbers = #tpu.dot_dimension_numbers<[1], [0], [0], [1], [0, 0, 1, 1], [], []>} : vector<1x64xbf16>, vector<64x224xbf16>, vector<1x224xf32> -> vector<1x224xf32>
    %cst_120 = arith.constant dense<0.000000e+00> : vector<1x224xf32>
    %251 = tpu.matmul %249, %231, %cst_120 {dimension_numbers = #tpu.dot_dimension_numbers<[1], [0], [0], [1], [0, 0, 1, 1], [], []>} : vector<1x64xbf16>, vector<64x224xbf16>, vector<1x224xf32> -> vector<1x224xf32>
    %252 = vector.extract_strided_slice %233 {offsets = [0, 192], sizes = [1, 32], strides = [1, 1]} : vector<1x224xf32> to vector<1x32xf32>
    %253 = arith.negf %252 : vector<1x32xf32>
    %254 = math.exp %253 : vector<1x32xf32>
    %cst_121 = arith.constant 1.000000e+00 : f32
    %255 = vector.broadcast %cst_121 : f32 to vector<1x32xf32>
    %256 = arith.addf %255, %254 : vector<1x32xf32>
    %257 = arith.divf %255, %256 : vector<1x32xf32>
    %c0_122 = arith.constant 0 : index
    %c0_123 = arith.constant 0 : index
    %258 = vector.load %arg4[%c0_122, %c0_123] : memref<32x224xf32, #tpu.memory_space<vmem>>, vector<32x224xf32>
    %cst_124 = arith.constant dense<0.000000e+00> : vector<1x224xf32>
    %259 = tpu.matmul %257, %258, %cst_124 {dimension_numbers = #tpu.dot_dimension_numbers<[1], [0], [0], [1], [0, 0, 1, 1], [], []>} : vector<1x32xf32>, vector<32x224xf32>, vector<1x224xf32> -> vector<1x224xf32>
    %260 = arith.subf %250, %251 : vector<1x224xf32>
    %261 = arith.mulf %260, %259 : vector<1x224xf32>
    %cst_125 = arith.constant dense<0.000000e+00> : vector<64x224xf32>
    %262 = tpu.matmul %248, %261, %cst_125 {dimension_numbers = #tpu.dot_dimension_numbers<[0], [0], [1], [1], [0, 1, 1, 1], [], []>} : vector<1x64xf32>, vector<1x224xf32>, vector<64x224xf32> -> vector<64x224xf32>
    %c0_126 = arith.constant 0 : index
    %c0_127 = arith.constant 0 : index
    %263 = vector.load %arg5[%c0_126, %c0_127] : memref<64x224xf32, #tpu.memory_space<vmem>>, vector<64x224xf32>
    %264 = arith.mulf %262, %263 : vector<64x224xf32>
    %265 = arith.addf %230, %264 : vector<64x224xf32>
    %c0_128 = arith.constant 0 : index
    %c0_129 = arith.constant 0 : index
    %266 = vector.load %arg7[%c0_128, %c0_129] : memref<64x224xf32, #tpu.memory_space<vmem>>, vector<64x224xf32>
    tpu.vector_store %arg7[%c0_128, %c0_129], %265 {strides = array<i32>} : memref<64x224xf32, #tpu.memory_space<vmem>>, vector<64x224xf32>,
    %c0_130 = arith.constant 0 : index
    %c0_131 = arith.constant 0 : index
    %267 = vector.load %arg7[%c0_130, %c0_131] : memref<64x224xf32, #tpu.memory_space<vmem>>, vector<64x224xf32>
    %268 = arith.truncf %267 : vector<64x224xf32> to vector<64x224xbf16>
    %269 = vector.extract_strided_slice %7 {offsets = [7, 0], sizes = [1, 64], strides = [1, 1]} : vector<8x64xbf16> to vector<1x64xbf16>
    %cst_132 = arith.constant dense<0.000000e+00> : vector<1x224xf32>
    %270 = tpu.matmul %269, %268, %cst_132 {dimension_numbers = #tpu.dot_dimension_numbers<[1], [0], [0], [1], [0, 0, 1, 1], [], []>} : vector<1x64xbf16>, vector<64x224xbf16>, vector<1x224xf32> -> vector<1x224xf32>
    %271 = vector.extract_strided_slice %270 {offsets = [0, 0], sizes = [1, 64], strides = [1, 1]} : vector<1x224xf32> to vector<1x64xf32>
    %272 = vector.extract_strided_slice %270 {offsets = [0, 64], sizes = [1, 128], strides = [1, 1]} : vector<1x224xf32> to vector<1x128xf32>
    %273 = vector.shape_cast %272 : vector<1x128xf32> to vector<1x1x128xf32>
    %cst_133 = arith.constant dense<0xFF800000> : vector<1xf32>
    %274 = vector.multi_reduction <maximumf>, %273, %cst_133 [1, 2] : vector<1x1x128xf32> to vector<1xf32>
    %275 = vector.shape_cast %274 : vector<1xf32> to vector<1x1x1xf32>
    %276 = vector.extract %275[0, 0, 0] : f32 from vector<1x1x1xf32>
    %277 = vector.broadcast %276 : f32 to vector<1x128xf32>
    %278 = arith.subf %272, %277 : vector<1x128xf32>
    %279 = math.exp %278 : vector<1x128xf32>
    %c0_134 = arith.constant 0 : index
    %c0_135 = arith.constant 0 : index
    %280 = vector.load %arg3[%c0_134, %c0_135] : memref<128x128xf32, #tpu.memory_space<vmem>>, vector<128x128xf32>
    %cst_136 = arith.constant dense<0.000000e+00> : vector<1x128xf32>
    %281 = tpu.matmul %279, %280, %cst_136 {dimension_numbers = #tpu.dot_dimension_numbers<[1], [0], [0], [1], [0, 0, 1, 1], [], []>} : vector<1x128xf32>, vector<128x128xf32>, vector<1x128xf32> -> vector<1x128xf32>
    %282 = arith.divf %279, %281 : vector<1x128xf32>
    %283 = vector.extract_strided_slice %282 {offsets = [0, 0], sizes = [1, 64], strides = [1, 1]} : vector<1x128xf32> to vector<1x64xf32>
    %284 = arith.truncf %283 : vector<1x64xf32> to vector<1x64xbf16>
    %285 = vector.extract_strided_slice %282 {offsets = [0, 64], sizes = [1, 64], strides = [1, 1]} : vector<1x128xf32> to vector<1x64xf32>
    %286 = arith.truncf %285 : vector<1x64xf32> to vector<1x64xbf16>
    %cst_137 = arith.constant dense<0.000000e+00> : vector<1x224xf32>
    %287 = tpu.matmul %284, %268, %cst_137 {dimension_numbers = #tpu.dot_dimension_numbers<[1], [0], [0], [1], [0, 0, 1, 1], [], []>} : vector<1x64xbf16>, vector<64x224xbf16>, vector<1x224xf32> -> vector<1x224xf32>
    %cst_138 = arith.constant dense<0.000000e+00> : vector<1x224xf32>
    %288 = tpu.matmul %286, %268, %cst_138 {dimension_numbers = #tpu.dot_dimension_numbers<[1], [0], [0], [1], [0, 0, 1, 1], [], []>} : vector<1x64xbf16>, vector<64x224xbf16>, vector<1x224xf32> -> vector<1x224xf32>
    %289 = vector.extract_strided_slice %270 {offsets = [0, 192], sizes = [1, 32], strides = [1, 1]} : vector<1x224xf32> to vector<1x32xf32>
    %290 = arith.negf %289 : vector<1x32xf32>
    %291 = math.exp %290 : vector<1x32xf32>
    %cst_139 = arith.constant 1.000000e+00 : f32
    %292 = vector.broadcast %cst_139 : f32 to vector<1x32xf32>
    %293 = arith.addf %292, %291 : vector<1x32xf32>
    %294 = arith.divf %292, %293 : vector<1x32xf32>
    %c0_140 = arith.constant 0 : index
    %c0_141 = arith.constant 0 : index
    %295 = vector.load %arg4[%c0_140, %c0_141] : memref<32x224xf32, #tpu.memory_space<vmem>>, vector<32x224xf32>
    %cst_142 = arith.constant dense<0.000000e+00> : vector<1x224xf32>
    %296 = tpu.matmul %294, %295, %cst_142 {dimension_numbers = #tpu.dot_dimension_numbers<[1], [0], [0], [1], [0, 0, 1, 1], [], []>} : vector<1x32xf32>, vector<32x224xf32>, vector<1x224xf32> -> vector<1x224xf32>
    %297 = arith.subf %287, %288 : vector<1x224xf32>
    %298 = arith.mulf %297, %296 : vector<1x224xf32>
    %cst_143 = arith.constant dense<0.000000e+00> : vector<64x224xf32>
    %299 = tpu.matmul %285, %298, %cst_143 {dimension_numbers = #tpu.dot_dimension_numbers<[0], [0], [1], [1], [0, 1, 1, 1], [], []>} : vector<1x64xf32>, vector<1x224xf32>, vector<64x224xf32> -> vector<64x224xf32>
    %c0_144 = arith.constant 0 : index
    %c0_145 = arith.constant 0 : index
    %300 = vector.load %arg5[%c0_144, %c0_145] : memref<64x224xf32, #tpu.memory_space<vmem>>, vector<64x224xf32>
    %301 = arith.mulf %299, %300 : vector<64x224xf32>
    %302 = arith.addf %267, %301 : vector<64x224xf32>
    %c0_146 = arith.constant 0 : index
    %c0_147 = arith.constant 0 : index
    %303 = vector.load %arg7[%c0_146, %c0_147] : memref<64x224xf32, #tpu.memory_space<vmem>>, vector<64x224xf32>
    tpu.vector_store %arg7[%c0_146, %c0_147], %302 {strides = array<i32>} : memref<64x224xf32, #tpu.memory_space<vmem>>, vector<64x224xf32>,
    %304 = tpu.concatenate %12, %49, %86, %123, %160, %197, %234, %271 in 0 : vector<1x64xf32>, vector<1x64xf32>, vector<1x64xf32>, vector<1x64xf32>, vector<1x64xf32>, vector<1x64xf32>, vector<1x64xf32>, vector<1x64xf32> -> vector<8x64xf32>
    %305 = arith.truncf %304 : vector<8x64xf32> to vector<8x64xbf16>
    %306 = arith.index_cast %5 : i32 to index
    %c0_148 = arith.constant 0 : index
    %307 = vector.load %arg6[%306, %c0_148] : memref<8x64xbf16, #tpu.memory_space<vmem>>, vector<8x64xbf16>
    tpu.vector_store %arg6[%306, %c0_148], %305 {strides = array<i32>} : memref<8x64xbf16, #tpu.memory_space<vmem>>, vector<8x64xbf16>,
    %c1_i32_149 = arith.constant 1 : i32
    return
  }
  func.func @transform_0(%arg0: i32) -> (i32, i32) {
    %c0_i32 = arith.constant 0 : i32
    %c0_i32_0 = arith.constant 0 : i32
    return %c0_i32, %arg0 : i32, i32
  }
  func.func @transform_1(%arg0: i32) -> (i32, i32) {
    %c0_i32 = arith.constant 0 : i32
    %c0_i32_0 = arith.constant 0 : i32
    %c0_i32_1 = arith.constant 0 : i32
    return %c0_i32, %c0_i32_0 : i32, i32
  }
  func.func @transform_2(%arg0: i32) -> (i32, i32) {
    %c0_i32 = arith.constant 0 : i32
    %c0_i32_0 = arith.constant 0 : i32
    %c0_i32_1 = arith.constant 0 : i32
    return %c0_i32, %c0_i32_0 : i32, i32
  }
  func.func @transform_3(%arg0: i32) -> (i32, i32) {
    %c0_i32 = arith.constant 0 : i32
    %c0_i32_0 = arith.constant 0 : i32
    %c0_i32_1 = arith.constant 0 : i32
    return %c0_i32, %c0_i32_0 : i32, i32
  }
  func.func @transform_4(%arg0: i32) -> (i32, i32) {
    %c0_i32 = arith.constant 0 : i32
    %c0_i32_0 = arith.constant 0 : i32
    %c0_i32_1 = arith.constant 0 : i32
    return %c0_i32, %c0_i32_0 : i32, i32
  }
  func.func @transform_5(%arg0: i32) -> (i32, i32) {
    %c0_i32 = arith.constant 0 : i32
    %c0_i32_0 = arith.constant 0 : i32
    return %c0_i32, %arg0 : i32, i32
  }
}

</mosaic_0001>

<bundles_post_ra>
// kernel: tpu_custom_call.1
= control target key start
LH: loop header
LB: loop body
LE: loop exit
PB: predicated region body
PF: predicated region fallthrough
CT: control target
= control target key end

     0   :  { %10 = vsyncpa [#allocation4], 0  ;;  %s7813_s0 = inlined_call_operand.hbm [shape: bf16[8,64], index: 0, kind: input, shape index: {}]   ;;  %s7814_s1 = inlined_call_operand.hbm [shape: f32[64,224], index: 1, kind: input, shape index: {}]   ;;  %s7815_s2 = inlined_call_operand.hbm [shape: f32[128,128], index: 2, kind: input, shape index: {}]   ;;  %s7816_s3 = inlined_call_operand.hbm [shape: f32[32,224], index: 3, kind: input, shape index: {}]   ;;  %s7817_s4 = inlined_call_operand.hbm [shape: f32[64,224], index: 4, kind: input, shape index: {}]   ;;  %s7818_s5 = inlined_call_operand.hbm [shape: bf16[8,64], index: 5, kind: output, shape index: {}]  }
   0x1   :  { %11 = vsyncpa [#allocation7], 0 }
   0x2   :  { %12 = vsyncpa [#allocation10], 0 }
   0x3   :  { %13 = vsyncpa [#allocation5], 0  ;;  %s5924_s18 = smov [#allocation6]  }
   0x4   :  { %s29_s19 = sshll.u32 %s5924_s18, 4  ;;  %s30_s19 = int_to_ptr.vmem [resolvable:$true] %s29_s19 }
   0x5   :  { %s5804_s20 = scalar_lea.vmem %s30_s19, 2048  ;;  %p5809_p1 = scmp.lt.s32.totalorder %s30_s19, %s30_s19 }
   0x6   :  { %p5805_p0 = scmp.ne.s32.totalorder %s30_s19, %s5804_s20  ;;  %p5810_p2 = scmp.lt.s32.totalorder %s5804_s20, %s5804_s20 }
   0x8   :  { %p5811_p3 = por %p5810_p2, %p5809_p1 }
   0xa   :  { %p5812_p4 = pnand %p5811_p3, %p5805_p0 }
   0xc   :  { %5815 = shalt.err (!%p5812_p4)
}
   0xd   :  { %s5925_s21 = smov 256   ;;  %s5926_s22 = smov 16  }
   0xe   :  { %35 = dma.hbm_to_vmem [thread:$0]  %s7814_s1, 2048, %s30_s19, [#allocation7], %s5925_s21, %s5925_s21, %s5926_s22  }
   0xf   :  { %s5927_s25 = smov [#allocation9]   ;;  %s5928_s27 = smov [#allocation3]  }
  0x10   :  { %s53_s26 = sshll.u32 %s5927_s25, 4  ;;  %s20_s28 = sshll.u32 %s5928_s27, 4  ;;  %s54_s26 = int_to_ptr.vmem [resolvable:$true] %s53_s26  ;;  %s21_s28 = int_to_ptr.vmem [resolvable:$true] %s20_s28 }
  0x11   :  { %s5824_s29 = scalar_lea.vmem %s54_s26, 1024  ;;  %p5829_p6 = scmp.lt.s32.totalorder %s54_s26, %s54_s26 }
  0x12   :  { %p5825_p5 = scmp.ne.s32.totalorder %s54_s26, %s5824_s29  ;;  %p5830_p7 = scmp.lt.s32.totalorder %s5824_s29, %s5824_s29 }
  0x14   :  { %p5831_p8 = por %p5830_p7, %p5829_p6 }
  0x16   :  { %p5832_p9 = pnand %p5831_p8, %p5825_p5 }
  0x18   :  { %5835 = shalt.err (!%p5832_p9)
}
  0x19   :  { %59 = dma.hbm_to_vmem [thread:$0]  %s7816_s3, 1024, %s54_s26, [#allocation10], %s5925_s21, %s5925_s21, %s5926_s22  }
  0x1a   :  { %s5844_s1 = scalar_lea.vmem %s21_s28, 64  ;;  %p5849_p11 = scmp.lt.s32.totalorder %s21_s28, %s21_s28 }
  0x1b   :  { %p5845_p10 = scmp.ne.s32.totalorder %s21_s28, %s5844_s1  ;;  %p5850_p12 = scmp.lt.s32.totalorder %s5844_s1, %s5844_s1 }
  0x1d   :  { %p5851_p13 = por %p5850_p12, %p5849_p11 }
  0x1f   :  { %p5852_p0 = pnand %p5851_p13, %p5845_p10 }
  0x21   :  { %5855 = shalt.err (!%p5852_p0)
}
  0x22   :  { %23 = dma.hbm_to_vmem [thread:$0]  %s7813_s0, 64, %s21_s28, [#allocation4]  }
  0x23   :  { %s5929_s9 = smov [#allocation8]  }
  0x24   :  { %s41_s10 = sshll.u32 %s5929_s9, 4  ;;  %s42_s10 = int_to_ptr.vmem [resolvable:$true] %s41_s10 }
  0x25   :  { %s5864_s11 = scalar_lea.vmem %s42_s10, 2048  ;;  %p5869_p2 = scmp.lt.s32.totalorder %s42_s10, %s42_s10 }
  0x26   :  { %p5865_p1 = scmp.ne.s32.totalorder %s42_s10, %s5864_s11  ;;  %p5870_p3 = scmp.lt.s32.totalorder %s5864_s11, %s5864_s11 }
  0x28   :  { %p5871_p4 = por %p5870_p3, %p5869_p2 }
  0x2a   :  { %p5872_p5 = pnand %p5871_p4, %p5865_p1 }
  0x2c   :  { %5875 = shalt.err (!%p5872_p5)
}
  0x2d   :  { %s5930_s3 = smov 128   ;;  %s5931_s12 = smov 8  }
  0x2e   :  { %47 = dma.hbm_to_vmem [thread:$0]  %s7815_s2, 2048, %s42_s10, [#allocation7], %s5930_s3, %s5930_s3, %s5931_s12  }
  0x2f   :  { %s5932_s15 = smov [#allocation11]  }
  0x30   :  { %s65_s16 = sshll.u32 %s5932_s15, 4  ;;  %s66_s16 = int_to_ptr.vmem [resolvable:$true] %s65_s16 }
  0x31   :  { %s5884_s0 = scalar_lea.vmem %s66_s16, 2048  ;;  %p5889_p7 = scmp.lt.s32.totalorder %s66_s16, %s66_s16 }
  0x32   :  { %p5885_p6 = scmp.ne.s32.totalorder %s66_s16, %s5884_s0  ;;  %p5890_p8 = scmp.lt.s32.totalorder %s5884_s0, %s5884_s0 }
  0x34   :  { %p5891_p9 = por %p5890_p8, %p5889_p7 }
  0x36   :  { %p5892_p10 = pnand %p5891_p9, %p5885_p6 }
  0x38   :  { %5895 = shalt.err (!%p5892_p10)
}
  0x39   :  { %71 = dma.hbm_to_vmem [thread:$0]  %s7817_s4, 2048, %s66_s16, [#allocation10], %s5925_s21, %s5925_s21, %s5926_s22  }
  0x3a   :  { %5916 = dma.done.wait [#allocation4], 64  }
  0x3b   :  { %5917 = vsyncadd [#allocation4], 4294967232 }
  0x3c   :  { %5918 = dma.done.wait [#allocation7], 4096  }
  0x3d   :  { %5919 = vsyncadd [#allocation7], 4294963200 }
  0x3e   :  { %5920 = dma.done.wait [#allocation10], 3072  }
  0x3f   :  { %5921 = vsyncadd [#allocation10], 4294964224  ;;  %v7821_v0 = vmov 0   ;;  %vm105_vm0 = vcmask 785408   ;;  %v101_v1 = vld [vmem:[#allocation6 + $0x68] sm:$0xff]  ;;  %v103_v2 = vld [vmem:[#allocation6 + $0x78] sm:$0xff] }
  0x40   :  { %182 = vmatprep.mubr.bf16.mxu0 %v7821_v0  ;;  %118 = vst.msk [vmem:[#allocation2 + $0x68] sm:$0xff] %vm105_vm0, %v101_v1  ;;  %120 = vst.msk [vmem:[#allocation2 + $0x78] sm:$0xff] %vm105_vm0, %v103_v2  ;;  %v97_v3 = vld [vmem:[#allocation6 + $0x48] sm:$0xff]  ;;  %v99_v4 = vld [vmem:[#allocation6 + $0x58] sm:$0xff]  ;;  %vm146_vm1 = vcmask 523264   ;;  %vm191_vm2 = vcmask 1040896  }
  0x41   :  { %114 = vst.msk [vmem:[#allocation2 + $0x48] sm:$0xff] %vm105_vm0, %v97_v3  ;;  %116 = vst.msk [vmem:[#allocation2 + $0x58] sm:$0xff] %vm105_vm0, %v99_v4  ;;  %v93_v5 = vld [vmem:[#allocation6 + $0x28] sm:$0xff]  ;;  %v95_v6 = vld [vmem:[#allocation6 + $0x38] sm:$0xff]  ;;  %vm193_vm3 = vcmask 516096   ;;  %v7819_v42 = vmov 0.0  }
  0x42   :  { %110 = vst.msk [vmem:[#allocation2 + $0x28] sm:$0xff] %vm105_vm0, %v93_v5  ;;  %112 = vst.msk [vmem:[#allocation2 + $0x38] sm:$0xff] %vm105_vm0, %v95_v6  ;;  %v89_v7 = vld [vmem:[#allocation6 + $0x8] sm:$0xff]  ;;  %v91_v8 = vld [vmem:[#allocation6 + $0x18] sm:$0xff]  ;;  %5363 = vmatprep.subr.mxu1 %v7819_v42  ;;  %vm5935_vm4 = vmmov 0   ;;  %s5936_s4 = smov 64  }
  0x43   :  { %v5999_v9 = vld [vmem:[#allocation6 + $0x60] sm:$0xff]  ;;  %v6001_v10 = vld [vmem:[#allocation6 + $0x70] sm:$0xff]  ;;  %106 = vst.msk [vmem:[#allocation2 + $0x8] sm:$0xff] %vm105_vm0, %v89_v7  ;;  %108 = vst.msk [vmem:[#allocation2 + $0x18] sm:$0xff] %vm105_vm0, %v91_v8  ;;  %5395 = vmatprep.mubr.msk.f32.mxu1 %vm5935_vm4, %v7819_v42  ;;  %vm423_vm5 = vcmask 261120   ;;  %vm558_vm6 = vcmask 1040384  }
  0x44   :  { %v6011_v13 = vpack.c.bf16 %v6001_v10, %v5999_v9  ;;  %v6013_v14 = vld [vmem:[#allocation6 + $0x40] sm:$0xff]  ;;  %v6021_v18 = vld [vmem:[#allocation6 + $0x50] sm:$0xff]  ;;  %v6070_v33 = vld [vmem:[#allocation3] sm:$0xf]  ;;  %vm533_vm7 = vcmask 7168   ;;  %vm5074_vm8 = vcmask 1041408  }
  0x45   :  { %v6034_v22 = vpack.c.bf16 %v6021_v18, %v6013_v14  ;;  %v6041_v24 = vld [vmem:[#allocation6 + $0x20] sm:$0xff]  ;;  %v6043_v25 = vld [vmem:[#allocation6 + $0x30] sm:$0xff]  ;;  %v6090_v41 = vld [vmem:[#allocation8 + $0x78] sm:$0xff]  ;;  %vm5076_vm9 = vcmask 1042432   ;;  %vm5078_vm10 = vcmask 1043456   ;;  %vm5080_vm11 = vcmask 1044480  }
  0x46   :  { %v6052_v28 = vpack.c.bf16 %v6043_v25, %v6041_v24  ;;  %v6059_v30 = vld [vmem:[#allocation6] sm:$0xff]  ;;  %v6061_v31 = vld [vmem:[#allocation6 + $0x10] sm:$0xff]  ;;  %5364 = vmatpush3.msra.mxu1 %v6090_v41  ;;  %v6097_v44 = vld [vmem:[#allocation8 + $0x68] sm:$0xff]  ;;  %vm5082_vm12 = vcmask 1045504   ;;  %vm5084_vm13 = vcmask 1046528   ;;  %vm5087_vm14 = vcmask 519168  }
  0x47   :  { %v6005_v11 = vld [vmem:[#allocation2 + $0x68] sm:$0xff]  ;;  %v6007_v12 = vld [vmem:[#allocation2 + $0x78] sm:$0xff]  ;;  %v6066_v32 = vpack.c.bf16 %v6061_v31, %v6059_v30  ;;  %5365 = vmatprep.subr.mxu1 %v7819_v42  ;;  %s5937_s26 = smov [#allocation12]  }
  0x48   :  { %v145_v15 = vpack.c.bf16 %v6007_v12, %v6005_v11  ;;  %v6017_v16 = vld [vmem:[#allocation2 + $0x48] sm:$0xff]  ;;  %v6019_v17 = vld [vmem:[#allocation2 + $0x58] sm:$0xff]  ;;  %s5095_s27 = sshll.u32 %s5937_s26, 4  ;;  %s5096_s27 = int_to_ptr.vmem [resolvable:$true] %s5095_s27 }
  0x49   :  { %v6025_v19 = vpack.c.bf16 %v6019_v17, %v6017_v16  ;;  %v6027_v20 = vld [vmem:[#allocation2 + $0x28] sm:$0xff]  ;;  %v6029_v21 = vld [vmem:[#allocation2 + $0x38] sm:$0xff]  ;;  %s5896_s28 = scalar_lea.vmem %s5096_s27, 64  ;;  %p5901_p12 = scmp.lt.s32.totalorder %s5096_s27, %s5096_s27 }
  0x4a   :  { %158 = vmatprep.subr.bf16.mxu0 %v145_v15  ;;  %v6039_v23 = vpack.c.bf16 %v6029_v21, %v6027_v20  ;;  %v6045_v26 = vld [vmem:[#allocation2 + $0x8] sm:$0xff]  ;;  %v6047_v27 = vld [vmem:[#allocation2 + $0x18] sm:$0xff]  ;;  %p5897_p11 = scmp.ne.s32.totalorder %s5096_s27, %s5896_s28  ;;  %p5902_p13 = scmp.lt.s32.totalorder %s5896_s28, %s5896_s28 }
  0x4b   :  { %159 = vmatpush1.bf16.msra.mxu0 %v6011_v13  ;;  %v6057_v29 = vpack.c.bf16 %v6047_v27, %v6045_v26  ;;  %v6093_v43 = vld [vmem:[#allocation8 + $0x70] sm:$0xff]  ;;  %v6101_v45 = vld [vmem:[#allocation8 + $0x60] sm:$0xff]  ;;  %v6105_v46 = vld [vmem:[#allocation8 + $0x58] sm:$0xff] }
  0x4c   :  { %160 = vmatprep.subr.bf16.mxu0 %v6025_v19  ;;  %5366 = vmatpush3.msra.mxu1 %v6093_v43  ;;  %v6109_v47 = vld [vmem:[#allocation8 + $0x50] sm:$0xff]  ;;  %v6113_v48 = vld [vmem:[#allocation8 + $0x48] sm:$0xff]  ;;  %v6117_v49 = vld [vmem:[#allocation8 + $0x40] sm:$0xff]  ;;  %p5903_p0 = por %p5902_p13, %p5901_p12 }
  0x4d   :  { %5367 = vmatprep.subr.mxu1 %v7819_v42  ;;  %v6121_v50 = vld [vmem:[#allocation8 + $0x38] sm:$0xff]  ;;  %v6125_v51 = vld [vmem:[#allocation8 + $0x30] sm:$0xff]  ;;  %v6129_v52 = vld [vmem:[#allocation8 + $0x28] sm:$0xff] }
  0x4e   :  { %5368 = vmatpush3.msra.mxu1 %v6097_v44  ;;  %v6133_v53 = vld [vmem:[#allocation8 + $0x20] sm:$0xff]  ;;  %v6137_v54 = vld [vmem:[#allocation8 + $0x18] sm:$0xff]  ;;  %v6141_v55 = vld [vmem:[#allocation8 + $0x10] sm:$0xff]  ;;  %p5904_p1 = pnand %p5903_p0, %p5897_p11 }
  0x4f   :  { %161 = vmatpush1.bf16.msra.mxu0 %v6034_v22  ;;  %5369 = vmatprep.subr.mxu1 %v7819_v42  ;;  %v6149_v5 = vld [vmem:[#allocation8 + $0x8] sm:$0xff]  ;;  %v6152_v6 = vld [vmem:[#allocation8] sm:$0xff] }
  0x50   :  { %162 = vmatprep.subr.bf16.mxu0 %v6039_v23  ;;  %5370 = vmatpush3.msra.mxu1 %v6101_v45 }
  0x51   :  { %5371 = vmatprep.subr.mxu1 %v7819_v42 }
  0x52   :  { %5372 = vmatpush3.msra.mxu1 %v6105_v46 }
  0x53   :  { %163 = vmatpush1.bf16.msra.mxu0 %v6052_v28  ;;  %5373 = vmatprep.subr.mxu1 %v7819_v42 }
  0x54   :  { %164 = vmatprep.subr.bf16.mxu0 %v6057_v29  ;;  %5374 = vmatpush3.msra.mxu1 %v6109_v47 }
  0x55   :  { %5375 = vmatprep.subr.mxu1 %v7819_v42 }
  0x56   :  { %5376 = vmatpush3.msra.mxu1 %v6113_v48 }
  0x57   :  { %165 = vmatpush1.bf16.msra.mxu0 %v6066_v32  ;;  %5377 = vmatprep.subr.mxu1 %v7819_v42 }
  0x58   :  { %329 = vmatprep.subr.bf16.mxu0 %v145_v15  ;;  %5378 = vmatpush3.msra.mxu1 %v6117_v49 }
  0x59   :  { %5379 = vmatprep.subr.mxu1 %v7819_v42 }
  0x5a   :  { %5106 = vmatmul.mubr.msk.bf16.vlgmr.msra.gmra.mxu0 %vm146_vm1, %v6070_v33  ;;  %5380 = vmatpush3.msra.mxu1 %v6121_v50 }
  0x5b   :  { %330 = vmatpush1.bf16.msra.mxu0 %v6011_v13  ;;  %353 = vmatprep.mubr.bf16.mxu0 %v7821_v0 }
  0x5c   :  { %331 = vmatprep.subr.bf16.mxu0 %v6025_v19  ;;  %5381 = vmatprep.subr.mxu1 %v7819_v42 }
  0x5d   :  { %5382 = vmatpush3.msra.mxu1 %v6125_v51 }
  0x5e   :  { %5383 = vmatprep.subr.mxu1 %v7819_v42 }
  0x5f   :  { %332 = vmatpush1.bf16.msra.mxu0 %v6034_v22  ;;  %5384 = vmatpush3.msra.mxu1 %v6129_v52 }
  0x60   :  { %333 = vmatprep.subr.bf16.mxu0 %v6039_v23  ;;  %5385 = vmatprep.subr.mxu1 %v7819_v42 }
  0x61   :  { %5386 = vmatpush3.msra.mxu1 %v6133_v53 }
  0x62   :  { %5387 = vmatprep.subr.mxu1 %v7819_v42 }
  0x63   :  { %334 = vmatpush1.bf16.msra.mxu0 %v6052_v28  ;;  %5388 = vmatpush3.msra.mxu1 %v6137_v54 }
  0x64   :  { %335 = vmatprep.subr.bf16.mxu0 %v6057_v29  ;;  %5389 = vmatprep.subr.mxu1 %v7819_v42 }
  0x65   :  { %5390 = vmatpush3.msra.mxu1 %v6141_v55 }
  0x66   :  { %5391 = vmatprep.subr.mxu1 %v7819_v42 }
  0x67   :  { %336 = vmatpush1.bf16.msra.mxu0 %v6066_v32  ;;  %5392 = vmatpush3.msra.mxu1 %v6149_v5 }
  0x68   :  { %373 = vmatprep.subr.bf16.mxu0 %v145_v15  ;;  %5393 = vmatprep.subr.mxu1 %v7819_v42 }
  0x69   :  { %5394 = vmatpush3.msra.mxu1 %v6152_v6 }
 0x11a   :  { %v6082_v34 = vpop.f32.mrf.mxu0 }
 0x11b   :  { %7857 = vst [vmem:[#allocation17_spill] sm:$0xff] %v6082_v34  ;;  %v192_v36 = vsel %vm191_vm2, %v6082_v34, -inf }
 0x11c   :  { %v6084_v35 = vpop.f32.mrf.mxu0 }
 0x11d   :  { %v194_v37 = vsel %vm193_vm3, %v6084_v35, -inf }
 0x11e   :  { %v188_v38 = vpop.f32.mrf.mxu0  ;;  %v195_v39 = vmax.f32 %v192_v36, %v194_v37 }
 0x120   :  { %196 = vmax.xlane.f32.xlu0 %v195_v39  ;;  %v189_v40 = vpop.f32.mrf.mxu0 }
 0x1a9   :  { %v197_v56 = vpop.xlane.xlu0 %196 }
 0x1aa   :  { %v198_v57 = vrot.slane %v197_v56, 4 }
 0x1ac   :  { %v199_v58 = vmax.f32 %v197_v56, %v198_v57  ;;  %v6162_v57 = vld [vmem:[#allocation9 + $0x38] sm:$0xff] }
 0x1ad   :  { %450 = vmatprep.subr.mxu1 %v6162_v57 }
 0x1ae   :  { %v200_v59 = vrot.slane %v199_v58, 2 }
 0x1b0   :  { %v201_v60 = vmax.f32 %v199_v58, %v200_v59  ;;  %v6164_v58 = vld [vmem:[#allocation9 + $0x30] sm:$0xff]  ;;  %v6166_v59 = vld [vmem:[#allocation9 + $0x28] sm:$0xff] }
 0x1b2   :  { %v202_v61 = vrot.slane %v201_v60, 1 }
 0x1b4   :  { %v203_v62 = vmax.f32 %v201_v60, %v202_v61  ;;  %v6169_v60 = vld [vmem:[#allocation9 + $0x20] sm:$0xff]  ;;  %v5109_v61 = vmul.f32 -1.442695, %v6084_v35 }
 0x1b6   :  { %5645 = vpush %v203_v62 }
 0x1e7   :  { %s5646_s2 = spop %5645 }
 0x1e8   :  { %v205_v63 = vstv %s5646_s2 }
 0x1e9   :  { %v206_v1 = vsub.f32 %v6082_v34, %v205_v63  ;;  %v207_v2 = vsub.f32 %v6084_v35, %v205_v63 }
 0x1eb   :  { %v208_v3 = vmul.f32 1.442695, %v206_v1  ;;  %v210_v4 = vmul.f32 1.442695, %v207_v2  ;;  %v6175_v2 = vld [vmem:[#allocation9 + $0x18] sm:$0xff] }
 0x1ed   :  { %5716 = vpow2.f32 %v208_v3  ;;  %v6178_v3 = vld [vmem:[#allocation9 + $0x10] sm:$0xff] }
 0x1ee   :  { %5718 = vpow2.f32 %v210_v4  ;;  %v6180_v4 = vld [vmem:[#allocation9 + $0x8] sm:$0xff] }
 0x1ef   :  { %5720 = vpow2.f32 %v5109_v61 }
 0x1fa   :  { %v5717_v7 = vpop.eup %5716 }
 0x1fb   :  { %v5719_v8 = vpop.eup %5718 }
 0x1fc   :  { %v5675_v15 = vpack.i.bf16 %v5719_v8, %v5717_v7  ;;  %v5721_v63 = vpop.eup %5720 }
 0x1fd   :  { %v409_v1 = vadd.f32 1.0, %v5721_v63 }
 0x1fe   :  { %5676 = vrot.lane.b32.xlu0 %v5675_v15, %s5936_s4  ;;  %v6183_v15 = vld [vmem:[#allocation9] sm:$0xff] }
 0x270   :  { %v5677_v36 = vpop.permute.xlu0 %5676 }
 0x271   :  { %v5679_v37 = vunpack.i.h.bf16 %v5677_v36  ;;  %v5678_v38 = vunpack.i.l.bf16 %v5677_v36 }
 0x273   :  { %v234_v39 = vsel %vm146_vm1, %v5678_v38, %v5679_v37 }
 0x274   :  { %5396 = vmatmul.mubr.f32.vlgmr.msra.gmra.mxu1 %v234_v39 }
 0x275   :  { %490 = vmatprep.mubr.f32.mxu1 %v7819_v42  ;;  %451 = vmatpush1.msra.mxu1 %v6164_v58 }
 0x276   :  { %452 = vmatprep.subr.mxu1 %v6166_v59 }
 0x277   :  { %453 = vmatpush1.msra.mxu1 %v6169_v60 }
 0x278   :  { %454 = vmatprep.subr.mxu1 %v6175_v2 }
 0x279   :  { %455 = vmatpush1.msra.mxu1 %v6178_v3 }
 0x27a   :  { %456 = vmatprep.subr.mxu1 %v6180_v4 }
 0x27b   :  { %457 = vmatpush1.msra.mxu1 %v6183_v15 }
 0x334   :  { %v302_v40 = vpop.f32.mrf.mxu1 }
 0x335   :  { %307 = vrot.lane.b32.xlu1 %v302_v40, %s5936_s4 }
 0x336   :  { %v5397_v56 = vpop.f32.mrf.mxu1 }
 0x3a7   :  { %v308_v62 = vpop.permute.xlu1 %307 }
 0x3a8   :  { %5722 = vrcp.f32 %v308_v62 }
 0x3a9   :  { %5724 = vrcp.f32 %v409_v1 }
 0x3b5   :  { %v5723_v35 = vpop.eup %5722 }
 0x3b6   :  { %v311_v36 = vmul.f32 %v5723_v35, %v5717_v7  ;;  %v5725_v38 = vpop.eup %5724  ;;  %v312_v39 = vmul.f32 %v5723_v35, %v5719_v8 }
 0x3b8   :  { %v313_v37 = vpack.c.bf16 %v311_v36, %v311_v36 }
 0x3ba   :  { %316 = vrot.lane.b32.xlu1 %v313_v37, %s5936_s4 }
 0x3be   :  { %421 = vrot.lane.b32.xlu1 %v5725_v38, %s5936_s4 }
 0x3e7   :  { %501 = vxpose.xlu1.b32.start.end [1/1] (short) (narrow) %v312_v39, 64 }
 0x42c   :  { %v317_v40 = vpop.permute.xlu1 %316 }
 0x42d   :  { %5107 = vmatmul.mubr.msk.bf16.vlgmr.msra.gmra.mxu0 %vm146_vm1, %v317_v40 }
 0x42e   :  { %374 = vmatpush1.bf16.msra.mxu0 %v6011_v13  ;;  %397 = vmatprep.mubr.bf16.mxu0 %v7821_v0  ;;  %v314_v13 = vpack.c.bf16 %v312_v39, %v312_v39 }
 0x42f   :  { %375 = vmatprep.subr.bf16.mxu0 %v6025_v19 }
 0x430   :  { %v422_v56 = vpop.permute.xlu1 %421 }
 0x431   :  { %5110 = vmatmul.mubr.msk.f32.vlgmr.msra.gmra.mxu1 %vm423_vm5, %v422_v56 }
 0x432   :  { %376 = vmatpush1.bf16.msra.mxu0 %v6034_v22  ;;  %629 = vmatprep.mubr.f32.mxu1 %v7819_v42 }
 0x433   :  { %377 = vmatprep.subr.bf16.mxu0 %v6039_v23 }
 0x436   :  { %378 = vmatpush1.bf16.msra.mxu0 %v6052_v28 }
 0x437   :  { %379 = vmatprep.subr.bf16.mxu0 %v6057_v29 }
 0x43a   :  { %380 = vmatpush1.bf16.msra.mxu0 %v6066_v32 }
 0x43d   :  { %5108 = vmatmul.mubr.msk.bf16.vlgmr.msra.gmra.mxu0 %vm146_vm1, %v314_v13 }
 0x43e   :  { %807 = vmatprep.mubr.bf16.mxu0 %v7821_v0 }
 0x463   :  { %v517_v22 = vpop.trf.xlu1 }
 0x467   :  { %v518_v62 = vpop.trf.xlu1 }
 0x46b   :  { %v519_v36 = vpop.trf.xlu1 }
 0x46f   :  { %v520_v40 = vpop.trf.xlu1 }
 0x473   :  { %v521_v56 = vpop.trf.xlu1 }
 0x477   :  { %v522_v13 = vpop.trf.xlu1 }
 0x4ed   :  { %v355_v19 = vpop.f32.mrf.mxu0 }
 0x4ef   :  { %v357_v7 = vpop.f32.mrf.mxu0 }
 0x4f1   :  { %v359_v8 = vpop.f32.mrf.mxu0  ;;  %v492_v63 = vpop.f32.mrf.mxu1 }
 0x4f3   :  { %v360_v61 = vpop.f32.mrf.mxu0  ;;  %v494_v29 = vpop.f32.mrf.mxu1 }
 0x4fd   :  { %v399_v1 = vpop.f32.mrf.mxu0 }
 0x4fe   :  { %v497_v23 = vsub.f32 %v355_v19, %v399_v1  ;;  %v523_v19 = vpop.trf.xlu1  ;;  %v6270_v1 = vld [vmem:[#allocation11 + $0x38] sm:$0xff] }
 0x4ff   :  { %v401_v35 = vpop.f32.mrf.mxu0 }
 0x500   :  { %v498_v28 = vsub.f32 %v357_v7, %v401_v35  ;;  %v499_v38 = vmul.f32 %v497_v23, %v492_v63 }
 0x501   :  { %v403_v37 = vpop.f32.mrf.mxu0 }
 0x502   :  { %v500_v32 = vmul.f32 %v498_v28, %v494_v29 }
 0x503   :  { %v404_v39 = vpop.f32.mrf.mxu0 }
 0x504   :  { %5111 = vmatprep.subr.msk.mxu1 %vm558_vm6, %v500_v32 }
 0x505   :  { %5112 = vmatpush1.msk.msra.mxu1 %vm558_vm6, %v499_v38  ;;  %v6280_v38 = vld [vmem:[#allocation11 + $0x58] sm:$0xff] }
 0x506   :  { %5113 = vmatmul.mubr.msk.f32.vlgmr.msra.gmra.mxu1 %vm533_vm7, %v517_v22  ;;  %5398 = vmatprep.subr.mxu1 %v7819_v42 }
 0x507   :  { %635 = vmatprep.mubr.f32.mxu1 %v7819_v42  ;;  %5399 = vmatpush3.msra.mxu1 %v6090_v41 }
 0x508   :  { %5400 = vmatprep.subr.mxu1 %v7819_v42 }
 0x509   :  { %5401 = vmatpush3.msra.mxu1 %v6093_v43 }
 0x50a   :  { %5114 = vmatmul.mubr.msk.f32.gmra.mxu1 %vm533_vm7, %v518_v62  ;;  %5402 = vmatprep.subr.mxu1 %v7819_v42 }
 0x50b   :  { %641 = vmatprep.mubr.f32.mxu1 %v7819_v42  ;;  %5403 = vmatpush3.msra.mxu1 %v6097_v44 }
 0x50c   :  { %5404 = vmatprep.subr.mxu1 %v7819_v42 }
 0x50d   :  { %5405 = vmatpush3.msra.mxu1 %v6101_v45 }
 0x50e   :  { %5115 = vmatmul.mubr.msk.f32.gmra.mxu1 %vm533_vm7, %v519_v36  ;;  %5406 = vmatprep.subr.mxu1 %v7819_v42  ;;  %v6275_v36 = vld [vmem:[#allocation11 + $0x48] sm:$0xff] }
 0x50f   :  { %647 = vmatprep.mubr.f32.mxu1 %v7819_v42  ;;  %5407 = vmatpush3.msra.mxu1 %v6105_v46 }
 0x510   :  { %5408 = vmatprep.subr.mxu1 %v7819_v42 }
 0x511   :  { %5409 = vmatpush3.msra.mxu1 %v6109_v47 }
 0x512   :  { %5116 = vmatmul.mubr.msk.f32.gmra.mxu1 %vm533_vm7, %v520_v40  ;;  %5410 = vmatprep.subr.mxu1 %v7819_v42 }
 0x513   :  { %653 = vmatprep.mubr.f32.mxu1 %v7819_v42  ;;  %5411 = vmatpush3.msra.mxu1 %v6113_v48  ;;  %v524_v48 = vpop.trf.xlu1 }
 0x514   :  { %5412 = vmatprep.subr.mxu1 %v7819_v42 }
 0x515   :  { %5413 = vmatpush3.msra.mxu1 %v6117_v49 }
 0x516   :  { %5117 = vmatmul.mubr.msk.f32.gmra.mxu1 %vm533_vm7, %v521_v56  ;;  %5414 = vmatprep.subr.mxu1 %v7819_v42 }
 0x517   :  { %659 = vmatprep.mubr.f32.mxu1 %v7819_v42  ;;  %5415 = vmatpush3.msra.mxu1 %v6121_v50  ;;  %v6255_v50 = vld [vmem:[#allocation11 + $0x8] sm:$0xff] }
 0x518   :  { %5416 = vmatprep.subr.mxu1 %v7819_v42 }
 0x519   :  { %5417 = vmatpush3.msra.mxu1 %v6125_v51 }
 0x51a   :  { %5118 = vmatmul.mubr.msk.f32.gmra.mxu1 %vm533_vm7, %v522_v13  ;;  %5418 = vmatprep.subr.mxu1 %v7819_v42  ;;  %v6285_v13 = vld [vmem:[#allocation11 + $0x68] sm:$0xff] }
 0x51b   :  { %665 = vmatprep.mubr.f32.mxu1 %v7819_v42  ;;  %5419 = vmatpush3.msra.mxu1 %v6129_v52 }
 0x51c   :  { %5420 = vmatprep.subr.mxu1 %v7819_v42 }
 0x51d   :  { %5421 = vmatpush3.msra.mxu1 %v6133_v53 }
 0x51e   :  { %5119 = vmatmul.mubr.msk.f32.gmra.mxu1 %vm533_vm7, %v523_v19  ;;  %5422 = vmatprep.subr.mxu1 %v7819_v42 }
 0x51f   :  { %671 = vmatprep.mubr.f32.mxu1 %v7819_v42  ;;  %5423 = vmatpush3.msra.mxu1 %v6137_v54  ;;  %v6260_v54 = vld [vmem:[#allocation11 + $0x18] sm:$0xff] }
 0x520   :  { %5424 = vmatprep.subr.mxu1 %v7819_v42 }
 0x521   :  { %5425 = vmatpush3.msra.mxu1 %v6141_v55 }
 0x522   :  { %5120 = vmatmul.mubr.msk.f32.gmra.mxu1 %vm533_vm7, %v524_v48  ;;  %5426 = vmatprep.subr.mxu1 %v7819_v42 }
 0x523   :  { %5427 = vmatpush3.msra.mxu1 %v6149_v5  ;;  %5430 = vmatprep.mubr.msk.f32.mxu1 %vm5935_vm4, %v7819_v42 }
 0x524   :  { %5428 = vmatprep.subr.mxu1 %v7819_v42 }
 0x525   :  { %5429 = vmatpush3.msra.mxu1 %v6152_v6  ;;  %v6265_v6 = vld [vmem:[#allocation11 + $0x28] sm:$0xff] }
 0x5c6   :  { %v6253_v49 = vpop.f32.mrf.mxu1 }
 0x5c8   :  { %v633_v51 = vpop.f32.mrf.mxu1 }
 0x5c9   :  { %v695_v52 = vmul.f32 %v6255_v50, %v633_v51 }
 0x5ca   :  { %v6258_v53 = vpop.f32.mrf.mxu1 }
 0x5cb   :  { %v711_v55 = vadd.f32 %v695_v52, %v6045_v26  ;;  %v6290_v52 = vld [vmem:[#allocation11 + $0x78] sm:$0xff] }
 0x5cc   :  { %v639_v5 = vpop.f32.mrf.mxu1 }
 0x5cd   :  { %727 = vst.msk [vmem:[#allocation2 + $0x8] sm:$0xff] %vm105_vm0, %v711_v55  ;;  %v697_v7 = vmul.f32 %v6260_v54, %v639_v5 }
 0x5ce   :  { %v643_v8 = vpop.f32.mrf.mxu1 }
 0x5cf   :  { %v713_v61 = vadd.f32 %v697_v7, %v6047_v27  ;;  %v6295_v7 = vld [vmem:[#allocation11 + $0x70] sm:$0xff] }
 0x5d0   :  { %v645_v22 = vpop.f32.mrf.mxu1 }
 0x5d1   :  { %729 = vst.msk [vmem:[#allocation2 + $0x18] sm:$0xff] %vm105_vm0, %v713_v61  ;;  %v699_v62 = vmul.f32 %v6265_v6, %v645_v22 }
 0x5d2   :  { %v649_v63 = vpop.f32.mrf.mxu1 }
 0x5d3   :  { %v715_v26 = vadd.f32 %v699_v62, %v6027_v20  ;;  %v6302_v62 = vld [vmem:[#allocation11 + $0x50] sm:$0xff] }
 0x5d4   :  { %v651_v23 = vpop.f32.mrf.mxu1 }
 0x5d5   :  { %731 = vst.msk [vmem:[#allocation2 + $0x28] sm:$0xff] %vm105_vm0, %v715_v26  ;;  %v701_v35 = vmul.f32 %v6270_v1, %v651_v23 }
 0x5d6   :  { %v655_v28 = vpop.f32.mrf.mxu1 }
 0x5d7   :  { %v717_v27 = vadd.f32 %v701_v35, %v6029_v21 }
 0x5d8   :  { %v657_v29 = vpop.f32.mrf.mxu1 }
 0x5d9   :  { %733 = vst.msk [vmem:[#allocation2 + $0x38] sm:$0xff] %vm105_vm0, %v717_v27  ;;  %v703_v37 = vmul.f32 %v6275_v36, %v657_v29  ;;  %v6311_v27 = vld [vmem:[#allocation11 + $0x30] sm:$0xff] }
 0x5da   :  { %v661_v32 = vpop.f32.mrf.mxu1 }
 0x5db   :  { %v719_v20 = vadd.f32 %v703_v37, %v6017_v16  ;;  %v704_v23 = vmul.f32 %v6302_v62, %v661_v32 }
 0x5dc   :  { %v663_v39 = vpop.f32.mrf.mxu1 }
 0x5dd   :  { %735 = vst.msk [vmem:[#allocation2 + $0x48] sm:$0xff] %vm105_vm0, %v719_v20  ;;  %v705_v40 = vmul.f32 %v6280_v38, %v663_v39 }
 0x5de   :  { %v667_v56 = vpop.f32.mrf.mxu1 }
 0x5df   :  { %v721_v21 = vadd.f32 %v705_v40, %v6019_v17  ;;  %v6298_v17 = vld [vmem:[#allocation11 + $0x60] sm:$0xff] }
 0x5e0   :  { %v669_v19 = vpop.f32.mrf.mxu1  ;;  %v706_v26 = vmul.f32 %v6298_v17, %v667_v56  ;;  %v6323_v40 = vld [vmem:[#allocation11 + $0x20] sm:$0xff]  ;;  %v6329_v56 = vadd.f32 %v704_v23, %v6021_v18  ;;  %v6348_v18 = vld [vmem:[#allocation2 + $0x38] sm:$0xff] }
 0x5e1   :  { %737 = vst.msk [vmem:[#allocation2 + $0x58] sm:$0xff] %vm105_vm0, %v721_v21  ;;  %v707_v48 = vmul.f32 %v6285_v13, %v669_v19  ;;  %v6337_v21 = vld [vmem:[#allocation11 + $0x10] sm:$0xff]  ;;  %v6382_v23 = vld [vmem:[#allocation2 + $0x8] sm:$0xff] }
 0x5e2   :  { %v673_v51 = vpop.f32.mrf.mxu1  ;;  %v6315_v29 = vadd.f32 %v706_v26, %v5999_v9  ;;  %7858 = vst [vmem:[#allocation18_spill] sm:$0xff] %v6337_v21 }
 0x5e3   :  { %v723_v16 = vadd.f32 %v707_v48, %v6005_v11  ;;  %v708_v22 = vmul.f32 %v6295_v7, %v673_v51  ;;  %v6305_v11 = vld [vmem:[#allocation11 + $0x40] sm:$0xff]  ;;  %v698_v48 = vmul.f32 %v6323_v40, %v643_v8 }
 0x5e4   :  { %v675_v55 = vpop.f32.mrf.mxu1  ;;  %v6350_v51 = vld [vmem:[#allocation11] sm:$0xff] }
 0x5e5   :  { %739 = vst.msk [vmem:[#allocation2 + $0x68] sm:$0xff] %vm105_vm0, %v723_v16  ;;  %v709_v5 = vmul.f32 %v6290_v52, %v675_v55  ;;  %v6309_v35 = vadd.f32 %v708_v22, %v6001_v10  ;;  %v700_v10 = vmul.f32 %v6311_v27, %v649_v63  ;;  %7860 = vst [vmem:[#allocation20_spill] sm:$0xff] %v6350_v51 }
 0x5e6   :  { %v696_v16 = vmul.f32 %v6337_v21, %v6258_v53  ;;  %v6371_v22 = vadd.f32 %v698_v48, %v6041_v24 }
 0x5e7   :  { %v725_v61 = vadd.f32 %v709_v5, %v6007_v12  ;;  %v702_v12 = vmul.f32 %v6305_v11, %v655_v28  ;;  %v6333_v9 = vpack.c.bf16 %v6309_v35, %v6315_v29  ;;  %v6335_v28 = vld [vmem:[#allocation2 + $0x48] sm:$0xff]  ;;  %v6356_v55 = vadd.f32 %v700_v10, %v6043_v25  ;;  %v6374_v25 = vld [vmem:[#allocation2 + $0x18] sm:$0xff] }
 0x5e8   :  { %v6321_v39 = vld [vmem:[#allocation2 + $0x58] sm:$0xff]  ;;  %7862 = vst [vmem:[#allocation22_spill] sm:$0xff] %v6371_v22  ;;  %v6378_v53 = vadd.f32 %v696_v16, %v6061_v31  ;;  %v759_v24 = vpack.c.bf16 %v6374_v25, %v6382_v23 }
 0x5e9   :  { %741 = vst.msk [vmem:[#allocation2 + $0x78] sm:$0xff] %vm105_vm0, %v725_v61  ;;  %v6341_v19 = vpack.c.bf16 %v6321_v39, %v6335_v28  ;;  %v6345_v63 = vadd.f32 %v702_v12, %v6013_v14  ;;  %7861 = vst [vmem:[#allocation21_spill] sm:$0xff] %v6356_v55  ;;  %v6362_v14 = vld [vmem:[#allocation2 + $0x28] sm:$0xff]  ;;  %v694_v61 = vmul.f32 %v6350_v51, %v6253_v49 }
 0x5ea   :  { %v6366_v5 = vpack.c.bf16 %v6348_v18, %v6362_v14  ;;  %7863 = vst [vmem:[#allocation23_spill] sm:$0xff] %v6378_v53  ;;  %v760_v26 = vpack.c.bf16 %v6356_v55, %v6371_v22  ;;  %v6386_v49 = vcombine.low %v6070_v33, %v6070_v33 }
 0x5eb   :  { %7859 = vst [vmem:[#allocation19_spill] sm:$0xff] %v6345_v63  ;;  %v6360_v8 = vpack.c.bf16 %v6329_v56, %v6345_v63  ;;  %v6391_v12 = vadd.f32 %v694_v61, %v6059_v30 }
 0x5ec   :  { %v6317_v37 = vld [vmem:[#allocation2 + $0x68] sm:$0xff]  ;;  %7864 = vst [vmem:[#allocation24_spill] sm:$0xff] %v6386_v49  ;;  %v6396_v10 = vshrl.u32 %v6386_v49, 16 }
 0x5ed   :  { %7865 = vst [vmem:[#allocation25_spill] sm:$0xff] %v6391_v12  ;;  %v758_v31 = vpack.c.bf16 %v6378_v53, %v6391_v12 }
 0x5ee   :  { %7866 = vst [vmem:[#allocation26_spill] sm:$0xff] %v6396_v10 }
 0x5f0   :  { %v6319_v20 = vld [vmem:[#allocation2 + $0x78] sm:$0xff] }
 0x5f1   :  { %v765_v32 = vpack.c.bf16 %v6319_v20, %v6317_v37 }
 0x5f3   :  { %783 = vmatprep.subr.bf16.mxu0 %v765_v32  ;;  %996 = vmatprep.subr.bf16.mxu1 %v765_v32 }
 0x5f4   :  { %784 = vmatpush1.bf16.msra.mxu0 %v6333_v9 }
 0x5f5   :  { %785 = vmatprep.subr.bf16.mxu0 %v6341_v19 }
 0x5f8   :  { %786 = vmatpush1.bf16.msra.mxu0 %v6360_v8 }
 0x5f9   :  { %787 = vmatprep.subr.bf16.mxu0 %v6366_v5 }
 0x5fc   :  { %788 = vmatpush1.bf16.msra.mxu0 %v760_v26 }
 0x5fd   :  { %789 = vmatprep.subr.bf16.mxu0 %v759_v24 }
 0x600   :  { %790 = vmatpush1.bf16.msra.mxu0 %v758_v31 }
 0x601   :  { %952 = vmatprep.subr.bf16.mxu0 %v765_v32 }
 0x603   :  { %5122 = vmatmul.mubr.msk.bf16.vlgmr.msra.gmra.mxu0 %vm146_vm1, %v6396_v10 }
 0x604   :  { %953 = vmatpush1.bf16.msra.mxu0 %v6333_v9  ;;  %976 = vmatprep.mubr.bf16.mxu0 %v7821_v0 }
 0x605   :  { %954 = vmatprep.subr.bf16.mxu0 %v6341_v19 }
 0x608   :  { %955 = vmatpush1.bf16.msra.mxu0 %v6360_v8 }
 0x609   :  { %956 = vmatprep.subr.bf16.mxu0 %v6366_v5 }
 0x60c   :  { %957 = vmatpush1.bf16.msra.mxu0 %v760_v26 }
 0x60d   :  { %958 = vmatprep.subr.bf16.mxu0 %v759_v24 }
 0x610   :  { %959 = vmatpush1.bf16.msra.mxu0 %v758_v31 }
 0x611   :  { %1072 = vmatprep.subr.mxu0 %v6162_v57 }
 0x6c3   :  { %v6406_v30 = vpop.f32.mrf.mxu0 }
 0x6c4   :  { %7867 = vst [vmem:[#allocation27_spill] sm:$0xff] %v6406_v30  ;;  %v816_v32 = vsel %vm191_vm2, %v6406_v30, -inf }
 0x6c5   :  { %v811_v33 = vpop.f32.mrf.mxu0 }
 0x6c6   :  { %v817_v48 = vsel %vm193_vm3, %v811_v33, -inf }
 0x6c7   :  { %v813_v16 = vpop.f32.mrf.mxu0  ;;  %v818_v61 = vmax.f32 %v816_v32, %v817_v48 }
 0x6c9   :  { %819 = vmax.xlane.f32.xlu0 %v818_v61  ;;  %v814_v42 = vpop.f32.mrf.mxu0 }
 0x752   :  { %v820_v0 = vpop.xlane.xlu0 %819 }
 0x753   :  { %v821_v34 = vrot.slane %v820_v0, 4 }
 0x755   :  { %v822_v10 = vmax.f32 %v820_v0, %v821_v34 }
 0x757   :  { %v823_v49 = vrot.slane %v822_v10, 2 }
 0x759   :  { %v824_v12 = vmax.f32 %v822_v10, %v823_v49 }
 0x75b   :  { %v825_v53 = vrot.slane %v824_v12, 1 }
 0x75d   :  { %v826_v22 = vmax.f32 %v824_v12, %v825_v53 }
 0x75f   :  { %5647 = vpush %v826_v22  ;;  %v7868_v22 = vmov 0  }
 0x790   :  { %s5648_s19 = spop %5647 }
 0x791   :  { %v828_v57 = vstv %s5648_s19 }
 0x792   :  { %v829_v51 = vsub.f32 %v6406_v30, %v828_v57  ;;  %v830_v55 = vsub.f32 %v811_v33, %v828_v57 }
 0x794   :  { %v831_v21 = vmul.f32 1.442695, %v829_v51  ;;  %v833_v63 = vmul.f32 1.442695, %v830_v55  ;;  %v5125_v51 = vmul.f32 -1.442695, %v811_v33 }
 0x796   :  { %5726 = vpow2.f32 %v831_v21 }
 0x797   :  { %5728 = vpow2.f32 %v833_v63 }
 0x798   :  { %5730 = vpow2.f32 %v5125_v51 }
 0x7a3   :  { %v5727_v32 = vpop.eup %5726 }
 0x7a4   :  { %v5729_v48 = vpop.eup %5728 }
 0x7a5   :  { %v5680_v42 = vpack.i.bf16 %v5729_v48, %v5727_v32 }
 0x7a7   :  { %5681 = vrot.lane.b32.xlu1 %v5680_v42, %s5936_s4 }
 0x819   :  { %v5682_v0 = vpop.permute.xlu1 %5681 }
 0x81a   :  { %v5684_v34 = vunpack.i.h.bf16 %v5682_v0  ;;  %v5683_v49 = vunpack.i.l.bf16 %v5682_v0 }
 0x81c   :  { %v857_v53 = vsel %vm146_vm1, %v5683_v49, %v5684_v34 }
 0x81d   :  { %5431 = vmatmul.mubr.f32.vlgmr.msra.gmra.mxu1 %v857_v53 }
 0x81e   :  { %997 = vmatpush1.bf16.msra.mxu1 %v6333_v9  ;;  %1020 = vmatprep.mubr.bf16.mxu1 %v7868_v22  ;;  %v5731_v9 = vpop.eup %5730 }
 0x81f   :  { %998 = vmatprep.subr.bf16.mxu1 %v6341_v19  ;;  %v1032_v12 = vadd.f32 1.0, %v5731_v9  ;;  %v6483_v9 = vld [vmem:[#allocation8 + $0x28] sm:$0xff] }
 0x822   :  { %999 = vmatpush1.bf16.msra.mxu1 %v6360_v8 }
 0x823   :  { %1000 = vmatprep.subr.bf16.mxu1 %v6366_v5 }
 0x826   :  { %1001 = vmatpush1.bf16.msra.mxu1 %v760_v26 }
 0x827   :  { %1002 = vmatprep.subr.bf16.mxu1 %v759_v24  ;;  %v7869_v24 = vmov 0.0  }
 0x82a   :  { %1003 = vmatpush1.bf16.msra.mxu1 %v758_v31 }
 0x8dd   :  { %v925_v21 = vpop.f32.mrf.mxu1 }
 0x8de   :  { %930 = vrot.lane.b32.xlu0 %v925_v21, %s5936_s4 }
 0x8df   :  { %v5432_v63 = vpop.f32.mrf.mxu1 }
 0x950   :  { %v931_v55 = vpop.permute.xlu0 %930 }
 0x951   :  { %5732 = vrcp.f32 %v931_v55  ;;  %v6479_v55 = vld [vmem:[#allocation8 + $0x30] sm:$0xff] }
 0x952   :  { %5734 = vrcp.f32 %v1032_v12  ;;  %v6486_v12 = vld [vmem:[#allocation8 + $0x20] sm:$0xff] }
 0x95e   :  { %v5733_v10 = vpop.eup %5732 }
 0x95f   :  { %v935_v19 = vmul.f32 %v5733_v10, %v5729_v48  ;;  %v934_v16 = vmul.f32 %v5733_v10, %v5727_v32  ;;  %v5735_v5 = vpop.eup %5734  ;;  %v6489_v10 = vld [vmem:[#allocation8 + $0x18] sm:$0xff] }
 0x961   :  { %v937_v8 = vpack.c.bf16 %v935_v19, %v935_v19  ;;  %v936_v61 = vpack.c.bf16 %v934_v16, %v934_v16  ;;  %v6497_v16 = vld [vmem:[#allocation8 + $0x8] sm:$0xff] }
 0x963   :  { %5124 = vmatmul.mubr.msk.bf16.vlgmr.msra.gmra.mxu1 %vm146_vm1, %v937_v8  ;;  %939 = vrot.lane.b32.xlu0 %v936_v61, %s5936_s4  ;;  %v6501_v8 = vld [vmem:[#allocation8] sm:$0xff] }
 0x964   :  { %1422 = vmatprep.mubr.bf16.mxu1 %v7868_v22 }
 0x967   :  { %1044 = vrot.lane.b32.xlu0 %v5735_v5, %s5936_s4 }
 0x985   :  { %1123 = vxpose.xlu0.b32.start.end [1/1] (short) (narrow) %v935_v19, 64  ;;  %v6493_v19 = vld [vmem:[#allocation8 + $0x10] sm:$0xff] }
 0x9d5   :  { %v940_v26 = vpop.permute.xlu0 %939 }
 0x9d6   :  { %5123 = vmatmul.mubr.msk.bf16.vlgmr.msra.gmra.mxu0 %vm146_vm1, %v940_v26 }
 0x9d7   :  { %1073 = vmatpush1.msra.mxu0 %v6164_v58  ;;  %1112 = vmatprep.mubr.f32.mxu0 %v7869_v24 }
 0x9d8   :  { %1074 = vmatprep.subr.mxu0 %v6166_v59 }
 0x9d9   :  { %1075 = vmatpush1.msra.mxu0 %v6169_v60  ;;  %v1045_v31 = vpop.permute.xlu0 %1044 }
 0x9da   :  { %1076 = vmatprep.subr.mxu0 %v6175_v2 }
 0x9db   :  { %1077 = vmatpush1.msra.mxu0 %v6178_v3 }
 0x9dc   :  { %1078 = vmatprep.subr.mxu0 %v6180_v4 }
 0x9dd   :  { %1079 = vmatpush1.msra.mxu0 %v6183_v15 }
 0x9de   :  { %5126 = vmatmul.mubr.msk.f32.vlgmr.msra.gmra.mxu0 %vm423_vm5, %v1045_v31 }
 0x9df   :  { %1249 = vmatprep.mubr.f32.mxu0 %v7869_v24 }
 0xa01   :  { %v1139_v59 = vpop.trf.xlu0 }
 0xa05   :  { %v1140_v2 = vpop.trf.xlu0 }
 0xa09   :  { %v1141_v53 = vpop.trf.xlu0 }
 0xa0d   :  { %v1142_v63 = vpop.trf.xlu0 }
 0xa11   :  { %v1143_v51 = vpop.trf.xlu0 }
 0xa23   :  { %v1022_v58 = vpop.f32.mrf.mxu1 }
 0xa25   :  { %v1024_v33 = vpop.f32.mrf.mxu1 }
 0xa27   :  { %v1026_v57 = vpop.f32.mrf.mxu1 }
 0xa29   :  { %v1027_v32 = vpop.f32.mrf.mxu1 }
 0xa96   :  { %v978_v48 = vpop.f32.mrf.mxu0 }
 0xa97   :  { %v1119_v4 = vsub.f32 %v978_v48, %v1022_v58 }
 0xa98   :  { %v980_v60 = vpop.f32.mrf.mxu0 }
 0xa99   :  { %v1120_v34 = vsub.f32 %v980_v60, %v1024_v33 }
 0xa9a   :  { %v982_v42 = vpop.f32.mrf.mxu0 }
 0xa9c   :  { %v983_v0 = vpop.f32.mrf.mxu0 }
 0xa9e   :  { %v1114_v3 = vpop.f32.mrf.mxu0 }
 0xa9f   :  { %v1121_v21 = vmul.f32 %v1119_v4, %v1114_v3 }
 0xaa0   :  { %v1116_v49 = vpop.f32.mrf.mxu0 }
 0xaa1   :  { %v1122_v15 = vmul.f32 %v1120_v34, %v1116_v49 }
 0xaa3   :  { %5127 = vmatprep.subr.msk.mxu0 %vm558_vm6, %v1122_v15 }
 0xaa4   :  { %5128 = vmatpush1.msk.msra.mxu0 %vm558_vm6, %v1121_v21 }
 0xaa5   :  { %5129 = vmatmul.mubr.msk.f32.vlgmr.msra.gmra.mxu0 %vm533_vm7, %v1139_v59  ;;  %5433 = vmatprep.subr.mxu0 %v7869_v24 }
 0xaa6   :  { %1255 = vmatprep.mubr.f32.mxu0 %v7869_v24  ;;  %5434 = vmatpush3.msra.mxu0 %v6090_v41  ;;  %v1144_v41 = vpop.trf.xlu0 }
 0xaa7   :  { %5435 = vmatprep.subr.mxu0 %v7869_v24 }
 0xaa8   :  { %5436 = vmatpush3.msra.mxu0 %v6093_v43 }
 0xaa9   :  { %5130 = vmatmul.mubr.msk.f32.gmra.mxu0 %vm533_vm7, %v1140_v2  ;;  %5437 = vmatprep.subr.mxu0 %v7869_v24 }
 0xaaa   :  { %1261 = vmatprep.mubr.f32.mxu0 %v7869_v24  ;;  %5438 = vmatpush3.msra.mxu0 %v6097_v44  ;;  %v1145_v43 = vpop.trf.xlu0 }
 0xaab   :  { %5439 = vmatprep.subr.mxu0 %v7869_v24 }
 0xaac   :  { %5440 = vmatpush3.msra.mxu0 %v6101_v45  ;;  %v6467_v45 = vld [vmem:[#allocation8 + $0x48] sm:$0xff] }
 0xaad   :  { %5131 = vmatmul.mubr.msk.f32.gmra.mxu0 %vm533_vm7, %v1141_v53  ;;  %5441 = vmatprep.subr.mxu0 %v7869_v24 }
 0xaae   :  { %1267 = vmatprep.mubr.f32.mxu0 %v7869_v24  ;;  %5442 = vmatpush3.msra.mxu0 %v6105_v46  ;;  %v1146_v44 = vpop.trf.xlu0  ;;  %v6471_v46 = vld [vmem:[#allocation8 + $0x40] sm:$0xff] }
 0xaaf   :  { %5443 = vmatprep.subr.mxu0 %v7869_v24 }
 0xab0   :  { %5444 = vmatpush3.msra.mxu0 %v6109_v47  ;;  %v6475_v47 = vld [vmem:[#allocation8 + $0x38] sm:$0xff] }
 0xab1   :  { %5132 = vmatmul.mubr.msk.f32.gmra.mxu0 %vm533_vm7, %v1142_v63  ;;  %5445 = vmatprep.subr.mxu0 %v7869_v24 }
 0xab2   :  { %1273 = vmatprep.mubr.f32.mxu0 %v7869_v24  ;;  %5446 = vmatpush3.msra.mxu0 %v6467_v45 }
 0xab3   :  { %5447 = vmatprep.subr.mxu0 %v7869_v24 }
 0xab4   :  { %5448 = vmatpush3.msra.mxu0 %v6471_v46 }
 0xab5   :  { %5133 = vmatmul.mubr.msk.f32.gmra.mxu0 %vm533_vm7, %v1143_v51  ;;  %5449 = vmatprep.subr.mxu0 %v7869_v24 }
 0xab6   :  { %1279 = vmatprep.mubr.f32.mxu0 %v7869_v24  ;;  %5450 = vmatpush3.msra.mxu0 %v6475_v47 }
 0xab7   :  { %5451 = vmatprep.subr.mxu0 %v7869_v24 }
 0xab8   :  { %5452 = vmatpush3.msra.mxu0 %v6479_v55 }
 0xab9   :  { %5134 = vmatmul.mubr.msk.f32.gmra.mxu0 %vm533_vm7, %v1144_v41  ;;  %5453 = vmatprep.subr.mxu0 %v7869_v24 }
 0xaba   :  { %1285 = vmatprep.mubr.f32.mxu0 %v7869_v24  ;;  %5454 = vmatpush3.msra.mxu0 %v6483_v9 }
 0xabb   :  { %5455 = vmatprep.subr.mxu0 %v7869_v24 }
 0xabc   :  { %5456 = vmatpush3.msra.mxu0 %v6486_v12 }
 0xabd   :  { %5135 = vmatmul.mubr.msk.f32.gmra.mxu0 %vm533_vm7, %v1145_v43  ;;  %5457 = vmatprep.subr.mxu0 %v7869_v24 }
 0xabe   :  { %1291 = vmatprep.mubr.f32.mxu0 %v7869_v24  ;;  %5458 = vmatpush3.msra.mxu0 %v6489_v10 }
 0xabf   :  { %5459 = vmatprep.subr.mxu0 %v7869_v24 }
 0xac0   :  { %5460 = vmatpush3.msra.mxu0 %v6493_v19 }
 0xac1   :  { %5136 = vmatmul.mubr.msk.f32.gmra.mxu0 %vm533_vm7, %v1146_v44  ;;  %5461 = vmatprep.subr.mxu0 %v7869_v24 }
 0xac2   :  { %5465 = vmatprep.mubr.msk.f32.mxu0 %vm5935_vm4, %v7869_v24  ;;  %5462 = vmatpush3.msra.mxu0 %v6497_v16 }
 0xac3   :  { %5463 = vmatprep.subr.mxu0 %v7869_v24 }
 0xac4   :  { %5464 = vmatpush3.msra.mxu0 %v6501_v8 }
 0xb65   :  { %v6506_v61 = vpop.f32.mrf.mxu0 }
 0xb67   :  { %v1253_v5 = vpop.f32.mrf.mxu0 }
 0xb68   :  { %v1315_v26 = vmul.f32 %v1253_v5, %v6255_v50  ;;  %v7870_v5 = vld [vmem:[#allocation19_spill] sm:$0xff] }
 0xb69   :  { %v1257_v31 = vpop.f32.mrf.mxu0 }
 0xb6a   :  { %v1331_v58 = vadd.f32 %v1315_v26, %v6382_v23 }
 0xb6b   :  { %v1259_v33 = vpop.f32.mrf.mxu0 }
 0xb6c   :  { %1347 = vst.msk [vmem:[#allocation2 + $0x8] sm:$0xff] %vm105_vm0, %v1331_v58  ;;  %v1317_v57 = vmul.f32 %v1259_v33, %v6260_v54  ;;  %v7872_v33 = vld [vmem:[#allocation21_spill] sm:$0xff] }
 0xb6d   :  { %v1263_v32 = vpop.f32.mrf.mxu0 }
 0xb6e   :  { %v1333_v59 = vadd.f32 %v1317_v57, %v6374_v25  ;;  %v1318_v44 = vmul.f32 %v1263_v32, %v6323_v40  ;;  %v7873_v32 = vld [vmem:[#allocation20_spill] sm:$0xff] }
 0xb6f   :  { %v1265_v48 = vpop.f32.mrf.mxu0 }
 0xb70   :  { %1349 = vst.msk [vmem:[#allocation2 + $0x18] sm:$0xff] %vm105_vm0, %v1333_v59  ;;  %v1319_v60 = vmul.f32 %v1265_v48, %v6265_v6 }
 0xb71   :  { %v1269_v42 = vpop.f32.mrf.mxu0 }
 0xb72   :  { %v1335_v2 = vadd.f32 %v1319_v60, %v6362_v14  ;;  %v1314_v60 = vmul.f32 %v6506_v61, %v7873_v32  ;;  %v7876_v61 = vld [vmem:[#allocation25_spill] sm:$0xff] }
 0xb73   :  { %v1271_v50 = vpop.f32.mrf.mxu0 }
 0xb74   :  { %1351 = vst.msk [vmem:[#allocation2 + $0x28] sm:$0xff] %vm105_vm0, %v1335_v2  ;;  %v1321_v23 = vmul.f32 %v1271_v50, %v6270_v1  ;;  %v7875_v50 = vld [vmem:[#allocation23_spill] sm:$0xff] }
 0xb75   :  { %v1275_v0 = vpop.f32.mrf.mxu0 }
 0xb76   :  { %v1337_v3 = vadd.f32 %v1321_v23, %v6348_v18 }
 0xb77   :  { %v1277_v54 = vpop.f32.mrf.mxu0 }
 0xb78   :  { %1353 = vst.msk [vmem:[#allocation2 + $0x38] sm:$0xff] %vm105_vm0, %v1337_v3  ;;  %v1323_v25 = vmul.f32 %v1277_v54, %v6275_v36  ;;  %v6597_v3 = vld [vmem:[#allocation2 + $0x8] sm:$0xff] }
 0xb79   :  { %v1281_v34 = vpop.f32.mrf.mxu0 }
 0xb7a   :  { %v1339_v4 = vadd.f32 %v1323_v25, %v6335_v28  ;;  %v1324_v51 = vmul.f32 %v1281_v34, %v6302_v62  ;;  %v6602_v25 = vadd.f32 %v1314_v60, %v7876_v61 }
 0xb7b   :  { %v1283_v6 = vpop.f32.mrf.mxu0  ;;  %v6580_v48 = vld [vmem:[#allocation2 + $0x28] sm:$0xff] }
 0xb7c   :  { %1355 = vst.msk [vmem:[#allocation2 + $0x48] sm:$0xff] %vm105_vm0, %v1339_v4  ;;  %v1325_v14 = vmul.f32 %v1283_v6, %v6280_v38  ;;  %v6552_v62 = vadd.f32 %v1324_v51, %v6329_v56  ;;  %v7871_v56 = vld [vmem:[#allocation18_spill] sm:$0xff]  ;;  %v7877_v4 = vld [vmem:[#allocation24_spill] sm:$0xff] }
 0xb7d   :  { %v1287_v49 = vpop.f32.mrf.mxu0  ;;  %v1316_v58 = vmul.f32 %v1257_v31, %v7871_v56  ;;  %v6590_v31 = vld [vmem:[#allocation2 + $0x18] sm:$0xff]  ;;  %v1386_v6 = vrot.slane %v7877_v4, 1 }
 0xb7e   :  { %v1341_v53 = vadd.f32 %v1325_v14, %v6321_v39  ;;  %v1326_v39 = vmul.f32 %v1287_v49, %v6298_v17  ;;  %v1320_v17 = vmul.f32 %v1269_v42, %v6311_v27  ;;  %v7874_v42 = vld [vmem:[#allocation22_spill] sm:$0xff]  ;;  %v1379_v54 = vpack.c.bf16 %v6590_v31, %v6597_v3 }
 0xb7f   :  { %v1289_v1 = vpop.f32.mrf.mxu0  ;;  %v6569_v27 = vld [vmem:[#allocation2 + $0x38] sm:$0xff]  ;;  %v6587_v2 = vadd.f32 %v1318_v44, %v7874_v42  ;;  %v6593_v23 = vadd.f32 %v1316_v58, %v7875_v50 }
 0xb80   :  { %1357 = vst.msk [vmem:[#allocation2 + $0x58] sm:$0xff] %vm105_vm0, %v1341_v53  ;;  %v1327_v18 = vmul.f32 %v1289_v1, %v6285_v13  ;;  %v6540_v41 = vadd.f32 %v1326_v39, %v6315_v29  ;;  %v6574_v57 = vadd.f32 %v1320_v17, %v7872_v33  ;;  %v1381_v40 = vpack.c.bf16 %v6569_v27, %v6580_v48 }
 0xb81   :  { %v1293_v15 = vpop.f32.mrf.mxu0  ;;  %v1378_v34 = vpack.c.bf16 %v6593_v23, %v6602_v25 }
 0xb82   :  { %v1343_v21 = vadd.f32 %v1327_v18, %v6317_v37  ;;  %v1328_v38 = vmul.f32 %v1293_v15, %v6295_v7  ;;  %v1322_v37 = vmul.f32 %v1275_v0, %v6305_v11  ;;  %v1380_v0 = vpack.c.bf16 %v6574_v57, %v6587_v2 }
 0xb83   :  { %v1295_v36 = vpop.f32.mrf.mxu0 }
 0xb84   :  { %1359 = vst.msk [vmem:[#allocation2 + $0x68] sm:$0xff] %vm105_vm0, %v1343_v21  ;;  %v1329_v28 = vmul.f32 %v1295_v36, %v6290_v52  ;;  %v6536_v13 = vadd.f32 %v1328_v38, %v6309_v35  ;;  %v6558_v35 = vld [vmem:[#allocation2 + $0x48] sm:$0xff]  ;;  %v6566_v26 = vadd.f32 %v1322_v37, %v7870_v5 }
 0xb86   :  { %v1345_v63 = vadd.f32 %v1329_v28, %v6319_v20  ;;  %v6556_v11 = vpack.c.bf16 %v6536_v13, %v6540_v41  ;;  %v6578_v59 = vpack.c.bf16 %v6552_v62, %v6566_v26 }
 0xb87   :  { %v6546_v20 = vld [vmem:[#allocation2 + $0x58] sm:$0xff] }
 0xb88   :  { %1361 = vst.msk [vmem:[#allocation2 + $0x78] sm:$0xff] %vm105_vm0, %v1345_v63  ;;  %v6562_v29 = vpack.c.bf16 %v6546_v20, %v6558_v35 }
 0xb8b   :  { %v6542_v43 = vld [vmem:[#allocation2 + $0x68] sm:$0xff] }
 0xb8f   :  { %v6544_v52 = vld [vmem:[#allocation2 + $0x78] sm:$0xff] }
 0xb90   :  { %v1385_v7 = vpack.c.bf16 %v6544_v52, %v6542_v43 }
 0xb92   :  { %1398 = vmatprep.subr.bf16.mxu1 %v1385_v7  ;;  %1611 = vmatprep.subr.bf16.mxu0 %v1385_v7 }
 0xb93   :  { %1399 = vmatpush1.bf16.msra.mxu1 %v6556_v11 }
 0xb94   :  { %1400 = vmatprep.subr.bf16.mxu1 %v6562_v29 }
 0xb97   :  { %1401 = vmatpush1.bf16.msra.mxu1 %v6578_v59 }
 0xb98   :  { %1402 = vmatprep.subr.bf16.mxu1 %v1381_v40 }
 0xb9b   :  { %1403 = vmatpush1.bf16.msra.mxu1 %v1380_v0 }
 0xb9c   :  { %1404 = vmatprep.subr.bf16.mxu1 %v1379_v54 }
 0xb9f   :  { %1405 = vmatpush1.bf16.msra.mxu1 %v1378_v34 }
 0xba0   :  { %1567 = vmatprep.subr.bf16.mxu1 %v1385_v7 }
 0xba2   :  { %5137 = vmatmul.mubr.msk.bf16.vlgmr.msra.gmra.mxu1 %vm146_vm1, %v1386_v6 }
 0xba3   :  { %1568 = vmatpush1.bf16.msra.mxu1 %v6556_v11  ;;  %1591 = vmatprep.mubr.bf16.mxu1 %v7868_v22 }
 0xba4   :  { %1569 = vmatprep.subr.bf16.mxu1 %v6562_v29 }
 0xba7   :  { %1570 = vmatpush1.bf16.msra.mxu1 %v6578_v59 }
 0xba8   :  { %1571 = vmatprep.subr.bf16.mxu1 %v1381_v40 }
 0xbab   :  { %1572 = vmatpush1.bf16.msra.mxu1 %v1380_v0 }
 0xbac   :  { %1573 = vmatprep.subr.bf16.mxu1 %v1379_v54 }
 0xbaf   :  { %1574 = vmatpush1.bf16.msra.mxu1 %v1378_v34 }
 0xc62   :  { %v6612_v14 = vpop.f32.mrf.mxu1 }
 0xc63   :  { %7878 = vst [vmem:[#allocation19_spill] sm:$0xff] %v6612_v14  ;;  %v1431_v53 = vsel %vm191_vm2, %v6612_v14, -inf }
 0xc64   :  { %v1426_v49 = vpop.f32.mrf.mxu1 }
 0xc65   :  { %v1432_v1 = vsel %vm193_vm3, %v1426_v49, -inf }
 0xc66   :  { %v1428_v18 = vpop.f32.mrf.mxu1  ;;  %v1433_v15 = vmax.f32 %v1431_v53, %v1432_v1  ;;  %v5140_v1 = vmul.f32 -1.442695, %v1426_v49 }
 0xc68   :  { %1434 = vmax.xlane.f32.xlu1 %v1433_v15  ;;  %v1429_v21 = vpop.f32.mrf.mxu1 }
 0xc69   :  { %v6625_v21 = vld [vmem:[#allocation9 + $0x38] sm:$0xff] }
 0xc6a   :  { %1687 = vmatprep.subr.mxu1 %v6625_v21 }
 0xcf1   :  { %v1435_v36 = vpop.xlane.xlu1 %1434 }
 0xcf2   :  { %v1436_v28 = vrot.slane %v1435_v36, 4 }
 0xcf4   :  { %v1437_v63 = vmax.f32 %v1435_v36, %v1436_v28  ;;  %v6634_v28 = vld [vmem:[#allocation9 + $0x28] sm:$0xff] }
 0xcf6   :  { %v1438_v38 = vrot.slane %v1437_v63, 2 }
 0xcf8   :  { %v1439_v39 = vmax.f32 %v1437_v63, %v1438_v38  ;;  %v6637_v63 = vld [vmem:[#allocation9 + $0x20] sm:$0xff]  ;;  %v6640_v38 = vld [vmem:[#allocation9 + $0x18] sm:$0xff] }
 0xcfa   :  { %v1440_v51 = vrot.slane %v1439_v39, 1 }
 0xcfc   :  { %v1441_v37 = vmax.f32 %v1439_v39, %v1440_v51  ;;  %v6644_v39 = vld [vmem:[#allocation9 + $0x10] sm:$0xff]  ;;  %v6647_v51 = vld [vmem:[#allocation9 + $0x8] sm:$0xff] }
 0xcfe   :  { %5649 = vpush %v1441_v37  ;;  %v6650_v37 = vld [vmem:[#allocation9] sm:$0xff] }
 0xd2f   :  { %s5650_s20 = spop %5649 }
 0xd30   :  { %v1443_v7 = vstv %s5650_s20 }
 0xd31   :  { %v1444_v17 = vsub.f32 %v6612_v14, %v1443_v7  ;;  %v1445_v44 = vsub.f32 %v1426_v49, %v1443_v7  ;;  %v6632_v49 = vld [vmem:[#allocation9 + $0x30] sm:$0xff] }
 0xd33   :  { %v1446_v5 = vmul.f32 1.442695, %v1444_v17  ;;  %v1448_v56 = vmul.f32 1.442695, %v1445_v44 }
 0xd35   :  { %5736 = vpow2.f32 %v1446_v5 }
 0xd36   :  { %5738 = vpow2.f32 %v1448_v56 }
 0xd37   :  { %5740 = vpow2.f32 %v5140_v1 }
 0xd42   :  { %v5737_v58 = vpop.eup %5736 }
 0xd43   :  { %v5739_v33 = vpop.eup %5738 }
 0xd44   :  { %v5685_v32 = vpack.i.bf16 %v5739_v33, %v5737_v58  ;;  %v5741_v15 = vpop.eup %5740 }
 0xd46   :  { %5686 = vrot.lane.b32.xlu0 %v5685_v32, %s5936_s4 }
 0xdb8   :  { %v5687_v60 = vpop.permute.xlu0 %5686 }
 0xdb9   :  { %v5689_v42 = vunpack.i.h.bf16 %v5687_v60  ;;  %v5688_v50 = vunpack.i.l.bf16 %v5687_v60 }
 0xdbb   :  { %v1472_v61 = vsel %vm146_vm1, %v5688_v50, %v5689_v42 }
 0xdbc   :  { %5466 = vmatmul.mubr.f32.vlgmr.msra.gmra.mxu0 %v1472_v61 }
 0xdbd   :  { %1612 = vmatpush1.bf16.msra.mxu0 %v6556_v11  ;;  %1635 = vmatprep.mubr.bf16.mxu0 %v7868_v22  ;;  %v1647_v11 = vadd.f32 1.0, %v5741_v15 }
 0xdbe   :  { %1613 = vmatprep.subr.bf16.mxu0 %v6562_v29 }
 0xdc1   :  { %1614 = vmatpush1.bf16.msra.mxu0 %v6578_v59 }
 0xdc2   :  { %1615 = vmatprep.subr.bf16.mxu0 %v1381_v40 }
 0xdc5   :  { %1616 = vmatpush1.bf16.msra.mxu0 %v1380_v0 }
 0xdc6   :  { %1617 = vmatprep.subr.bf16.mxu0 %v1379_v54 }
 0xdc9   :  { %1618 = vmatpush1.bf16.msra.mxu0 %v1378_v34 }
 0xe7c   :  { %v1540_v6 = vpop.f32.mrf.mxu0 }
 0xe7d   :  { %1545 = vrot.lane.b32.xlu1 %v1540_v6, %s5936_s4 }
 0xe7e   :  { %v5467_v53 = vpop.f32.mrf.mxu0 }
 0xeef   :  { %v1546_v18 = vpop.permute.xlu1 %1545 }
 0xef0   :  { %5742 = vrcp.f32 %v1546_v18 }
 0xef1   :  { %5744 = vrcp.f32 %v1647_v11 }
 0xefd   :  { %v5743_v29 = vpop.eup %5742 }
 0xefe   :  { %v1550_v59 = vmul.f32 %v5743_v29, %v5739_v33  ;;  %v1549_v40 = vmul.f32 %v5743_v29, %v5737_v58  ;;  %v5745_v34 = vpop.eup %5744 }
 0xf00   :  { %v1552_v0 = vpack.c.bf16 %v1550_v59, %v1550_v59  ;;  %v1551_v54 = vpack.c.bf16 %v1549_v40, %v1549_v40 }
 0xf02   :  { %5139 = vmatmul.mubr.msk.bf16.vlgmr.msra.gmra.mxu0 %vm146_vm1, %v1552_v0  ;;  %1554 = vrot.lane.b32.xlu1 %v1551_v54, %s5936_s4 }
 0xf03   :  { %2037 = vmatprep.mubr.bf16.mxu0 %v7868_v22 }
 0xf06   :  { %1659 = vrot.lane.b32.xlu1 %v5745_v34, %s5936_s4  ;;  %v6677_v34 = vld [vmem:[#allocation8 + $0x78] sm:$0xff] }
 0xf2f   :  { %1738 = vxpose.xlu1.b32.start.end [1/1] (short) (narrow) %v1550_v59, 64 }
 0xf74   :  { %v1555_v36 = vpop.permute.xlu1 %1554 }
 0xf75   :  { %5138 = vmatmul.mubr.msk.bf16.vlgmr.msra.gmra.mxu1 %vm146_vm1, %v1555_v36  ;;  %v6681_v36 = vld [vmem:[#allocation8 + $0x70] sm:$0xff] }
 0xf76   :  { %1688 = vmatpush1.msra.mxu1 %v6632_v49  ;;  %1727 = vmatprep.mubr.f32.mxu1 %v7869_v24 }
 0xf77   :  { %1689 = vmatprep.subr.mxu1 %v6634_v28 }
 0xf78   :  { %1690 = vmatpush1.msra.mxu1 %v6637_v63  ;;  %v1660_v7 = vpop.permute.xlu1 %1659 }
 0xf79   :  { %1691 = vmatprep.subr.mxu1 %v6640_v38 }
 0xf7a   :  { %1692 = vmatpush1.msra.mxu1 %v6644_v39 }
 0xf7b   :  { %1693 = vmatprep.subr.mxu1 %v6647_v51 }
 0xf7c   :  { %1694 = vmatpush1.msra.mxu1 %v6650_v37 }
 0xf7d   :  { %5141 = vmatmul.mubr.msk.f32.vlgmr.msra.gmra.mxu1 %vm423_vm5, %v1660_v7  ;;  %v6685_v7 = vld [vmem:[#allocation8 + $0x68] sm:$0xff] }
 0xf7e   :  { %1864 = vmatprep.mubr.f32.mxu1 %v7869_v24 }
 0xfab   :  { %v1754_v58 = vpop.trf.xlu1 }
 0xfaf   :  { %v1755_v42 = vpop.trf.xlu1 }
 0xfb3   :  { %v1756_v18 = vpop.trf.xlu1 }
 0xfb7   :  { %v1757_v29 = vpop.trf.xlu1 }
 0xfbb   :  { %v1758_v59 = vpop.trf.xlu1 }
 0xfbf   :  { %v1759_v40 = vpop.trf.xlu1 }
 0xfc2   :  { %v1637_v17 = vpop.f32.mrf.mxu0 }
 0xfc3   :  { %v1760_v0 = vpop.trf.xlu1 }
 0xfc4   :  { %v1639_v44 = vpop.f32.mrf.mxu0 }
 0xfc6   :  { %v1641_v5 = vpop.f32.mrf.mxu0 }
 0xfc7   :  { %v1761_v54 = vpop.trf.xlu1  ;;  %v6697_v5 = vld [vmem:[#allocation8 + $0x50] sm:$0xff] }
 0xfc8   :  { %v1642_v56 = vpop.f32.mrf.mxu0 }
0x1035   :  { %v1593_v33 = vpop.f32.mrf.mxu1 }
0x1036   :  { %v1734_v53 = vsub.f32 %v1593_v33, %v1637_v17  ;;  %v6689_v17 = vld [vmem:[#allocation8 + $0x60] sm:$0xff] }
0x1037   :  { %v1595_v32 = vpop.f32.mrf.mxu1 }
0x1038   :  { %v1735_v6 = vsub.f32 %v1595_v32, %v1639_v44  ;;  %v6693_v44 = vld [vmem:[#allocation8 + $0x58] sm:$0xff] }
0x1039   :  { %v1597_v60 = vpop.f32.mrf.mxu1 }
0x103b   :  { %v1598_v50 = vpop.f32.mrf.mxu1 }
0x103d   :  { %v1729_v61 = vpop.f32.mrf.mxu1 }
0x103e   :  { %v1736_v11 = vmul.f32 %v1734_v53, %v1729_v61  ;;  %v6742_v53 = vld [vmem:[#allocation11 + $0x48] sm:$0xff] }
0x103f   :  { %v1731_v1 = vpop.f32.mrf.mxu1 }
0x1040   :  { %v1737_v15 = vmul.f32 %v1735_v6, %v1731_v1 }
0x1042   :  { %5142 = vmatprep.subr.msk.mxu1 %vm558_vm6, %v1737_v15 }
0x1043   :  { %5143 = vmatpush1.msk.msra.mxu1 %vm558_vm6, %v1736_v11  ;;  %v6747_v11 = vld [vmem:[#allocation11 + $0x58] sm:$0xff] }
0x1044   :  { %5144 = vmatmul.mubr.msk.f32.vlgmr.msra.gmra.mxu1 %vm533_vm7, %v1754_v58  ;;  %5468 = vmatprep.subr.mxu1 %v7869_v24 }
0x1045   :  { %1870 = vmatprep.mubr.f32.mxu1 %v7869_v24  ;;  %5469 = vmatpush3.msra.mxu1 %v6677_v34 }
0x1046   :  { %5470 = vmatprep.subr.mxu1 %v7869_v24 }
0x1047   :  { %5471 = vmatpush3.msra.mxu1 %v6681_v36 }
0x1048   :  { %5145 = vmatmul.mubr.msk.f32.gmra.mxu1 %vm533_vm7, %v1755_v42  ;;  %5472 = vmatprep.subr.mxu1 %v7869_v24  ;;  %v6737_v42 = vld [vmem:[#allocation11 + $0x38] sm:$0xff] }
0x1049   :  { %1876 = vmatprep.mubr.f32.mxu1 %v7869_v24  ;;  %5473 = vmatpush3.msra.mxu1 %v6685_v7 }
0x104a   :  { %5474 = vmatprep.subr.mxu1 %v7869_v24 }
0x104b   :  { %5475 = vmatpush3.msra.mxu1 %v6689_v17 }
0x104c   :  { %5146 = vmatmul.mubr.msk.f32.gmra.mxu1 %vm533_vm7, %v1756_v18  ;;  %5476 = vmatprep.subr.mxu1 %v7869_v24 }
0x104d   :  { %1882 = vmatprep.mubr.f32.mxu1 %v7869_v24  ;;  %5477 = vmatpush3.msra.mxu1 %v6693_v44 }
0x104e   :  { %5478 = vmatprep.subr.mxu1 %v7869_v24 }
0x104f   :  { %5479 = vmatpush3.msra.mxu1 %v6697_v5 }
0x1050   :  { %5147 = vmatmul.mubr.msk.f32.gmra.mxu1 %vm533_vm7, %v1757_v29  ;;  %5480 = vmatprep.subr.mxu1 %v7869_v24 }
0x1051   :  { %1888 = vmatprep.mubr.f32.mxu1 %v7869_v24  ;;  %5481 = vmatpush3.msra.mxu1 %v6467_v45 }
0x1052   :  { %5482 = vmatprep.subr.mxu1 %v7869_v24 }
0x1053   :  { %5483 = vmatpush3.msra.mxu1 %v6471_v46  ;;  %v6722_v46 = vld [vmem:[#allocation11 + $0x8] sm:$0xff] }
0x1054   :  { %5148 = vmatmul.mubr.msk.f32.gmra.mxu1 %vm533_vm7, %v1758_v59  ;;  %5484 = vmatprep.subr.mxu1 %v7869_v24 }
0x1055   :  { %1894 = vmatprep.mubr.f32.mxu1 %v7869_v24  ;;  %5485 = vmatpush3.msra.mxu1 %v6475_v47 }
0x1056   :  { %5486 = vmatprep.subr.mxu1 %v7869_v24 }
0x1057   :  { %5487 = vmatpush3.msra.mxu1 %v6479_v55 }
0x1058   :  { %5149 = vmatmul.mubr.msk.f32.gmra.mxu1 %vm533_vm7, %v1759_v40  ;;  %5488 = vmatprep.subr.mxu1 %v7869_v24 }
0x1059   :  { %1900 = vmatprep.mubr.f32.mxu1 %v7869_v24  ;;  %5489 = vmatpush3.msra.mxu1 %v6483_v9 }
0x105a   :  { %5490 = vmatprep.subr.mxu1 %v7869_v24 }
0x105b   :  { %5491 = vmatpush3.msra.mxu1 %v6486_v12  ;;  %v6727_v12 = vld [vmem:[#allocation11 + $0x18] sm:$0xff] }
0x105c   :  { %5150 = vmatmul.mubr.msk.f32.gmra.mxu1 %vm533_vm7, %v1760_v0  ;;  %5492 = vmatprep.subr.mxu1 %v7869_v24  ;;  %v6752_v0 = vld [vmem:[#allocation11 + $0x68] sm:$0xff] }
0x105d   :  { %1906 = vmatprep.mubr.f32.mxu1 %v7869_v24  ;;  %5493 = vmatpush3.msra.mxu1 %v6489_v10 }
0x105e   :  { %5494 = vmatprep.subr.mxu1 %v7869_v24 }
0x105f   :  { %5495 = vmatpush3.msra.mxu1 %v6493_v19 }
0x1060   :  { %5151 = vmatmul.mubr.msk.f32.gmra.mxu1 %vm533_vm7, %v1761_v54  ;;  %5496 = vmatprep.subr.mxu1 %v7869_v24 }
0x1061   :  { %5500 = vmatprep.mubr.msk.f32.mxu1 %vm5935_vm4, %v7869_v24  ;;  %5497 = vmatpush3.msra.mxu1 %v6497_v16 }
0x1062   :  { %5498 = vmatprep.subr.mxu1 %v7869_v24 }
0x1063   :  { %5499 = vmatpush3.msra.mxu1 %v6501_v8  ;;  %v6732_v8 = vld [vmem:[#allocation11 + $0x28] sm:$0xff] }
0x1104   :  { %v6720_v45 = vpop.f32.mrf.mxu1 }
0x1106   :  { %v1868_v47 = vpop.f32.mrf.mxu1 }
0x1107   :  { %v1930_v55 = vmul.f32 %v6722_v46, %v1868_v47 }
0x1108   :  { %v6725_v9 = vpop.f32.mrf.mxu1 }
0x1109   :  { %v1946_v10 = vadd.f32 %v1930_v55, %v6597_v3 }
0x110a   :  { %v1874_v19 = vpop.f32.mrf.mxu1 }
0x110b   :  { %1962 = vst.msk [vmem:[#allocation2 + $0x8] sm:$0xff] %vm105_vm0, %v1946_v10  ;;  %v1932_v16 = vmul.f32 %v6727_v12, %v1874_v19  ;;  %v6757_v10 = vld [vmem:[#allocation11 + $0x78] sm:$0xff] }
0x110c   :  { %v1878_v56 = vpop.f32.mrf.mxu1 }
0x110d   :  { %v1948_v58 = vadd.f32 %v1932_v16, %v6590_v31 }
0x110e   :  { %v1880_v33 = vpop.f32.mrf.mxu1 }
0x110f   :  { %1964 = vst.msk [vmem:[#allocation2 + $0x18] sm:$0xff] %vm105_vm0, %v1948_v58  ;;  %v1934_v32 = vmul.f32 %v6732_v8, %v1880_v33  ;;  %v6762_v58 = vld [vmem:[#allocation11 + $0x70] sm:$0xff] }
0x1110   :  { %v1884_v60 = vpop.f32.mrf.mxu1 }
0x1111   :  { %v1950_v3 = vadd.f32 %v1934_v32, %v6580_v48 }
0x1112   :  { %v1886_v50 = vpop.f32.mrf.mxu1 }
0x1113   :  { %1966 = vst.msk [vmem:[#allocation2 + $0x28] sm:$0xff] %vm105_vm0, %v1950_v3  ;;  %v1936_v61 = vmul.f32 %v6737_v42, %v1886_v50  ;;  %v6769_v3 = vld [vmem:[#allocation11 + $0x50] sm:$0xff] }
0x1114   :  { %v1890_v6 = vpop.f32.mrf.mxu1 }
0x1115   :  { %v1952_v31 = vadd.f32 %v1936_v61, %v6569_v27 }
0x1116   :  { %v1892_v1 = vpop.f32.mrf.mxu1 }
0x1117   :  { %1968 = vst.msk [vmem:[#allocation2 + $0x38] sm:$0xff] %vm105_vm0, %v1952_v31  ;;  %v1938_v18 = vmul.f32 %v6742_v53, %v1892_v1  ;;  %v6778_v1 = vld [vmem:[#allocation11 + $0x30] sm:$0xff] }
0x1118   :  { %v1896_v15 = vpop.f32.mrf.mxu1 }
0x1119   :  { %v1954_v48 = vadd.f32 %v1938_v18, %v6558_v35  ;;  %v1939_v61 = vmul.f32 %v6769_v3, %v1896_v15 }
0x111a   :  { %v1898_v29 = vpop.f32.mrf.mxu1 }
0x111b   :  { %1970 = vst.msk [vmem:[#allocation2 + $0x48] sm:$0xff] %vm105_vm0, %v1954_v48  ;;  %v1940_v59 = vmul.f32 %v6747_v11, %v1898_v29 }
0x111c   :  { %v1902_v40 = vpop.f32.mrf.mxu1 }
0x111d   :  { %v1956_v27 = vadd.f32 %v1940_v59, %v6546_v20  ;;  %v6765_v20 = vld [vmem:[#allocation11 + $0x60] sm:$0xff] }
0x111e   :  { %v1904_v54 = vpop.f32.mrf.mxu1  ;;  %v1941_v50 = vmul.f32 %v6765_v20, %v1902_v40  ;;  %v6790_v40 = vld [vmem:[#allocation11 + $0x20] sm:$0xff] }
0x111f   :  { %1972 = vst.msk [vmem:[#allocation2 + $0x58] sm:$0xff] %vm105_vm0, %v1956_v27  ;;  %v1942_v47 = vmul.f32 %v6752_v0, %v1904_v54  ;;  %7879 = vst [vmem:[#allocation18_spill] sm:$0xff] %v6790_v40  ;;  %v6796_v27 = vadd.f32 %v1939_v61, %v6552_v62  ;;  %v6804_v54 = vld [vmem:[#allocation11 + $0x10] sm:$0xff] }
0x1120   :  { %v1908_v55 = vpop.f32.mrf.mxu1  ;;  %v6782_v18 = vadd.f32 %v1941_v50, %v6540_v41  ;;  %7881 = vst [vmem:[#allocation20_spill] sm:$0xff] %v6804_v54  ;;  %v6815_v62 = vld [vmem:[#allocation2 + $0x38] sm:$0xff] }
0x1121   :  { %v1958_v35 = vadd.f32 %v1942_v47, %v6542_v43  ;;  %v1943_v32 = vmul.f32 %v6762_v58, %v1908_v55  ;;  %v6772_v43 = vld [vmem:[#allocation11 + $0x40] sm:$0xff]  ;;  %7880 = vst [vmem:[#allocation21_spill] sm:$0xff] %v6796_v27  ;;  %v1933_v55 = vmul.f32 %v6790_v40, %v1878_v56 }
0x1122   :  { %v1910_v19 = vpop.f32.mrf.mxu1 }
0x1123   :  { %1974 = vst.msk [vmem:[#allocation2 + $0x68] sm:$0xff] %vm105_vm0, %v1958_v35  ;;  %v1944_v16 = vmul.f32 %v6757_v10, %v1910_v19  ;;  %v6776_v31 = vadd.f32 %v1943_v32, %v6536_v13  ;;  %v1935_v13 = vmul.f32 %v6778_v1, %v1884_v60  ;;  %v6817_v35 = vld [vmem:[#allocation11] sm:$0xff]  ;;  %v1931_v19 = vmul.f32 %v6804_v54, %v6725_v9 }
0x1124   :  { %7883 = vst [vmem:[#allocation23_spill] sm:$0xff] %v6817_v35  ;;  %v1929_v32 = vmul.f32 %v6817_v35, %v6720_v45  ;;  %v6838_v50 = vadd.f32 %v1933_v55, %v6587_v2  ;;  %v7888_v55 = vld [vmem:[#allocation26_spill] sm:$0xff] }
0x1125   :  { %v1960_v33 = vadd.f32 %v1944_v16, %v6544_v52  ;;  %v1937_v52 = vmul.f32 %v6772_v43, %v1890_v6  ;;  %v6800_v41 = vpack.c.bf16 %v6776_v31, %v6782_v18  ;;  %v6802_v6 = vld [vmem:[#allocation2 + $0x48] sm:$0xff]  ;;  %v6823_v16 = vadd.f32 %v1935_v13, %v6574_v57  ;;  %v6841_v57 = vld [vmem:[#allocation2 + $0x18] sm:$0xff] }
0x1126   :  { %v6788_v59 = vld [vmem:[#allocation2 + $0x58] sm:$0xff]  ;;  %7885 = vst [vmem:[#allocation28_spill] sm:$0xff] %v6838_v50  ;;  %v6845_v9 = vadd.f32 %v1931_v19, %v6593_v23  ;;  %v6854_v2 = vadd.f32 %v1929_v32, %v6602_v25  ;;  %v2001_v14 = vrot.slane %v7888_v55, 1 }
0x1127   :  { %1976 = vst.msk [vmem:[#allocation2 + $0x78] sm:$0xff] %vm105_vm0, %v1960_v33  ;;  %v6808_v47 = vpack.c.bf16 %v6788_v59, %v6802_v6  ;;  %v6812_v60 = vadd.f32 %v1937_v52, %v6566_v26  ;;  %7884 = vst [vmem:[#allocation25_spill] sm:$0xff] %v6823_v16  ;;  %v6829_v26 = vld [vmem:[#allocation2 + $0x28] sm:$0xff]  ;;  %v1995_v61 = vpack.c.bf16 %v6823_v16, %v6838_v50 }
0x1128   :  { %v6833_v33 = vpack.c.bf16 %v6815_v62, %v6829_v26  ;;  %7886 = vst [vmem:[#allocation29_spill] sm:$0xff] %v6845_v9  ;;  %v6849_v52 = vld [vmem:[#allocation2 + $0x8] sm:$0xff]  ;;  %7887 = vst [vmem:[#allocation30_spill] sm:$0xff] %v6854_v2  ;;  %v1993_v13 = vpack.c.bf16 %v6845_v9, %v6854_v2 }
0x1129   :  { %7882 = vst [vmem:[#allocation22_spill] sm:$0xff] %v6812_v60  ;;  %v6827_v56 = vpack.c.bf16 %v6796_v27, %v6812_v60  ;;  %v1994_v45 = vpack.c.bf16 %v6841_v57, %v6849_v52 }
0x112a   :  { %v6784_v48 = vld [vmem:[#allocation2 + $0x68] sm:$0xff] }
0x112e   :  { %v6786_v29 = vld [vmem:[#allocation2 + $0x78] sm:$0xff] }
0x112f   :  { %v2000_v15 = vpack.c.bf16 %v6786_v29, %v6784_v48 }
0x1131   :  { %2013 = vmatprep.subr.bf16.mxu0 %v2000_v15  ;;  %2226 = vmatprep.subr.bf16.mxu1 %v2000_v15 }
0x1132   :  { %2014 = vmatpush1.bf16.msra.mxu0 %v6800_v41 }
0x1133   :  { %2015 = vmatprep.subr.bf16.mxu0 %v6808_v47 }
0x1136   :  { %2016 = vmatpush1.bf16.msra.mxu0 %v6827_v56 }
0x1137   :  { %2017 = vmatprep.subr.bf16.mxu0 %v6833_v33 }
0x113a   :  { %2018 = vmatpush1.bf16.msra.mxu0 %v1995_v61 }
0x113b   :  { %2019 = vmatprep.subr.bf16.mxu0 %v1994_v45 }
0x113e   :  { %2020 = vmatpush1.bf16.msra.mxu0 %v1993_v13 }
0x113f   :  { %2182 = vmatprep.subr.bf16.mxu0 %v2000_v15 }
0x1141   :  { %5152 = vmatmul.mubr.msk.bf16.vlgmr.msra.gmra.mxu0 %vm146_vm1, %v2001_v14 }
0x1142   :  { %2183 = vmatpush1.bf16.msra.mxu0 %v6800_v41  ;;  %2206 = vmatprep.mubr.bf16.mxu0 %v7868_v22 }
0x1143   :  { %2184 = vmatprep.subr.bf16.mxu0 %v6808_v47 }
0x1146   :  { %2185 = vmatpush1.bf16.msra.mxu0 %v6827_v56 }
0x1147   :  { %2186 = vmatprep.subr.bf16.mxu0 %v6833_v33 }
0x114a   :  { %2187 = vmatpush1.bf16.msra.mxu0 %v1995_v61 }
0x114b   :  { %2188 = vmatprep.subr.bf16.mxu0 %v1994_v45 }
0x114e   :  { %2189 = vmatpush1.bf16.msra.mxu0 %v1993_v13 }
0x114f   :  { %2302 = vmatprep.subr.mxu0 %v6625_v21 }
0x1201   :  { %v6866_v23 = vpop.f32.mrf.mxu0 }
0x1202   :  { %7889 = vst [vmem:[#allocation31_spill] sm:$0xff] %v6866_v23  ;;  %v2046_v14 = vsel %vm191_vm2, %v6866_v23, -inf }
0x1203   :  { %v2041_v25 = vpop.f32.mrf.mxu0 }
0x1204   :  { %v2047_v15 = vsel %vm193_vm3, %v2041_v25, -inf }
0x1205   :  { %v2043_v19 = vpop.f32.mrf.mxu0  ;;  %v2048_v32 = vmax.f32 %v2046_v14, %v2047_v15 }
0x1207   :  { %2049 = vmax.xlane.f32.xlu0 %v2048_v32  ;;  %v2044_v30 = vpop.f32.mrf.mxu0 }
0x1290   :  { %v2050_v55 = vpop.xlane.xlu0 %2049 }
0x1291   :  { %v2051_v4 = vrot.slane %v2050_v55, 4 }
0x1293   :  { %v2052_v2 = vmax.f32 %v2050_v55, %v2051_v4 }
0x1295   :  { %v2053_v9 = vrot.slane %v2052_v2, 2 }
0x1297   :  { %v2054_v50 = vmax.f32 %v2052_v2, %v2053_v9 }
0x1299   :  { %v2055_v35 = vrot.slane %v2054_v50, 1 }
0x129b   :  { %v2056_v16 = vmax.f32 %v2054_v50, %v2055_v35 }
0x129d   :  { %5651 = vpush %v2056_v16 }
0x12ce   :  { %s5652_s21 = spop %5651 }
0x12cf   :  { %v2058_v21 = vstv %s5652_s21 }
0x12d0   :  { %v2059_v54 = vsub.f32 %v6866_v23, %v2058_v21  ;;  %v2060_v60 = vsub.f32 %v2041_v25, %v2058_v21 }
0x12d2   :  { %v2061_v40 = vmul.f32 1.442695, %v2059_v54  ;;  %v2063_v27 = vmul.f32 1.442695, %v2060_v60  ;;  %v5155_v54 = vmul.f32 -1.442695, %v2041_v25 }
0x12d4   :  { %5746 = vpow2.f32 %v2061_v40 }
0x12d5   :  { %5748 = vpow2.f32 %v2063_v27 }
0x12d6   :  { %5750 = vpow2.f32 %v5155_v54  ;;  %v6943_v54 = vld [vmem:[#allocation8 + $0x28] sm:$0xff] }
0x12e1   :  { %v5747_v14 = vpop.eup %5746 }
0x12e2   :  { %v5749_v15 = vpop.eup %5748 }
0x12e3   :  { %v5690_v30 = vpack.i.bf16 %v5749_v15, %v5747_v14 }
0x12e5   :  { %5691 = vrot.lane.b32.xlu1 %v5690_v30, %s5936_s4 }
0x1357   :  { %v5692_v4 = vpop.permute.xlu1 %5691 }
0x1358   :  { %v5694_v55 = vunpack.i.h.bf16 %v5692_v4  ;;  %v5693_v9 = vunpack.i.l.bf16 %v5692_v4 }
0x135a   :  { %v2087_v35 = vsel %vm146_vm1, %v5693_v9, %v5694_v55 }
0x135b   :  { %5501 = vmatmul.mubr.f32.vlgmr.msra.gmra.mxu1 %v2087_v35 }
0x135c   :  { %2227 = vmatpush1.bf16.msra.mxu1 %v6800_v41  ;;  %2250 = vmatprep.mubr.bf16.mxu1 %v7868_v22  ;;  %v5751_v41 = vpop.eup %5750 }
0x135d   :  { %2228 = vmatprep.subr.bf16.mxu1 %v6808_v47  ;;  %v2262_v16 = vadd.f32 1.0, %v5751_v41  ;;  %v6949_v41 = vld [vmem:[#allocation8 + $0x18] sm:$0xff] }
0x1360   :  { %2229 = vmatpush1.bf16.msra.mxu1 %v6827_v56 }
0x1361   :  { %2230 = vmatprep.subr.bf16.mxu1 %v6833_v33 }
0x1364   :  { %2231 = vmatpush1.bf16.msra.mxu1 %v1995_v61 }
0x1365   :  { %2232 = vmatprep.subr.bf16.mxu1 %v1994_v45 }
0x1368   :  { %2233 = vmatpush1.bf16.msra.mxu1 %v1993_v13 }
0x141b   :  { %v2155_v40 = vpop.f32.mrf.mxu1 }
0x141c   :  { %2160 = vrot.lane.b32.xlu0 %v2155_v40, %s5936_s4 }
0x141d   :  { %v5502_v27 = vpop.f32.mrf.mxu1 }
0x141e   :  { %v6939_v27 = vld [vmem:[#allocation8 + $0x30] sm:$0xff] }
0x148e   :  { %v2161_v60 = vpop.permute.xlu0 %2160 }
0x148f   :  { %5752 = vrcp.f32 %v2161_v60  ;;  %v6946_v60 = vld [vmem:[#allocation8 + $0x20] sm:$0xff] }
0x1490   :  { %5754 = vrcp.f32 %v2262_v16  ;;  %v6953_v16 = vld [vmem:[#allocation8 + $0x10] sm:$0xff] }
0x149c   :  { %v5753_v50 = vpop.eup %5752 }
0x149d   :  { %v2165_v47 = vmul.f32 %v5753_v50, %v5749_v15  ;;  %v2164_v2 = vmul.f32 %v5753_v50, %v5747_v14  ;;  %v5755_v33 = vpop.eup %5754  ;;  %v6957_v50 = vld [vmem:[#allocation8 + $0x8] sm:$0xff] }
0x149f   :  { %v2167_v56 = vpack.c.bf16 %v2165_v47, %v2165_v47  ;;  %v2166_v19 = vpack.c.bf16 %v2164_v2, %v2164_v2 }
0x14a1   :  { %5154 = vmatmul.mubr.msk.bf16.vlgmr.msra.gmra.mxu1 %vm146_vm1, %v2167_v56  ;;  %2169 = vrot.lane.b32.xlu0 %v2166_v19, %s5936_s4 }
0x14a2   :  { %2652 = vmatprep.mubr.bf16.mxu1 %v7868_v22 }
0x14a5   :  { %2274 = vrot.lane.b32.xlu0 %v5755_v33, %s5936_s4 }
0x14c3   :  { %2353 = vxpose.xlu0.b32.start.end [1/1] (short) (narrow) %v2165_v47, 64  ;;  %v6961_v47 = vld [vmem:[#allocation8] sm:$0xff] }
0x1513   :  { %v2170_v61 = vpop.permute.xlu0 %2169 }
0x1514   :  { %5153 = vmatmul.mubr.msk.bf16.vlgmr.msra.gmra.mxu0 %vm146_vm1, %v2170_v61 }
0x1515   :  { %2303 = vmatpush1.msra.mxu0 %v6632_v49  ;;  %2342 = vmatprep.mubr.f32.mxu0 %v7869_v24 }
0x1516   :  { %2304 = vmatprep.subr.mxu0 %v6634_v28 }
0x1517   :  { %2305 = vmatpush1.msra.mxu0 %v6637_v63  ;;  %v2275_v45 = vpop.permute.xlu0 %2274 }
0x1518   :  { %2306 = vmatprep.subr.mxu0 %v6640_v38 }
0x1519   :  { %2307 = vmatpush1.msra.mxu0 %v6644_v39 }
0x151a   :  { %2308 = vmatprep.subr.mxu0 %v6647_v51 }
0x151b   :  { %2309 = vmatpush1.msra.mxu0 %v6650_v37 }
0x151c   :  { %5156 = vmatmul.mubr.msk.f32.vlgmr.msra.gmra.mxu0 %vm423_vm5, %v2275_v45 }
0x151d   :  { %2479 = vmatprep.mubr.f32.mxu0 %v7869_v24 }
0x153f   :  { %v2369_v28 = vpop.trf.xlu0 }
0x1543   :  { %v2370_v38 = vpop.trf.xlu0 }
0x1547   :  { %v2371_v55 = vpop.trf.xlu0 }
0x154b   :  { %v2372_v35 = vpop.trf.xlu0 }
0x154f   :  { %v2373_v40 = vpop.trf.xlu0 }
0x1561   :  { %v2252_v49 = vpop.f32.mrf.mxu1 }
0x1563   :  { %v2254_v13 = vpop.f32.mrf.mxu1 }
0x1565   :  { %v2256_v25 = vpop.f32.mrf.mxu1 }
0x1567   :  { %v2257_v32 = vpop.f32.mrf.mxu1 }
0x15d4   :  { %v2208_v21 = vpop.f32.mrf.mxu0 }
0x15d5   :  { %v2349_v51 = vsub.f32 %v2208_v21, %v2252_v49 }
0x15d6   :  { %v2210_v63 = vpop.f32.mrf.mxu0 }
0x15d7   :  { %v2350_v30 = vsub.f32 %v2210_v63, %v2254_v13 }
0x15d8   :  { %v2212_v14 = vpop.f32.mrf.mxu0 }
0x15da   :  { %v2213_v15 = vpop.f32.mrf.mxu0 }
0x15dc   :  { %v2344_v39 = vpop.f32.mrf.mxu0 }
0x15dd   :  { %v2351_v9 = vmul.f32 %v2349_v51, %v2344_v39 }
0x15de   :  { %v2346_v4 = vpop.f32.mrf.mxu0 }
0x15df   :  { %v2352_v37 = vmul.f32 %v2350_v30, %v2346_v4 }
0x15e1   :  { %5157 = vmatprep.subr.msk.mxu0 %vm558_vm6, %v2352_v37 }
0x15e2   :  { %5158 = vmatpush1.msk.msra.mxu0 %vm558_vm6, %v2351_v9 }
0x15e3   :  { %5159 = vmatmul.mubr.msk.f32.vlgmr.msra.gmra.mxu0 %vm533_vm7, %v2369_v28  ;;  %5503 = vmatprep.subr.mxu0 %v7869_v24 }
0x15e4   :  { %2485 = vmatprep.mubr.f32.mxu0 %v7869_v24  ;;  %5504 = vmatpush3.msra.mxu0 %v6677_v34  ;;  %v2374_v34 = vpop.trf.xlu0 }
0x15e5   :  { %5505 = vmatprep.subr.mxu0 %v7869_v24 }
0x15e6   :  { %5506 = vmatpush3.msra.mxu0 %v6681_v36 }
0x15e7   :  { %5160 = vmatmul.mubr.msk.f32.gmra.mxu0 %vm533_vm7, %v2370_v38  ;;  %5507 = vmatprep.subr.mxu0 %v7869_v24 }
0x15e8   :  { %2491 = vmatprep.mubr.f32.mxu0 %v7869_v24  ;;  %5508 = vmatpush3.msra.mxu0 %v6685_v7  ;;  %v2375_v36 = vpop.trf.xlu0 }
0x15e9   :  { %5509 = vmatprep.subr.mxu0 %v7869_v24 }
0x15ea   :  { %5510 = vmatpush3.msra.mxu0 %v6689_v17  ;;  %v6927_v17 = vld [vmem:[#allocation8 + $0x48] sm:$0xff] }
0x15eb   :  { %5161 = vmatmul.mubr.msk.f32.gmra.mxu0 %vm533_vm7, %v2371_v55  ;;  %5511 = vmatprep.subr.mxu0 %v7869_v24 }
0x15ec   :  { %2497 = vmatprep.mubr.f32.mxu0 %v7869_v24  ;;  %5512 = vmatpush3.msra.mxu0 %v6693_v44  ;;  %v2376_v7 = vpop.trf.xlu0  ;;  %v6931_v44 = vld [vmem:[#allocation8 + $0x40] sm:$0xff] }
0x15ed   :  { %5513 = vmatprep.subr.mxu0 %v7869_v24 }
0x15ee   :  { %5514 = vmatpush3.msra.mxu0 %v6697_v5  ;;  %v6935_v5 = vld [vmem:[#allocation8 + $0x38] sm:$0xff] }
0x15ef   :  { %5162 = vmatmul.mubr.msk.f32.gmra.mxu0 %vm533_vm7, %v2372_v35  ;;  %5515 = vmatprep.subr.mxu0 %v7869_v24 }
0x15f0   :  { %2503 = vmatprep.mubr.f32.mxu0 %v7869_v24  ;;  %5516 = vmatpush3.msra.mxu0 %v6927_v17 }
0x15f1   :  { %5517 = vmatprep.subr.mxu0 %v7869_v24 }
0x15f2   :  { %5518 = vmatpush3.msra.mxu0 %v6931_v44 }
0x15f3   :  { %5163 = vmatmul.mubr.msk.f32.gmra.mxu0 %vm533_vm7, %v2373_v40  ;;  %5519 = vmatprep.subr.mxu0 %v7869_v24 }
0x15f4   :  { %2509 = vmatprep.mubr.f32.mxu0 %v7869_v24  ;;  %5520 = vmatpush3.msra.mxu0 %v6935_v5 }
0x15f5   :  { %5521 = vmatprep.subr.mxu0 %v7869_v24 }
0x15f6   :  { %5522 = vmatpush3.msra.mxu0 %v6939_v27 }
0x15f7   :  { %5164 = vmatmul.mubr.msk.f32.gmra.mxu0 %vm533_vm7, %v2374_v34  ;;  %5523 = vmatprep.subr.mxu0 %v7869_v24 }
0x15f8   :  { %2515 = vmatprep.mubr.f32.mxu0 %v7869_v24  ;;  %5524 = vmatpush3.msra.mxu0 %v6943_v54 }
0x15f9   :  { %5525 = vmatprep.subr.mxu0 %v7869_v24 }
0x15fa   :  { %5526 = vmatpush3.msra.mxu0 %v6946_v60 }
0x15fb   :  { %5165 = vmatmul.mubr.msk.f32.gmra.mxu0 %vm533_vm7, %v2375_v36  ;;  %5527 = vmatprep.subr.mxu0 %v7869_v24  ;;  %v7891_v36 = vld [vmem:[#allocation18_spill] sm:$0xff] }
0x15fc   :  { %2521 = vmatprep.mubr.f32.mxu0 %v7869_v24  ;;  %5528 = vmatpush3.msra.mxu0 %v6949_v41 }
0x15fd   :  { %5529 = vmatprep.subr.mxu0 %v7869_v24 }
0x15fe   :  { %5530 = vmatpush3.msra.mxu0 %v6953_v16 }
0x15ff   :  { %5166 = vmatmul.mubr.msk.f32.gmra.mxu0 %vm533_vm7, %v2376_v7  ;;  %5531 = vmatprep.subr.mxu0 %v7869_v24 }
0x1600   :  { %5535 = vmatprep.mubr.msk.f32.mxu0 %vm5935_vm4, %v7869_v24  ;;  %5532 = vmatpush3.msra.mxu0 %v6957_v50 }
0x1601   :  { %5533 = vmatprep.subr.mxu0 %v7869_v24 }
0x1602   :  { %5534 = vmatpush3.msra.mxu0 %v6961_v47 }
0x16a3   :  { %v6966_v2 = vpop.f32.mrf.mxu0 }
0x16a5   :  { %v2483_v56 = vpop.f32.mrf.mxu0 }
0x16a6   :  { %v2545_v19 = vmul.f32 %v2483_v56, %v6722_v46  ;;  %v7892_v56 = vld [vmem:[#allocation22_spill] sm:$0xff] }
0x16a7   :  { %v2487_v33 = vpop.f32.mrf.mxu0 }
0x16a8   :  { %v2561_v61 = vadd.f32 %v2545_v19, %v6849_v52 }
0x16a9   :  { %v2489_v45 = vpop.f32.mrf.mxu0 }
0x16aa   :  { %2577 = vst.msk [vmem:[#allocation2 + $0x8] sm:$0xff] %vm105_vm0, %v2561_v61  ;;  %v2547_v49 = vmul.f32 %v2489_v45, %v6727_v12  ;;  %v7893_v61 = vld [vmem:[#allocation20_spill] sm:$0xff] }
0x16ab   :  { %v2493_v13 = vpop.f32.mrf.mxu0  ;;  %v2546_v45 = vmul.f32 %v2487_v33, %v7893_v61 }
0x16ac   :  { %v2563_v25 = vadd.f32 %v2547_v49, %v6841_v57  ;;  %v2548_v7 = vmul.f32 %v2493_v13, %v7891_v36  ;;  %v7894_v49 = vld [vmem:[#allocation25_spill] sm:$0xff] }
0x16ad   :  { %v2495_v32 = vpop.f32.mrf.mxu0 }
0x16ae   :  { %2579 = vst.msk [vmem:[#allocation2 + $0x18] sm:$0xff] %vm105_vm0, %v2563_v25  ;;  %v2549_v28 = vmul.f32 %v2495_v32, %v6732_v8 }
0x16af   :  { %v2499_v21 = vpop.f32.mrf.mxu0 }
0x16b0   :  { %v2565_v63 = vadd.f32 %v2549_v28, %v6829_v26 }
0x16b1   :  { %v2501_v46 = vpop.f32.mrf.mxu0 }
0x16b2   :  { %2581 = vst.msk [vmem:[#allocation2 + $0x28] sm:$0xff] %vm105_vm0, %v2565_v63  ;;  %v2551_v52 = vmul.f32 %v2501_v46, %v6737_v42  ;;  %v7896_v46 = vld [vmem:[#allocation28_spill] sm:$0xff] }
0x16b3   :  { %v2505_v14 = vpop.f32.mrf.mxu0 }
0x16b4   :  { %v2567_v38 = vadd.f32 %v2551_v52, %v6815_v62  ;;  %v7047_v52 = vadd.f32 %v2548_v7, %v7896_v46 }
0x16b5   :  { %v2507_v12 = vpop.f32.mrf.mxu0  ;;  %v7050_v33 = vld [vmem:[#allocation2 + $0x18] sm:$0xff] }
0x16b6   :  { %2583 = vst.msk [vmem:[#allocation2 + $0x38] sm:$0xff] %vm105_vm0, %v2567_v38  ;;  %v2553_v57 = vmul.f32 %v2507_v12, %v6742_v53 }
0x16b7   :  { %v2511_v15 = vpop.f32.mrf.mxu0 }
0x16b8   :  { %v2569_v39 = vadd.f32 %v2553_v57, %v6802_v6  ;;  %v2554_v9 = vmul.f32 %v2511_v15, %v6769_v3  ;;  %v7890_v3 = vld [vmem:[#allocation21_spill] sm:$0xff] }
0x16b9   :  { %v2513_v8 = vpop.f32.mrf.mxu0  ;;  %v7040_v28 = vld [vmem:[#allocation2 + $0x28] sm:$0xff] }
0x16ba   :  { %2585 = vst.msk [vmem:[#allocation2 + $0x48] sm:$0xff] %vm105_vm0, %v2569_v39  ;;  %v2555_v26 = vmul.f32 %v2513_v8, %v6747_v11  ;;  %v7012_v34 = vadd.f32 %v2554_v9, %v7890_v3  ;;  %v7057_v57 = vld [vmem:[#allocation2 + $0x8] sm:$0xff] }
0x16bb   :  { %v2517_v30 = vpop.f32.mrf.mxu0  ;;  %v2609_v15 = vpack.c.bf16 %v7050_v33, %v7057_v57 }
0x16bc   :  { %v2571_v51 = vadd.f32 %v2555_v26, %v6788_v59  ;;  %v2556_v59 = vmul.f32 %v2517_v30, %v6765_v20  ;;  %v2550_v20 = vmul.f32 %v2499_v21, %v6778_v1  ;;  %v7895_v21 = vld [vmem:[#allocation23_spill] sm:$0xff]  ;;  %v7899_v26 = vld [vmem:[#allocation24_spill] sm:$0xff] }
0x16bd   :  { %v2519_v42 = vpop.f32.mrf.mxu0  ;;  %v7029_v1 = vld [vmem:[#allocation2 + $0x38] sm:$0xff]  ;;  %v2544_v63 = vmul.f32 %v6966_v2, %v7895_v21  ;;  %v7898_v2 = vld [vmem:[#allocation30_spill] sm:$0xff]  ;;  %v2616_v30 = vrot.slane %v7899_v26, 2 }
0x16be   :  { %2587 = vst.msk [vmem:[#allocation2 + $0x58] sm:$0xff] %vm105_vm0, %v2571_v51  ;;  %v2557_v62 = vmul.f32 %v2519_v42, %v6752_v0  ;;  %v7000_v35 = vadd.f32 %v2556_v59, %v6782_v18  ;;  %v7034_v25 = vadd.f32 %v2550_v20, %v7894_v49  ;;  %v2611_v13 = vpack.c.bf16 %v7029_v1, %v7040_v28 }
0x16bf   :  { %v2523_v4 = vpop.f32.mrf.mxu0  ;;  %v7062_v39 = vadd.f32 %v2544_v63, %v7898_v2 }
0x16c0   :  { %v2573_v55 = vadd.f32 %v2557_v62, %v6784_v48  ;;  %v2558_v11 = vmul.f32 %v2523_v4, %v6762_v58  ;;  %v2552_v48 = vmul.f32 %v2505_v14, %v6772_v43  ;;  %v7897_v14 = vld [vmem:[#allocation29_spill] sm:$0xff]  ;;  %v2610_v12 = vpack.c.bf16 %v7034_v25, %v7047_v52 }
0x16c1   :  { %v2525_v53 = vpop.f32.mrf.mxu0  ;;  %v7053_v38 = vadd.f32 %v2546_v45, %v7897_v14 }
0x16c2   :  { %2589 = vst.msk [vmem:[#allocation2 + $0x68] sm:$0xff] %vm105_vm0, %v2573_v55  ;;  %v2559_v6 = vmul.f32 %v2525_v53, %v6757_v10  ;;  %v6996_v0 = vadd.f32 %v2558_v11, %v6776_v31  ;;  %v7018_v31 = vld [vmem:[#allocation2 + $0x48] sm:$0xff]  ;;  %v7026_v19 = vadd.f32 %v2552_v48, %v7892_v56 }
0x16c3   :  { %v2608_v8 = vpack.c.bf16 %v7053_v38, %v7062_v39 }
0x16c4   :  { %v2575_v37 = vadd.f32 %v2559_v6, %v6786_v29  ;;  %v7016_v43 = vpack.c.bf16 %v6996_v0, %v7000_v35  ;;  %v7038_v32 = vpack.c.bf16 %v7012_v34, %v7026_v19 }
0x16c5   :  { %v7006_v29 = vld [vmem:[#allocation2 + $0x58] sm:$0xff] }
0x16c6   :  { %2591 = vst.msk [vmem:[#allocation2 + $0x78] sm:$0xff] %vm105_vm0, %v2575_v37  ;;  %v7022_v18 = vpack.c.bf16 %v7006_v29, %v7018_v31 }
0x16c9   :  { %v7002_v40 = vld [vmem:[#allocation2 + $0x68] sm:$0xff] }
0x16cd   :  { %v7004_v10 = vld [vmem:[#allocation2 + $0x78] sm:$0xff] }
0x16ce   :  { %v2615_v58 = vpack.c.bf16 %v7004_v10, %v7002_v40 }
0x16d0   :  { %2628 = vmatprep.subr.bf16.mxu1 %v2615_v58  ;;  %2841 = vmatprep.subr.bf16.mxu0 %v2615_v58 }
0x16d1   :  { %2629 = vmatpush1.bf16.msra.mxu1 %v7016_v43 }
0x16d2   :  { %2630 = vmatprep.subr.bf16.mxu1 %v7022_v18 }
0x16d5   :  { %2631 = vmatpush1.bf16.msra.mxu1 %v7038_v32 }
0x16d6   :  { %2632 = vmatprep.subr.bf16.mxu1 %v2611_v13 }
0x16d9   :  { %2633 = vmatpush1.bf16.msra.mxu1 %v2610_v12 }
0x16da   :  { %2634 = vmatprep.subr.bf16.mxu1 %v2609_v15 }
0x16dd   :  { %2635 = vmatpush1.bf16.msra.mxu1 %v2608_v8 }
0x16de   :  { %2797 = vmatprep.subr.bf16.mxu1 %v2615_v58 }
0x16e0   :  { %5167 = vmatmul.mubr.msk.bf16.vlgmr.msra.gmra.mxu1 %vm146_vm1, %v2616_v30 }
0x16e1   :  { %2798 = vmatpush1.bf16.msra.mxu1 %v7016_v43  ;;  %2821 = vmatprep.mubr.bf16.mxu1 %v7868_v22 }
0x16e2   :  { %2799 = vmatprep.subr.bf16.mxu1 %v7022_v18 }
0x16e5   :  { %2800 = vmatpush1.bf16.msra.mxu1 %v7038_v32 }
0x16e6   :  { %2801 = vmatprep.subr.bf16.mxu1 %v2611_v13 }
0x16e9   :  { %2802 = vmatpush1.bf16.msra.mxu1 %v2610_v12 }
0x16ea   :  { %2803 = vmatprep.subr.bf16.mxu1 %v2609_v15 }
0x16ed   :  { %2804 = vmatpush1.bf16.msra.mxu1 %v2608_v8 }
0x17a0   :  { %v7072_v51 = vpop.f32.mrf.mxu1 }
0x17a1   :  { %7900 = vst [vmem:[#allocation21_spill] sm:$0xff] %v7072_v51  ;;  %v2661_v62 = vsel %vm191_vm2, %v7072_v51, -inf }
0x17a2   :  { %v2656_v42 = vpop.f32.mrf.mxu1 }
0x17a3   :  { %v2662_v4 = vsel %vm193_vm3, %v2656_v42, -inf }
0x17a4   :  { %v2658_v55 = vpop.f32.mrf.mxu1  ;;  %v2663_v53 = vmax.f32 %v2661_v62, %v2662_v4  ;;  %v5170_v4 = vmul.f32 -1.442695, %v2656_v42 }
0x17a6   :  { %2664 = vmax.xlane.f32.xlu1 %v2663_v53  ;;  %v2659_v6 = vpop.f32.mrf.mxu1 }
0x17a7   :  { %v7085_v6 = vld [vmem:[#allocation9 + $0x38] sm:$0xff] }
0x17a8   :  { %2917 = vmatprep.subr.mxu1 %v7085_v6 }
0x182f   :  { %v2665_v37 = vpop.xlane.xlu1 %2664 }
0x1830   :  { %v2666_v11 = vrot.slane %v2665_v37, 4 }
0x1832   :  { %v2667_v59 = vmax.f32 %v2665_v37, %v2666_v11  ;;  %v7094_v11 = vld [vmem:[#allocation9 + $0x28] sm:$0xff] }
0x1834   :  { %v2668_v9 = vrot.slane %v2667_v59, 2 }
0x1836   :  { %v2669_v48 = vmax.f32 %v2667_v59, %v2668_v9  ;;  %v7097_v59 = vld [vmem:[#allocation9 + $0x20] sm:$0xff]  ;;  %v7100_v9 = vld [vmem:[#allocation9 + $0x18] sm:$0xff] }
0x1838   :  { %v2670_v58 = vrot.slane %v2669_v48, 1 }
0x183a   :  { %v2671_v20 = vmax.f32 %v2669_v48, %v2670_v58  ;;  %v7104_v48 = vld [vmem:[#allocation9 + $0x10] sm:$0xff]  ;;  %v7107_v58 = vld [vmem:[#allocation9 + $0x8] sm:$0xff] }
0x183c   :  { %5653 = vpush %v2671_v20  ;;  %v7110_v20 = vld [vmem:[#allocation9] sm:$0xff] }
0x186d   :  { %s5654_s22 = spop %5653 }
0x186e   :  { %v2673_v3 = vstv %s5654_s22 }
0x186f   :  { %v2674_v36 = vsub.f32 %v7072_v51, %v2673_v3  ;;  %v2675_v7 = vsub.f32 %v2656_v42, %v2673_v3  ;;  %v7092_v42 = vld [vmem:[#allocation9 + $0x30] sm:$0xff] }
0x1871   :  { %v2676_v56 = vmul.f32 1.442695, %v2674_v36  ;;  %v2678_v61 = vmul.f32 1.442695, %v2675_v7 }
0x1873   :  { %5756 = vpow2.f32 %v2676_v56 }
0x1874   :  { %5758 = vpow2.f32 %v2678_v61 }
0x1875   :  { %5760 = vpow2.f32 %v5170_v4 }
0x1880   :  { %v5757_v45 = vpop.eup %5756 }
0x1881   :  { %v5759_v49 = vpop.eup %5758 }
0x1882   :  { %v5695_v21 = vpack.i.bf16 %v5759_v49, %v5757_v45  ;;  %v5761_v53 = vpop.eup %5760 }
0x1884   :  { %5696 = vrot.lane.b32.xlu0 %v5695_v21, %s5936_s4 }
0x18f6   :  { %v5697_v63 = vpop.permute.xlu0 %5696 }
0x18f7   :  { %v5699_v46 = vunpack.i.h.bf16 %v5697_v63  ;;  %v5698_v14 = vunpack.i.l.bf16 %v5697_v63 }
0x18f9   :  { %v2702_v2 = vsel %vm146_vm1, %v5698_v14, %v5699_v46 }
0x18fa   :  { %5536 = vmatmul.mubr.f32.vlgmr.msra.gmra.mxu0 %v2702_v2 }
0x18fb   :  { %2842 = vmatpush1.bf16.msra.mxu0 %v7016_v43  ;;  %2865 = vmatprep.mubr.bf16.mxu0 %v7868_v22  ;;  %v2877_v43 = vadd.f32 1.0, %v5761_v53 }
0x18fc   :  { %2843 = vmatprep.subr.bf16.mxu0 %v7022_v18 }
0x18ff   :  { %2844 = vmatpush1.bf16.msra.mxu0 %v7038_v32 }
0x1900   :  { %2845 = vmatprep.subr.bf16.mxu0 %v2611_v13 }
0x1903   :  { %2846 = vmatpush1.bf16.msra.mxu0 %v2610_v12 }
0x1904   :  { %2847 = vmatprep.subr.bf16.mxu0 %v2609_v15 }
0x1907   :  { %2848 = vmatpush1.bf16.msra.mxu0 %v2608_v8 }
0x19ba   :  { %v2770_v30 = vpop.f32.mrf.mxu0 }
0x19bb   :  { %2775 = vrot.lane.b32.xlu1 %v2770_v30, %s5936_s4 }
0x19bc   :  { %v5537_v62 = vpop.f32.mrf.mxu0 }
0x1a2d   :  { %v2776_v55 = vpop.permute.xlu1 %2775 }
0x1a2e   :  { %5762 = vrcp.f32 %v2776_v55 }
0x1a2f   :  { %5764 = vrcp.f32 %v2877_v43 }
0x1a3b   :  { %v5763_v18 = vpop.eup %5762 }
0x1a3c   :  { %v2780_v32 = vmul.f32 %v5763_v18, %v5759_v49  ;;  %v2779_v13 = vmul.f32 %v5763_v18, %v5757_v45  ;;  %v5765_v8 = vpop.eup %5764 }
0x1a3e   :  { %v2782_v12 = vpack.c.bf16 %v2780_v32, %v2780_v32  ;;  %v2781_v15 = vpack.c.bf16 %v2779_v13, %v2779_v13 }
0x1a40   :  { %5169 = vmatmul.mubr.msk.bf16.vlgmr.msra.gmra.mxu0 %vm146_vm1, %v2782_v12  ;;  %2784 = vrot.lane.b32.xlu1 %v2781_v15, %s5936_s4 }
0x1a41   :  { %3267 = vmatprep.mubr.bf16.mxu0 %v7868_v22 }
0x1a44   :  { %2889 = vrot.lane.b32.xlu1 %v5765_v8, %s5936_s4  ;;  %v7137_v8 = vld [vmem:[#allocation8 + $0x78] sm:$0xff] }
0x1a6d   :  { %2968 = vxpose.xlu1.b32.start.end [1/1] (short) (narrow) %v2780_v32, 64 }
0x1ab2   :  { %v2785_v37 = vpop.permute.xlu1 %2784 }
0x1ab3   :  { %5168 = vmatmul.mubr.msk.bf16.vlgmr.msra.gmra.mxu1 %vm146_vm1, %v2785_v37  ;;  %v7141_v37 = vld [vmem:[#allocation8 + $0x70] sm:$0xff] }
0x1ab4   :  { %2918 = vmatpush1.msra.mxu1 %v7092_v42  ;;  %2957 = vmatprep.mubr.f32.mxu1 %v7869_v24 }
0x1ab5   :  { %2919 = vmatprep.subr.mxu1 %v7094_v11 }
0x1ab6   :  { %2920 = vmatpush1.msra.mxu1 %v7097_v59  ;;  %v2890_v3 = vpop.permute.xlu1 %2889 }
0x1ab7   :  { %2921 = vmatprep.subr.mxu1 %v7100_v9 }
0x1ab8   :  { %2922 = vmatpush1.msra.mxu1 %v7104_v48 }
0x1ab9   :  { %2923 = vmatprep.subr.mxu1 %v7107_v58 }
0x1aba   :  { %2924 = vmatpush1.msra.mxu1 %v7110_v20 }
0x1abb   :  { %5171 = vmatmul.mubr.msk.f32.vlgmr.msra.gmra.mxu1 %vm423_vm5, %v2890_v3  ;;  %v7145_v3 = vld [vmem:[#allocation8 + $0x68] sm:$0xff] }
0x1abc   :  { %3094 = vmatprep.mubr.f32.mxu1 %v7869_v24 }
0x1ae9   :  { %v2984_v45 = vpop.trf.xlu1 }
0x1aed   :  { %v2985_v46 = vpop.trf.xlu1 }
0x1af1   :  { %v2986_v55 = vpop.trf.xlu1 }
0x1af5   :  { %v2987_v18 = vpop.trf.xlu1 }
0x1af9   :  { %v2988_v32 = vpop.trf.xlu1 }
0x1afd   :  { %v2989_v13 = vpop.trf.xlu1 }
0x1b00   :  { %v2867_v36 = vpop.f32.mrf.mxu0 }
0x1b01   :  { %v2990_v12 = vpop.trf.xlu1 }
0x1b02   :  { %v2869_v7 = vpop.f32.mrf.mxu0 }
0x1b04   :  { %v2871_v56 = vpop.f32.mrf.mxu0 }
0x1b05   :  { %v2991_v15 = vpop.trf.xlu1  ;;  %v7157_v56 = vld [vmem:[#allocation8 + $0x50] sm:$0xff] }
0x1b06   :  { %v2872_v61 = vpop.f32.mrf.mxu0 }
0x1b73   :  { %v2823_v49 = vpop.f32.mrf.mxu1 }
0x1b74   :  { %v2964_v62 = vsub.f32 %v2823_v49, %v2867_v36  ;;  %v7149_v36 = vld [vmem:[#allocation8 + $0x60] sm:$0xff] }
0x1b75   :  { %v2825_v21 = vpop.f32.mrf.mxu1 }
0x1b76   :  { %v2965_v30 = vsub.f32 %v2825_v21, %v2869_v7  ;;  %v7153_v7 = vld [vmem:[#allocation8 + $0x58] sm:$0xff] }
0x1b77   :  { %v2827_v63 = vpop.f32.mrf.mxu1 }
0x1b79   :  { %v2828_v14 = vpop.f32.mrf.mxu1 }
0x1b7b   :  { %v2959_v2 = vpop.f32.mrf.mxu1 }
0x1b7c   :  { %v2966_v43 = vmul.f32 %v2964_v62, %v2959_v2  ;;  %v7202_v62 = vld [vmem:[#allocation11 + $0x48] sm:$0xff] }
0x1b7d   :  { %v2961_v4 = vpop.f32.mrf.mxu1 }
0x1b7e   :  { %v2967_v53 = vmul.f32 %v2965_v30, %v2961_v4 }
0x1b80   :  { %5172 = vmatprep.subr.msk.mxu1 %vm558_vm6, %v2967_v53 }
0x1b81   :  { %5173 = vmatpush1.msk.msra.mxu1 %vm558_vm6, %v2966_v43  ;;  %v7207_v43 = vld [vmem:[#allocation11 + $0x58] sm:$0xff] }
0x1b82   :  { %5174 = vmatmul.mubr.msk.f32.vlgmr.msra.gmra.mxu1 %vm533_vm7, %v2984_v45  ;;  %5538 = vmatprep.subr.mxu1 %v7869_v24 }
0x1b83   :  { %3100 = vmatprep.mubr.f32.mxu1 %v7869_v24  ;;  %5539 = vmatpush3.msra.mxu1 %v7137_v8 }
0x1b84   :  { %5540 = vmatprep.subr.mxu1 %v7869_v24 }
0x1b85   :  { %5541 = vmatpush3.msra.mxu1 %v7141_v37 }
0x1b86   :  { %5175 = vmatmul.mubr.msk.f32.gmra.mxu1 %vm533_vm7, %v2985_v46  ;;  %5542 = vmatprep.subr.mxu1 %v7869_v24  ;;  %v7197_v46 = vld [vmem:[#allocation11 + $0x38] sm:$0xff] }
0x1b87   :  { %3106 = vmatprep.mubr.f32.mxu1 %v7869_v24  ;;  %5543 = vmatpush3.msra.mxu1 %v7145_v3 }
0x1b88   :  { %5544 = vmatprep.subr.mxu1 %v7869_v24 }
0x1b89   :  { %5545 = vmatpush3.msra.mxu1 %v7149_v36 }
0x1b8a   :  { %5176 = vmatmul.mubr.msk.f32.gmra.mxu1 %vm533_vm7, %v2986_v55  ;;  %5546 = vmatprep.subr.mxu1 %v7869_v24 }
0x1b8b   :  { %3112 = vmatprep.mubr.f32.mxu1 %v7869_v24  ;;  %5547 = vmatpush3.msra.mxu1 %v7153_v7 }
0x1b8c   :  { %5548 = vmatprep.subr.mxu1 %v7869_v24 }
0x1b8d   :  { %5549 = vmatpush3.msra.mxu1 %v7157_v56 }
0x1b8e   :  { %5177 = vmatmul.mubr.msk.f32.gmra.mxu1 %vm533_vm7, %v2987_v18  ;;  %5550 = vmatprep.subr.mxu1 %v7869_v24 }
0x1b8f   :  { %3118 = vmatprep.mubr.f32.mxu1 %v7869_v24  ;;  %5551 = vmatpush3.msra.mxu1 %v6927_v17 }
0x1b90   :  { %5552 = vmatprep.subr.mxu1 %v7869_v24 }
0x1b91   :  { %5553 = vmatpush3.msra.mxu1 %v6931_v44  ;;  %v7182_v44 = vld [vmem:[#allocation11 + $0x8] sm:$0xff] }
0x1b92   :  { %5178 = vmatmul.mubr.msk.f32.gmra.mxu1 %vm533_vm7, %v2988_v32  ;;  %5554 = vmatprep.subr.mxu1 %v7869_v24 }
0x1b93   :  { %3124 = vmatprep.mubr.f32.mxu1 %v7869_v24  ;;  %5555 = vmatpush3.msra.mxu1 %v6935_v5 }
0x1b94   :  { %5556 = vmatprep.subr.mxu1 %v7869_v24 }
0x1b95   :  { %5557 = vmatpush3.msra.mxu1 %v6939_v27 }
0x1b96   :  { %5179 = vmatmul.mubr.msk.f32.gmra.mxu1 %vm533_vm7, %v2989_v13  ;;  %5558 = vmatprep.subr.mxu1 %v7869_v24 }
0x1b97   :  { %3130 = vmatprep.mubr.f32.mxu1 %v7869_v24  ;;  %5559 = vmatpush3.msra.mxu1 %v6943_v54 }
0x1b98   :  { %5560 = vmatprep.subr.mxu1 %v7869_v24 }
0x1b99   :  { %5561 = vmatpush3.msra.mxu1 %v6946_v60  ;;  %v7187_v60 = vld [vmem:[#allocation11 + $0x18] sm:$0xff] }
0x1b9a   :  { %5180 = vmatmul.mubr.msk.f32.gmra.mxu1 %vm533_vm7, %v2990_v12  ;;  %5562 = vmatprep.subr.mxu1 %v7869_v24  ;;  %v7212_v12 = vld [vmem:[#allocation11 + $0x68] sm:$0xff] }
0x1b9b   :  { %3136 = vmatprep.mubr.f32.mxu1 %v7869_v24  ;;  %5563 = vmatpush3.msra.mxu1 %v6949_v41 }
0x1b9c   :  { %5564 = vmatprep.subr.mxu1 %v7869_v24 }
0x1b9d   :  { %5565 = vmatpush3.msra.mxu1 %v6953_v16 }
0x1b9e   :  { %5181 = vmatmul.mubr.msk.f32.gmra.mxu1 %vm533_vm7, %v2991_v15  ;;  %5566 = vmatprep.subr.mxu1 %v7869_v24 }
0x1b9f   :  { %5570 = vmatprep.mubr.msk.f32.mxu1 %vm5935_vm4, %v7869_v24  ;;  %5567 = vmatpush3.msra.mxu1 %v6957_v50 }
0x1ba0   :  { %5568 = vmatprep.subr.mxu1 %v7869_v24 }
0x1ba1   :  { %5569 = vmatpush3.msra.mxu1 %v6961_v47  ;;  %v7192_v47 = vld [vmem:[#allocation11 + $0x28] sm:$0xff] }
0x1c42   :  { %v7180_v17 = vpop.f32.mrf.mxu1 }
0x1c44   :  { %v3098_v5 = vpop.f32.mrf.mxu1 }
0x1c45   :  { %v3160_v27 = vmul.f32 %v7182_v44, %v3098_v5 }
0x1c46   :  { %v7185_v54 = vpop.f32.mrf.mxu1 }
0x1c47   :  { %v3176_v41 = vadd.f32 %v3160_v27, %v7057_v57 }
0x1c48   :  { %v3104_v16 = vpop.f32.mrf.mxu1 }
0x1c49   :  { %3192 = vst.msk [vmem:[#allocation2 + $0x8] sm:$0xff] %vm105_vm0, %v3176_v41  ;;  %v3162_v50 = vmul.f32 %v7187_v60, %v3104_v16  ;;  %v7217_v41 = vld [vmem:[#allocation11 + $0x78] sm:$0xff] }
0x1c4a   :  { %v3108_v61 = vpop.f32.mrf.mxu1 }
0x1c4b   :  { %v3178_v45 = vadd.f32 %v3162_v50, %v7050_v33 }
0x1c4c   :  { %v3110_v49 = vpop.f32.mrf.mxu1 }
0x1c4d   :  { %3194 = vst.msk [vmem:[#allocation2 + $0x18] sm:$0xff] %vm105_vm0, %v3178_v45  ;;  %v3164_v21 = vmul.f32 %v7192_v47, %v3110_v49  ;;  %v7222_v45 = vld [vmem:[#allocation11 + $0x70] sm:$0xff] }
0x1c4e   :  { %v3114_v63 = vpop.f32.mrf.mxu1 }
0x1c4f   :  { %v3180_v57 = vadd.f32 %v3164_v21, %v7040_v28 }
0x1c50   :  { %v3116_v14 = vpop.f32.mrf.mxu1 }
0x1c51   :  { %3196 = vst.msk [vmem:[#allocation2 + $0x28] sm:$0xff] %vm105_vm0, %v3180_v57  ;;  %v3166_v2 = vmul.f32 %v7197_v46, %v3116_v14  ;;  %v7229_v57 = vld [vmem:[#allocation11 + $0x50] sm:$0xff] }
0x1c52   :  { %v3120_v30 = vpop.f32.mrf.mxu1 }
0x1c53   :  { %v3182_v33 = vadd.f32 %v3166_v2, %v7029_v1 }
0x1c54   :  { %v3122_v4 = vpop.f32.mrf.mxu1 }
0x1c55   :  { %3198 = vst.msk [vmem:[#allocation2 + $0x38] sm:$0xff] %vm105_vm0, %v3182_v33  ;;  %v3168_v55 = vmul.f32 %v7202_v62, %v3122_v4  ;;  %v7238_v4 = vld [vmem:[#allocation11 + $0x30] sm:$0xff] }
0x1c56   :  { %v3126_v53 = vpop.f32.mrf.mxu1 }
0x1c57   :  { %v3184_v28 = vadd.f32 %v3168_v55, %v7018_v31  ;;  %v3169_v2 = vmul.f32 %v7229_v57, %v3126_v53 }
0x1c58   :  { %v3128_v18 = vpop.f32.mrf.mxu1 }
0x1c59   :  { %3200 = vst.msk [vmem:[#allocation2 + $0x48] sm:$0xff] %vm105_vm0, %v3184_v28  ;;  %v3170_v32 = vmul.f32 %v7207_v43, %v3128_v18 }
0x1c5a   :  { %v3132_v13 = vpop.f32.mrf.mxu1 }
0x1c5b   :  { %v3186_v1 = vadd.f32 %v3170_v32, %v7006_v29  ;;  %v7225_v29 = vld [vmem:[#allocation11 + $0x60] sm:$0xff] }
0x1c5c   :  { %v3134_v15 = vpop.f32.mrf.mxu1  ;;  %v3171_v14 = vmul.f32 %v7225_v29, %v3132_v13  ;;  %v7250_v13 = vld [vmem:[#allocation11 + $0x20] sm:$0xff] }
0x1c5d   :  { %3202 = vst.msk [vmem:[#allocation2 + $0x58] sm:$0xff] %vm105_vm0, %v3186_v1  ;;  %v3172_v5 = vmul.f32 %v7212_v12, %v3134_v15  ;;  %7901 = vst [vmem:[#allocation18_spill] sm:$0xff] %v7250_v13  ;;  %v7256_v1 = vadd.f32 %v3169_v2, %v7012_v34  ;;  %v7264_v15 = vld [vmem:[#allocation11 + $0x10] sm:$0xff] }
0x1c5e   :  { %v3138_v27 = vpop.f32.mrf.mxu1  ;;  %v7242_v55 = vadd.f32 %v3171_v14, %v7000_v35  ;;  %7903 = vst [vmem:[#allocation20_spill] sm:$0xff] %v7264_v15  ;;  %v7275_v34 = vld [vmem:[#allocation2 + $0x38] sm:$0xff] }
0x1c5f   :  { %v3188_v31 = vadd.f32 %v3172_v5, %v7002_v40  ;;  %v3173_v21 = vmul.f32 %v7222_v45, %v3138_v27  ;;  %v7232_v40 = vld [vmem:[#allocation11 + $0x40] sm:$0xff]  ;;  %7902 = vst [vmem:[#allocation22_spill] sm:$0xff] %v7256_v1  ;;  %v3163_v27 = vmul.f32 %v7250_v13, %v3108_v61 }
0x1c60   :  { %v3140_v16 = vpop.f32.mrf.mxu1 }
0x1c61   :  { %3204 = vst.msk [vmem:[#allocation2 + $0x68] sm:$0xff] %vm105_vm0, %v3188_v31  ;;  %v3174_v50 = vmul.f32 %v7217_v41, %v3140_v16  ;;  %v7236_v33 = vadd.f32 %v3173_v21, %v6996_v0  ;;  %v3165_v0 = vmul.f32 %v7238_v4, %v3114_v63  ;;  %v7277_v31 = vld [vmem:[#allocation11] sm:$0xff]  ;;  %v3161_v16 = vmul.f32 %v7264_v15, %v7185_v54 }
0x1c62   :  { %7905 = vst [vmem:[#allocation23_spill] sm:$0xff] %v7277_v31  ;;  %v3159_v21 = vmul.f32 %v7277_v31, %v7180_v17  ;;  %v7298_v14 = vadd.f32 %v3163_v27, %v7047_v52  ;;  %v7910_v27 = vld [vmem:[#allocation26_spill] sm:$0xff] }
0x1c63   :  { %v3190_v49 = vadd.f32 %v3174_v50, %v7004_v10  ;;  %v3167_v10 = vmul.f32 %v7232_v40, %v3120_v30  ;;  %v7260_v35 = vpack.c.bf16 %v7236_v33, %v7242_v55  ;;  %v7262_v30 = vld [vmem:[#allocation2 + $0x48] sm:$0xff]  ;;  %v7283_v50 = vadd.f32 %v3165_v0, %v7034_v25  ;;  %v7301_v25 = vld [vmem:[#allocation2 + $0x18] sm:$0xff] }
0x1c64   :  { %v7248_v32 = vld [vmem:[#allocation2 + $0x58] sm:$0xff]  ;;  %7907 = vst [vmem:[#allocation29_spill] sm:$0xff] %v7298_v14  ;;  %v7305_v54 = vadd.f32 %v3161_v16, %v7053_v38  ;;  %v7314_v52 = vadd.f32 %v3159_v21, %v7062_v39  ;;  %v3231_v51 = vrot.slane %v7910_v27, 2 }
0x1c65   :  { %3206 = vst.msk [vmem:[#allocation2 + $0x78] sm:$0xff] %vm105_vm0, %v3190_v49  ;;  %v7268_v5 = vpack.c.bf16 %v7248_v32, %v7262_v30  ;;  %v7272_v63 = vadd.f32 %v3167_v10, %v7026_v19  ;;  %7906 = vst [vmem:[#allocation28_spill] sm:$0xff] %v7283_v50  ;;  %v7289_v19 = vld [vmem:[#allocation2 + $0x28] sm:$0xff]  ;;  %v3225_v2 = vpack.c.bf16 %v7283_v50, %v7298_v14 }
0x1c66   :  { %v7293_v49 = vpack.c.bf16 %v7275_v34, %v7289_v19  ;;  %7908 = vst [vmem:[#allocation30_spill] sm:$0xff] %v7305_v54  ;;  %v7309_v10 = vld [vmem:[#allocation2 + $0x8] sm:$0xff]  ;;  %7909 = vst [vmem:[#allocation32_spill] sm:$0xff] %v7314_v52  ;;  %v3223_v0 = vpack.c.bf16 %v7305_v54, %v7314_v52 }
0x1c67   :  { %7904 = vst [vmem:[#allocation25_spill] sm:$0xff] %v7272_v63  ;;  %v7287_v61 = vpack.c.bf16 %v7256_v1, %v7272_v63  ;;  %v3224_v17 = vpack.c.bf16 %v7301_v25, %v7309_v10 }
0x1c68   :  { %v7244_v28 = vld [vmem:[#allocation2 + $0x68] sm:$0xff] }
0x1c6c   :  { %v7246_v18 = vld [vmem:[#allocation2 + $0x78] sm:$0xff] }
0x1c6d   :  { %v3230_v53 = vpack.c.bf16 %v7246_v18, %v7244_v28 }
0x1c6f   :  { %3243 = vmatprep.subr.bf16.mxu0 %v3230_v53  ;;  %3456 = vmatprep.subr.bf16.mxu1 %v3230_v53 }
0x1c70   :  { %3244 = vmatpush1.bf16.msra.mxu0 %v7260_v35 }
0x1c71   :  { %3245 = vmatprep.subr.bf16.mxu0 %v7268_v5 }
0x1c74   :  { %3246 = vmatpush1.bf16.msra.mxu0 %v7287_v61 }
0x1c75   :  { %3247 = vmatprep.subr.bf16.mxu0 %v7293_v49 }
0x1c78   :  { %3248 = vmatpush1.bf16.msra.mxu0 %v3225_v2 }
0x1c79   :  { %3249 = vmatprep.subr.bf16.mxu0 %v3224_v17 }
0x1c7c   :  { %3250 = vmatpush1.bf16.msra.mxu0 %v3223_v0 }
0x1c7d   :  { %3412 = vmatprep.subr.bf16.mxu0 %v3230_v53 }
0x1c7f   :  { %5182 = vmatmul.mubr.msk.bf16.vlgmr.msra.gmra.mxu0 %vm146_vm1, %v3231_v51 }
0x1c80   :  { %3413 = vmatpush1.bf16.msra.mxu0 %v7260_v35  ;;  %3436 = vmatprep.mubr.bf16.mxu0 %v7868_v22 }
0x1c81   :  { %3414 = vmatprep.subr.bf16.mxu0 %v7268_v5 }
0x1c84   :  { %3415 = vmatpush1.bf16.msra.mxu0 %v7287_v61 }
0x1c85   :  { %3416 = vmatprep.subr.bf16.mxu0 %v7293_v49 }
0x1c88   :  { %3417 = vmatpush1.bf16.msra.mxu0 %v3225_v2 }
0x1c89   :  { %3418 = vmatprep.subr.bf16.mxu0 %v3224_v17 }
0x1c8c   :  { %3419 = vmatpush1.bf16.msra.mxu0 %v3223_v0 }
0x1c8d   :  { %3532 = vmatprep.subr.mxu0 %v7085_v6 }
0x1d3f   :  { %v7326_v38 = vpop.f32.mrf.mxu0 }
0x1d40   :  { %v3276_v51 = vsel %vm191_vm2, %v7326_v38, -inf }
0x1d41   :  { %v3271_v39 = vpop.f32.mrf.mxu0 }
0x1d42   :  { %v3277_v53 = vsel %vm193_vm3, %v3271_v39, -inf }
0x1d43   :  { %v3273_v16 = vpop.f32.mrf.mxu0  ;;  %v3278_v21 = vmax.f32 %v3276_v51, %v3277_v53 }
0x1d45   :  { %3279 = vmax.xlane.f32.xlu0 %v3278_v21  ;;  %v3274_v23 = vpop.f32.mrf.mxu0 }
0x1dce   :  { %v3280_v27 = vpop.xlane.xlu0 %3279 }
0x1dcf   :  { %v3281_v26 = vrot.slane %v3280_v27, 4 }
0x1dd1   :  { %v3282_v52 = vmax.f32 %v3280_v27, %v3281_v26 }
0x1dd3   :  { %v3283_v54 = vrot.slane %v3282_v52, 2 }
0x1dd5   :  { %v3284_v14 = vmax.f32 %v3282_v52, %v3283_v54 }
0x1dd7   :  { %v3285_v31 = vrot.slane %v3284_v14, 1 }
0x1dd9   :  { %v3286_v50 = vmax.f32 %v3284_v14, %v3285_v31 }
0x1ddb   :  { %5655 = vpush %v3286_v50 }
0x1e0c   :  { %s5656_s23 = spop %5655 }
0x1e0d   :  { %v3288_v6 = vstv %s5656_s23 }
0x1e0e   :  { %v3289_v15 = vsub.f32 %v7326_v38, %v3288_v6  ;;  %v3290_v63 = vsub.f32 %v3271_v39, %v3288_v6 }
0x1e10   :  { %v3291_v13 = vmul.f32 1.442695, %v3289_v15  ;;  %v3293_v1 = vmul.f32 1.442695, %v3290_v63  ;;  %v5185_v15 = vmul.f32 -1.442695, %v3271_v39 }
0x1e12   :  { %5766 = vpow2.f32 %v3291_v13 }
0x1e13   :  { %5768 = vpow2.f32 %v3293_v1 }
0x1e14   :  { %5770 = vpow2.f32 %v5185_v15  ;;  %v7403_v15 = vld [vmem:[#allocation8 + $0x28] sm:$0xff] }
0x1e1f   :  { %v5767_v51 = vpop.eup %5766 }
0x1e20   :  { %v5769_v53 = vpop.eup %5768 }
0x1e21   :  { %v5700_v23 = vpack.i.bf16 %v5769_v53, %v5767_v51 }
0x1e23   :  { %5701 = vrot.lane.b32.xlu1 %v5700_v23, %s5936_s4 }
0x1e95   :  { %v5702_v26 = vpop.permute.xlu1 %5701 }
0x1e96   :  { %v5704_v27 = vunpack.i.h.bf16 %v5702_v26  ;;  %v5703_v54 = vunpack.i.l.bf16 %v5702_v26 }
0x1e98   :  { %v3317_v31 = vsel %vm146_vm1, %v5703_v54, %v5704_v27 }
0x1e99   :  { %5571 = vmatmul.mubr.f32.vlgmr.msra.gmra.mxu1 %v3317_v31 }
0x1e9a   :  { %3457 = vmatpush1.bf16.msra.mxu1 %v7260_v35  ;;  %3480 = vmatprep.mubr.bf16.mxu1 %v7868_v22  ;;  %v5771_v35 = vpop.eup %5770 }
0x1e9b   :  { %3458 = vmatprep.subr.bf16.mxu1 %v7268_v5  ;;  %v3492_v50 = vadd.f32 1.0, %v5771_v35  ;;  %v7409_v35 = vld [vmem:[#allocation8 + $0x18] sm:$0xff] }
0x1e9e   :  { %3459 = vmatpush1.bf16.msra.mxu1 %v7287_v61 }
0x1e9f   :  { %3460 = vmatprep.subr.bf16.mxu1 %v7293_v49 }
0x1ea2   :  { %3461 = vmatpush1.bf16.msra.mxu1 %v3225_v2 }
0x1ea3   :  { %3462 = vmatprep.subr.bf16.mxu1 %v3224_v17 }
0x1ea6   :  { %3463 = vmatpush1.bf16.msra.mxu1 %v3223_v0 }
0x1f59   :  { %v3385_v13 = vpop.f32.mrf.mxu1 }
0x1f5a   :  { %3390 = vrot.lane.b32.xlu0 %v3385_v13, %s5936_s4 }
0x1f5b   :  { %v5572_v1 = vpop.f32.mrf.mxu1 }
0x1f5c   :  { %v7399_v1 = vld [vmem:[#allocation8 + $0x30] sm:$0xff] }
0x1fcc   :  { %v3391_v63 = vpop.permute.xlu0 %3390 }
0x1fcd   :  { %5772 = vrcp.f32 %v3391_v63  ;;  %v7406_v63 = vld [vmem:[#allocation8 + $0x20] sm:$0xff] }
0x1fce   :  { %5774 = vrcp.f32 %v3492_v50  ;;  %v7413_v50 = vld [vmem:[#allocation8 + $0x10] sm:$0xff] }
0x1fda   :  { %v5773_v14 = vpop.eup %5772 }
0x1fdb   :  { %v3395_v5 = vmul.f32 %v5773_v14, %v5769_v53  ;;  %v3394_v52 = vmul.f32 %v5773_v14, %v5767_v51  ;;  %v5775_v49 = vpop.eup %5774  ;;  %v7417_v14 = vld [vmem:[#allocation8 + $0x8] sm:$0xff] }
0x1fdd   :  { %v3397_v61 = vpack.c.bf16 %v3395_v5, %v3395_v5  ;;  %v3396_v16 = vpack.c.bf16 %v3394_v52, %v3394_v52 }
0x1fdf   :  { %5184 = vmatmul.mubr.msk.bf16.vlgmr.msra.gmra.mxu1 %vm146_vm1, %v3397_v61  ;;  %3399 = vrot.lane.b32.xlu0 %v3396_v16, %s5936_s4 }
0x1fe0   :  { %3882 = vmatprep.mubr.bf16.mxu1 %v7868_v22 }
0x1fe3   :  { %3504 = vrot.lane.b32.xlu0 %v5775_v49, %s5936_s4 }
0x2001   :  { %3583 = vxpose.xlu0.b32.start.end [1/1] (short) (narrow) %v3395_v5, 64  ;;  %v7421_v5 = vld [vmem:[#allocation8] sm:$0xff] }
0x2051   :  { %v3400_v2 = vpop.permute.xlu0 %3399 }
0x2052   :  { %5183 = vmatmul.mubr.msk.bf16.vlgmr.msra.gmra.mxu0 %vm146_vm1, %v3400_v2 }
0x2053   :  { %3533 = vmatpush1.msra.mxu0 %v7092_v42  ;;  %3572 = vmatprep.mubr.f32.mxu0 %v7869_v24 }
0x2054   :  { %3534 = vmatprep.subr.mxu0 %v7094_v11 }
0x2055   :  { %3535 = vmatpush1.msra.mxu0 %v7097_v59  ;;  %v3505_v17 = vpop.permute.xlu0 %3504 }
0x2056   :  { %3536 = vmatprep.subr.mxu0 %v7100_v9 }
0x2057   :  { %3537 = vmatpush1.msra.mxu0 %v7104_v48 }
0x2058   :  { %3538 = vmatprep.subr.mxu0 %v7107_v58 }
0x2059   :  { %3539 = vmatpush1.msra.mxu0 %v7110_v20 }
0x205a   :  { %5186 = vmatmul.mubr.msk.f32.vlgmr.msra.gmra.mxu0 %vm423_vm5, %v3505_v17 }
0x205b   :  { %3709 = vmatprep.mubr.f32.mxu0 %v7869_v24 }
0x207d   :  { %v3599_v11 = vpop.trf.xlu0 }
0x2081   :  { %v3600_v9 = vpop.trf.xlu0 }
0x2085   :  { %v3601_v27 = vpop.trf.xlu0 }
0x2089   :  { %v3602_v31 = vpop.trf.xlu0 }
0x208d   :  { %v3603_v13 = vpop.trf.xlu0 }
0x209f   :  { %v3482_v42 = vpop.f32.mrf.mxu1 }
0x20a1   :  { %v3484_v0 = vpop.f32.mrf.mxu1 }
0x20a3   :  { %v3486_v39 = vpop.f32.mrf.mxu1 }
0x20a5   :  { %v3487_v21 = vpop.f32.mrf.mxu1 }
0x2112   :  { %v3438_v6 = vpop.f32.mrf.mxu0 }
0x2113   :  { %v3579_v58 = vsub.f32 %v3438_v6, %v3482_v42 }
0x2114   :  { %v3440_v59 = vpop.f32.mrf.mxu0 }
0x2115   :  { %v3580_v23 = vsub.f32 %v3440_v59, %v3484_v0 }
0x2116   :  { %v3442_v51 = vpop.f32.mrf.mxu0 }
0x2118   :  { %v3443_v53 = vpop.f32.mrf.mxu0 }
0x211a   :  { %v3574_v48 = vpop.f32.mrf.mxu0 }
0x211b   :  { %v3581_v54 = vmul.f32 %v3579_v58, %v3574_v48 }
0x211c   :  { %v3576_v26 = vpop.f32.mrf.mxu0 }
0x211d   :  { %v3582_v20 = vmul.f32 %v3580_v23, %v3576_v26 }
0x211f   :  { %5187 = vmatprep.subr.msk.mxu0 %vm558_vm6, %v3582_v20 }
0x2120   :  { %5188 = vmatpush1.msk.msra.mxu0 %vm558_vm6, %v3581_v54 }
0x2121   :  { %5189 = vmatmul.mubr.msk.f32.vlgmr.msra.gmra.mxu0 %vm533_vm7, %v3599_v11  ;;  %5573 = vmatprep.subr.mxu0 %v7869_v24 }
0x2122   :  { %3715 = vmatprep.mubr.f32.mxu0 %v7869_v24  ;;  %5574 = vmatpush3.msra.mxu0 %v7137_v8  ;;  %v3604_v8 = vpop.trf.xlu0 }
0x2123   :  { %5575 = vmatprep.subr.mxu0 %v7869_v24 }
0x2124   :  { %5576 = vmatpush3.msra.mxu0 %v7141_v37 }
0x2125   :  { %5190 = vmatmul.mubr.msk.f32.gmra.mxu0 %vm533_vm7, %v3600_v9  ;;  %5577 = vmatprep.subr.mxu0 %v7869_v24 }
0x2126   :  { %3721 = vmatprep.mubr.f32.mxu0 %v7869_v24  ;;  %5578 = vmatpush3.msra.mxu0 %v7145_v3  ;;  %v3605_v37 = vpop.trf.xlu0 }
0x2127   :  { %5579 = vmatprep.subr.mxu0 %v7869_v24 }
0x2128   :  { %5580 = vmatpush3.msra.mxu0 %v7149_v36  ;;  %v7387_v36 = vld [vmem:[#allocation8 + $0x48] sm:$0xff] }
0x2129   :  { %5191 = vmatmul.mubr.msk.f32.gmra.mxu0 %vm533_vm7, %v3601_v27  ;;  %5581 = vmatprep.subr.mxu0 %v7869_v24 }
0x212a   :  { %3727 = vmatprep.mubr.f32.mxu0 %v7869_v24  ;;  %5582 = vmatpush3.msra.mxu0 %v7153_v7  ;;  %v3606_v3 = vpop.trf.xlu0  ;;  %v7391_v7 = vld [vmem:[#allocation8 + $0x40] sm:$0xff] }
0x212b   :  { %5583 = vmatprep.subr.mxu0 %v7869_v24 }
0x212c   :  { %5584 = vmatpush3.msra.mxu0 %v7157_v56  ;;  %v7395_v56 = vld [vmem:[#allocation8 + $0x38] sm:$0xff] }
0x212d   :  { %5192 = vmatmul.mubr.msk.f32.gmra.mxu0 %vm533_vm7, %v3602_v31  ;;  %5585 = vmatprep.subr.mxu0 %v7869_v24 }
0x212e   :  { %3733 = vmatprep.mubr.f32.mxu0 %v7869_v24  ;;  %5586 = vmatpush3.msra.mxu0 %v7387_v36 }
0x212f   :  { %5587 = vmatprep.subr.mxu0 %v7869_v24 }
0x2130   :  { %5588 = vmatpush3.msra.mxu0 %v7391_v7 }
0x2131   :  { %5193 = vmatmul.mubr.msk.f32.gmra.mxu0 %vm533_vm7, %v3603_v13  ;;  %5589 = vmatprep.subr.mxu0 %v7869_v24 }
0x2132   :  { %3739 = vmatprep.mubr.f32.mxu0 %v7869_v24  ;;  %5590 = vmatpush3.msra.mxu0 %v7395_v56 }
0x2133   :  { %5591 = vmatprep.subr.mxu0 %v7869_v24 }
0x2134   :  { %5592 = vmatpush3.msra.mxu0 %v7399_v1 }
0x2135   :  { %5194 = vmatmul.mubr.msk.f32.gmra.mxu0 %vm533_vm7, %v3604_v8  ;;  %5593 = vmatprep.subr.mxu0 %v7869_v24 }
0x2136   :  { %3745 = vmatprep.mubr.f32.mxu0 %v7869_v24  ;;  %5594 = vmatpush3.msra.mxu0 %v7403_v15 }
0x2137   :  { %5595 = vmatprep.subr.mxu0 %v7869_v24 }
0x2138   :  { %5596 = vmatpush3.msra.mxu0 %v7406_v63 }
0x2139   :  { %5195 = vmatmul.mubr.msk.f32.gmra.mxu0 %vm533_vm7, %v3605_v37  ;;  %5597 = vmatprep.subr.mxu0 %v7869_v24  ;;  %v7912_v37 = vld [vmem:[#allocation18_spill] sm:$0xff] }
0x213a   :  { %3751 = vmatprep.mubr.f32.mxu0 %v7869_v24  ;;  %5598 = vmatpush3.msra.mxu0 %v7409_v35 }
0x213b   :  { %5599 = vmatprep.subr.mxu0 %v7869_v24 }
0x213c   :  { %5600 = vmatpush3.msra.mxu0 %v7413_v50 }
0x213d   :  { %5196 = vmatmul.mubr.msk.f32.gmra.mxu0 %vm533_vm7, %v3606_v3  ;;  %5601 = vmatprep.subr.mxu0 %v7869_v24 }
0x213e   :  { %5605 = vmatprep.mubr.msk.f32.mxu0 %vm5935_vm4, %v7869_v24  ;;  %5602 = vmatpush3.msra.mxu0 %v7417_v14 }
0x213f   :  { %5603 = vmatprep.subr.mxu0 %v7869_v24 }
0x2140   :  { %5604 = vmatpush3.msra.mxu0 %v7421_v5 }
0x21e1   :  { %v7426_v52 = vpop.f32.mrf.mxu0 }
0x21e3   :  { %v3713_v61 = vpop.f32.mrf.mxu0 }
0x21e4   :  { %v3775_v16 = vmul.f32 %v3713_v61, %v7182_v44  ;;  %v7913_v61 = vld [vmem:[#allocation25_spill] sm:$0xff] }
0x21e5   :  { %v3717_v49 = vpop.f32.mrf.mxu0 }
0x21e6   :  { %v3791_v2 = vadd.f32 %v3775_v16, %v7309_v10 }
0x21e7   :  { %v3719_v17 = vpop.f32.mrf.mxu0 }
0x21e8   :  { %3807 = vst.msk [vmem:[#allocation2 + $0x8] sm:$0xff] %vm105_vm0, %v3791_v2  ;;  %v3777_v42 = vmul.f32 %v3719_v17, %v7187_v60  ;;  %v7914_v2 = vld [vmem:[#allocation20_spill] sm:$0xff] }
0x21e9   :  { %v3723_v0 = vpop.f32.mrf.mxu0  ;;  %v3776_v17 = vmul.f32 %v3717_v49, %v7914_v2 }
0x21ea   :  { %v3793_v39 = vadd.f32 %v3777_v42, %v7301_v25  ;;  %v3778_v3 = vmul.f32 %v3723_v0, %v7912_v37  ;;  %v7915_v42 = vld [vmem:[#allocation28_spill] sm:$0xff] }
0x21eb   :  { %v3725_v21 = vpop.f32.mrf.mxu0 }
0x21ec   :  { %3809 = vst.msk [vmem:[#allocation2 + $0x18] sm:$0xff] %vm105_vm0, %v3793_v39  ;;  %v3779_v11 = vmul.f32 %v3725_v21, %v7192_v47 }
0x21ed   :  { %v3729_v6 = vpop.f32.mrf.mxu0 }
0x21ee   :  { %v3795_v59 = vadd.f32 %v3779_v11, %v7289_v19 }
0x21ef   :  { %v3731_v44 = vpop.f32.mrf.mxu0 }
0x21f0   :  { %3811 = vst.msk [vmem:[#allocation2 + $0x28] sm:$0xff] %vm105_vm0, %v3795_v59  ;;  %v3781_v10 = vmul.f32 %v3731_v44, %v7197_v46  ;;  %v7917_v44 = vld [vmem:[#allocation29_spill] sm:$0xff] }
0x21f1   :  { %v3735_v51 = vpop.f32.mrf.mxu0 }
0x21f2   :  { %v3797_v9 = vadd.f32 %v3781_v10, %v7275_v34  ;;  %v7507_v10 = vadd.f32 %v3778_v3, %v7917_v44 }
0x21f3   :  { %v3737_v60 = vpop.f32.mrf.mxu0  ;;  %v7510_v49 = vld [vmem:[#allocation2 + $0x18] sm:$0xff] }
0x21f4   :  { %3813 = vst.msk [vmem:[#allocation2 + $0x38] sm:$0xff] %vm105_vm0, %v3797_v9  ;;  %v3783_v25 = vmul.f32 %v3737_v60, %v7202_v62 }
0x21f5   :  { %v3741_v53 = vpop.f32.mrf.mxu0 }
0x21f6   :  { %v3799_v48 = vadd.f32 %v3783_v25, %v7262_v30  ;;  %v3784_v54 = vmul.f32 %v3741_v53, %v7229_v57  ;;  %v7911_v57 = vld [vmem:[#allocation22_spill] sm:$0xff]  ;;  %v7517_v25 = vld [vmem:[#allocation2 + $0x8] sm:$0xff] }
0x21f7   :  { %v3743_v47 = vpop.f32.mrf.mxu0  ;;  %v7500_v11 = vld [vmem:[#allocation2 + $0x28] sm:$0xff]  ;;  %v3839_v53 = vpack.c.bf16 %v7510_v49, %v7517_v25 }
0x21f8   :  { %3815 = vst.msk [vmem:[#allocation2 + $0x48] sm:$0xff] %vm105_vm0, %v3799_v48  ;;  %v3785_v19 = vmul.f32 %v3743_v47, %v7207_v43  ;;  %v7472_v8 = vadd.f32 %v3784_v54, %v7911_v57 }
0x21f9   :  { %v3747_v23 = vpop.f32.mrf.mxu0 }
0x21fa   :  { %v3801_v58 = vadd.f32 %v3785_v19, %v7248_v32  ;;  %v3786_v32 = vmul.f32 %v3747_v23, %v7225_v29  ;;  %v3780_v29 = vmul.f32 %v3729_v6, %v7238_v4  ;;  %v7916_v6 = vld [vmem:[#allocation23_spill] sm:$0xff]  ;;  %v7920_v19 = vld [vmem:[#allocation24_spill] sm:$0xff] }
0x21fb   :  { %v3749_v46 = vpop.f32.mrf.mxu0  ;;  %v7489_v4 = vld [vmem:[#allocation2 + $0x38] sm:$0xff]  ;;  %v3774_v59 = vmul.f32 %v7426_v52, %v7916_v6  ;;  %v7919_v52 = vld [vmem:[#allocation32_spill] sm:$0xff]  ;;  %v3846_v23 = vrot.slane %v7920_v19, 3 }
0x21fc   :  { %3817 = vst.msk [vmem:[#allocation2 + $0x58] sm:$0xff] %vm105_vm0, %v3801_v58  ;;  %v3787_v34 = vmul.f32 %v3749_v46, %v7212_v12  ;;  %v7460_v31 = vadd.f32 %v3786_v32, %v7242_v55  ;;  %v7494_v39 = vadd.f32 %v3780_v29, %v7915_v42  ;;  %v3841_v0 = vpack.c.bf16 %v7489_v4, %v7500_v11 }
0x21fd   :  { %v3753_v26 = vpop.f32.mrf.mxu0  ;;  %v7522_v48 = vadd.f32 %v3774_v59, %v7919_v52 }
0x21fe   :  { %v3803_v27 = vadd.f32 %v3787_v34, %v7244_v28  ;;  %v3788_v43 = vmul.f32 %v3753_v26, %v7222_v45  ;;  %v3782_v28 = vmul.f32 %v3735_v51, %v7232_v40  ;;  %v7918_v51 = vld [vmem:[#allocation30_spill] sm:$0xff]  ;;  %v3840_v60 = vpack.c.bf16 %v7494_v39, %v7507_v10 }
0x21ff   :  { %v3755_v62 = vpop.f32.mrf.mxu0  ;;  %v7513_v9 = vadd.f32 %v3776_v17, %v7918_v51 }
0x2200   :  { %3819 = vst.msk [vmem:[#allocation2 + $0x68] sm:$0xff] %vm105_vm0, %v3803_v27  ;;  %v3789_v30 = vmul.f32 %v3755_v62, %v7217_v41  ;;  %v7456_v12 = vadd.f32 %v3788_v43, %v7236_v33  ;;  %v7478_v33 = vld [vmem:[#allocation2 + $0x48] sm:$0xff]  ;;  %v7486_v16 = vadd.f32 %v3782_v28, %v7913_v61 }
0x2201   :  { %v3838_v47 = vpack.c.bf16 %v7513_v9, %v7522_v48 }
0x2202   :  { %v3805_v20 = vadd.f32 %v3789_v30, %v7246_v18  ;;  %v7476_v40 = vpack.c.bf16 %v7456_v12, %v7460_v31  ;;  %v7498_v21 = vpack.c.bf16 %v7472_v8, %v7486_v16 }
0x2203   :  { %v7466_v18 = vld [vmem:[#allocation2 + $0x58] sm:$0xff] }
0x2204   :  { %3821 = vst.msk [vmem:[#allocation2 + $0x78] sm:$0xff] %vm105_vm0, %v3805_v20  ;;  %v7482_v55 = vpack.c.bf16 %v7466_v18, %v7478_v33 }
0x2207   :  { %v7462_v13 = vld [vmem:[#allocation2 + $0x68] sm:$0xff] }
0x220b   :  { %v7464_v41 = vld [vmem:[#allocation2 + $0x78] sm:$0xff] }
0x220c   :  { %v3845_v45 = vpack.c.bf16 %v7464_v41, %v7462_v13 }
0x220e   :  { %3858 = vmatprep.subr.bf16.mxu1 %v3845_v45  ;;  %4071 = vmatprep.subr.bf16.mxu0 %v3845_v45 }
0x220f   :  { %3859 = vmatpush1.bf16.msra.mxu1 %v7476_v40 }
0x2210   :  { %3860 = vmatprep.subr.bf16.mxu1 %v7482_v55 }
0x2213   :  { %3861 = vmatpush1.bf16.msra.mxu1 %v7498_v21 }
0x2214   :  { %3862 = vmatprep.subr.bf16.mxu1 %v3841_v0 }
0x2217   :  { %3863 = vmatpush1.bf16.msra.mxu1 %v3840_v60 }
0x2218   :  { %3864 = vmatprep.subr.bf16.mxu1 %v3839_v53 }
0x221b   :  { %3865 = vmatpush1.bf16.msra.mxu1 %v3838_v47 }
0x221c   :  { %4027 = vmatprep.subr.bf16.mxu1 %v3845_v45 }
0x221e   :  { %5197 = vmatmul.mubr.msk.bf16.vlgmr.msra.gmra.mxu1 %vm146_vm1, %v3846_v23 }
0x221f   :  { %4028 = vmatpush1.bf16.msra.mxu1 %v7476_v40  ;;  %4051 = vmatprep.mubr.bf16.mxu1 %v7868_v22 }
0x2220   :  { %4029 = vmatprep.subr.bf16.mxu1 %v7482_v55 }
0x2223   :  { %4030 = vmatpush1.bf16.msra.mxu1 %v7498_v21 }
0x2224   :  { %4031 = vmatprep.subr.bf16.mxu1 %v3841_v0 }
0x2227   :  { %4032 = vmatpush1.bf16.msra.mxu1 %v3840_v60 }
0x2228   :  { %4033 = vmatprep.subr.bf16.mxu1 %v3839_v53 }
0x222b   :  { %4034 = vmatpush1.bf16.msra.mxu1 %v3838_v47 }
0x22de   :  { %v7532_v58 = vpop.f32.mrf.mxu1 }
0x22df   :  { %v3891_v34 = vsel %vm191_vm2, %v7532_v58, -inf }
0x22e0   :  { %v3886_v46 = vpop.f32.mrf.mxu1 }
0x22e1   :  { %v3892_v26 = vsel %vm193_vm3, %v3886_v46, -inf }
0x22e2   :  { %v3888_v27 = vpop.f32.mrf.mxu1  ;;  %v3893_v62 = vmax.f32 %v3891_v34, %v3892_v26  ;;  %v5200_v34 = vmul.f32 -1.442695, %v3886_v46 }
0x22e4   :  { %3894 = vmax.xlane.f32.xlu1 %v3893_v62  ;;  %v3889_v30 = vpop.f32.mrf.mxu1  ;;  %v7545_v62 = vld [vmem:[#allocation9 + $0x38] sm:$0xff] }
0x22e5   :  { %4147 = vmatprep.subr.mxu1 %v7545_v62 }
0x236d   :  { %v3895_v20 = vpop.xlane.xlu1 %3894 }
0x236e   :  { %v3896_v43 = vrot.slane %v3895_v20, 4 }
0x2370   :  { %v3897_v32 = vmax.f32 %v3895_v20, %v3896_v43  ;;  %v7554_v20 = vld [vmem:[#allocation9 + $0x28] sm:$0xff]  ;;  %v7557_v43 = vld [vmem:[#allocation9 + $0x20] sm:$0xff] }
0x2372   :  { %v3898_v54 = vrot.slane %v3897_v32, 2 }
0x2374   :  { %v3899_v28 = vmax.f32 %v3897_v32, %v3898_v54  ;;  %v7560_v32 = vld [vmem:[#allocation9 + $0x18] sm:$0xff]  ;;  %v7564_v54 = vld [vmem:[#allocation9 + $0x10] sm:$0xff] }
0x2376   :  { %v3900_v45 = vrot.slane %v3899_v28, 1 }
0x2378   :  { %v3901_v29 = vmax.f32 %v3899_v28, %v3900_v45  ;;  %v7567_v28 = vld [vmem:[#allocation9 + $0x8] sm:$0xff]  ;;  %v7570_v45 = vld [vmem:[#allocation9] sm:$0xff] }
0x237a   :  { %5657 = vpush %v3901_v29 }
0x23ab   :  { %s5658_s24 = spop %5657 }
0x23ac   :  { %v3903_v57 = vstv %s5658_s24 }
0x23ad   :  { %v3904_v37 = vsub.f32 %v7532_v58, %v3903_v57  ;;  %v3905_v3 = vsub.f32 %v3886_v46, %v3903_v57  ;;  %v7552_v46 = vld [vmem:[#allocation9 + $0x30] sm:$0xff] }
0x23af   :  { %v3906_v61 = vmul.f32 1.442695, %v3904_v37  ;;  %v3908_v2 = vmul.f32 1.442695, %v3905_v3 }
0x23b1   :  { %5776 = vpow2.f32 %v3906_v61 }
0x23b2   :  { %5778 = vpow2.f32 %v3908_v2 }
0x23b3   :  { %5780 = vpow2.f32 %v5200_v34 }
0x23be   :  { %v5777_v17 = vpop.eup %5776 }
0x23bf   :  { %v5779_v42 = vpop.eup %5778 }
0x23c0   :  { %v5705_v6 = vpack.i.bf16 %v5779_v42, %v5777_v17  ;;  %v5781_v27 = vpop.eup %5780 }
0x23c2   :  { %5706 = vrot.lane.b32.xlu0 %v5705_v6, %s5936_s4 }
0x2434   :  { %v5707_v59 = vpop.permute.xlu0 %5706 }
0x2435   :  { %v5709_v44 = vunpack.i.h.bf16 %v5707_v59  ;;  %v5708_v51 = vunpack.i.l.bf16 %v5707_v59 }
0x2437   :  { %v3932_v52 = vsel %vm146_vm1, %v5708_v51, %v5709_v44 }
0x2438   :  { %5606 = vmatmul.mubr.f32.vlgmr.msra.gmra.mxu0 %v3932_v52 }
0x2439   :  { %4072 = vmatpush1.bf16.msra.mxu0 %v7476_v40  ;;  %4095 = vmatprep.mubr.bf16.mxu0 %v7868_v22  ;;  %v4107_v40 = vadd.f32 1.0, %v5781_v27 }
0x243a   :  { %4073 = vmatprep.subr.bf16.mxu0 %v7482_v55 }
0x243d   :  { %4074 = vmatpush1.bf16.msra.mxu0 %v7498_v21 }
0x243e   :  { %4075 = vmatprep.subr.bf16.mxu0 %v3841_v0 }
0x2441   :  { %4076 = vmatpush1.bf16.msra.mxu0 %v3840_v60 }
0x2442   :  { %4077 = vmatprep.subr.bf16.mxu0 %v3839_v53 }
0x2445   :  { %4078 = vmatpush1.bf16.msra.mxu0 %v3838_v47 }
0x24f8   :  { %v4000_v19 = vpop.f32.mrf.mxu0 }
0x24f9   :  { %4005 = vrot.lane.b32.xlu1 %v4000_v19, %s5936_s4 }
0x24fa   :  { %v5607_v23 = vpop.f32.mrf.mxu0 }
0x256b   :  { %v4006_v26 = vpop.permute.xlu1 %4005 }
0x256c   :  { %5782 = vrcp.f32 %v4006_v26 }
0x256d   :  { %5784 = vrcp.f32 %v4107_v40 }
0x2579   :  { %v5783_v55 = vpop.eup %5782 }
0x257a   :  { %v4010_v21 = vmul.f32 %v5783_v55, %v5779_v42  ;;  %v4009_v0 = vmul.f32 %v5783_v55, %v5777_v17  ;;  %v5785_v47 = vpop.eup %5784 }
0x257c   :  { %v4012_v60 = vpack.c.bf16 %v4010_v21, %v4010_v21  ;;  %v4011_v53 = vpack.c.bf16 %v4009_v0, %v4009_v0 }
0x257e   :  { %5199 = vmatmul.mubr.msk.bf16.vlgmr.msra.gmra.mxu0 %vm146_vm1, %v4012_v60  ;;  %4014 = vrot.lane.b32.xlu1 %v4011_v53, %s5936_s4  ;;  %v4540_v53 = vld [vmem:[#allocation8 + $0x78] sm:$0xff] }
0x257f   :  { %4497 = vmatprep.mubr.bf16.mxu0 %v7868_v22 }
0x2582   :  { %4119 = vrot.lane.b32.xlu1 %v5785_v47, %s5936_s4  ;;  %v4539_v47 = vld [vmem:[#allocation8 + $0x70] sm:$0xff] }
0x25ab   :  { %4198 = vxpose.xlu1.b32.start.end [1/1] (short) (narrow) %v4010_v21, 64 }
0x25f0   :  { %v4015_v30 = vpop.permute.xlu1 %4014 }
0x25f1   :  { %5198 = vmatmul.mubr.msk.bf16.vlgmr.msra.gmra.mxu1 %vm146_vm1, %v4015_v30  ;;  %v4538_v30 = vld [vmem:[#allocation8 + $0x68] sm:$0xff] }
0x25f2   :  { %4148 = vmatpush1.msra.mxu1 %v7552_v46  ;;  %4187 = vmatprep.mubr.f32.mxu1 %v7869_v24 }
0x25f3   :  { %4149 = vmatprep.subr.mxu1 %v7554_v20 }
0x25f4   :  { %4150 = vmatpush1.msra.mxu1 %v7557_v43  ;;  %v4120_v29 = vpop.permute.xlu1 %4119 }
0x25f5   :  { %4151 = vmatprep.subr.mxu1 %v7560_v32 }
0x25f6   :  { %4152 = vmatpush1.msra.mxu1 %v7564_v54 }
0x25f7   :  { %4153 = vmatprep.subr.mxu1 %v7567_v28 }
0x25f8   :  { %4154 = vmatpush1.msra.mxu1 %v7570_v45 }
0x25f9   :  { %5201 = vmatmul.mubr.msk.f32.vlgmr.msra.gmra.mxu1 %vm423_vm5, %v4120_v29  ;;  %v4537_v29 = vld [vmem:[#allocation8 + $0x60] sm:$0xff] }
0x25fa   :  { %4324 = vmatprep.mubr.f32.mxu1 %v7869_v24 }
0x2627   :  { %v4214_v2 = vpop.trf.xlu1 }
0x262b   :  { %v4215_v59 = vpop.trf.xlu1 }
0x262f   :  { %v4216_v34 = vpop.trf.xlu1 }
0x2633   :  { %v4217_v40 = vpop.trf.xlu1 }
0x2637   :  { %v4218_v55 = vpop.trf.xlu1 }
0x263b   :  { %v4219_v21 = vpop.trf.xlu1 }
0x263e   :  { %v4097_v57 = vpop.f32.mrf.mxu0 }
0x263f   :  { %v4220_v0 = vpop.trf.xlu1 }
0x2640   :  { %v4099_v37 = vpop.f32.mrf.mxu0 }
0x2642   :  { %v4101_v3 = vpop.f32.mrf.mxu0 }
0x2643   :  { %v4221_v60 = vpop.trf.xlu1 }
0x2644   :  { %v4102_v61 = vpop.f32.mrf.mxu0 }
0x26b1   :  { %v4053_v17 = vpop.f32.mrf.mxu1 }
0x26b2   :  { %v4194_v19 = vsub.f32 %v4053_v17, %v4097_v57  ;;  %v4536_v57 = vld [vmem:[#allocation8 + $0x58] sm:$0xff] }
0x26b3   :  { %v4055_v42 = vpop.f32.mrf.mxu1 }
0x26b4   :  { %v4195_v52 = vsub.f32 %v4055_v42, %v4099_v37  ;;  %v4535_v37 = vld [vmem:[#allocation8 + $0x50] sm:$0xff] }
0x26b5   :  { %v4057_v6 = vpop.f32.mrf.mxu1 }
0x26b6   :  { %v7639_v6 = vld [vmem:[#allocation11 + $0x38] sm:$0xff] }
0x26b7   :  { %v4058_v44 = vpop.f32.mrf.mxu1 }
0x26b9   :  { %v4189_v51 = vpop.f32.mrf.mxu1 }
0x26ba   :  { %v4196_v27 = vmul.f32 %v4194_v19, %v4189_v51 }
0x26bb   :  { %v4191_v23 = vpop.f32.mrf.mxu1 }
0x26bc   :  { %v4197_v26 = vmul.f32 %v4195_v52, %v4191_v23  ;;  %v7644_v52 = vld [vmem:[#allocation11 + $0x48] sm:$0xff] }
0x26be   :  { %5202 = vmatprep.subr.msk.mxu1 %vm558_vm6, %v4197_v26  ;;  %v7649_v26 = vld [vmem:[#allocation11 + $0x58] sm:$0xff] }
0x26bf   :  { %5203 = vmatpush1.msk.msra.mxu1 %vm558_vm6, %v4196_v27 }
0x26c0   :  { %5204 = vmatmul.mubr.msk.f32.vlgmr.msra.gmra.mxu1 %vm533_vm7, %v4214_v2  ;;  %5608 = vmatprep.subr.mxu1 %v7869_v24 }
0x26c1   :  { %4330 = vmatprep.mubr.f32.mxu1 %v7869_v24  ;;  %5609 = vmatpush3.msra.mxu1 %v4540_v53 }
0x26c2   :  { %5610 = vmatprep.subr.mxu1 %v7869_v24 }
0x26c3   :  { %5611 = vmatpush3.msra.mxu1 %v4539_v47  ;;  %v7659_v47 = vld [vmem:[#allocation11 + $0x78] sm:$0xff] }
0x26c4   :  { %5205 = vmatmul.mubr.msk.f32.gmra.mxu1 %vm533_vm7, %v4215_v59  ;;  %5612 = vmatprep.subr.mxu1 %v7869_v24 }
0x26c5   :  { %4336 = vmatprep.mubr.f32.mxu1 %v7869_v24  ;;  %5613 = vmatpush3.msra.mxu1 %v4538_v30 }
0x26c6   :  { %5614 = vmatprep.subr.mxu1 %v7869_v24 }
0x26c7   :  { %5615 = vmatpush3.msra.mxu1 %v4537_v29 }
0x26c8   :  { %5206 = vmatmul.mubr.msk.f32.gmra.mxu1 %vm533_vm7, %v4216_v34  ;;  %5616 = vmatprep.subr.mxu1 %v7869_v24 }
0x26c9   :  { %4342 = vmatprep.mubr.f32.mxu1 %v7869_v24  ;;  %5617 = vmatpush3.msra.mxu1 %v4536_v57  ;;  %v4387_v57 = vld [vmem:[#allocation11 + $0x70] sm:$0xff] }
0x26ca   :  { %5618 = vmatprep.subr.mxu1 %v7869_v24 }
0x26cb   :  { %5619 = vmatpush3.msra.mxu1 %v4535_v37 }
0x26cc   :  { %5207 = vmatmul.mubr.msk.f32.gmra.mxu1 %vm533_vm7, %v4217_v40  ;;  %5620 = vmatprep.subr.mxu1 %v7869_v24 }
0x26cd   :  { %4348 = vmatprep.mubr.f32.mxu1 %v7869_v24  ;;  %5621 = vmatpush3.msra.mxu1 %v7387_v36 }
0x26ce   :  { %5622 = vmatprep.subr.mxu1 %v7869_v24 }
0x26cf   :  { %5623 = vmatpush3.msra.mxu1 %v7391_v7  ;;  %v7624_v7 = vld [vmem:[#allocation11 + $0x8] sm:$0xff] }
0x26d0   :  { %5208 = vmatmul.mubr.msk.f32.gmra.mxu1 %vm533_vm7, %v4218_v55  ;;  %5624 = vmatprep.subr.mxu1 %v7869_v24 }
0x26d1   :  { %4354 = vmatprep.mubr.f32.mxu1 %v7869_v24  ;;  %5625 = vmatpush3.msra.mxu1 %v7395_v56 }
0x26d2   :  { %5626 = vmatprep.subr.mxu1 %v7869_v24 }
0x26d3   :  { %5627 = vmatpush3.msra.mxu1 %v7399_v1 }
0x26d4   :  { %5209 = vmatmul.mubr.msk.f32.gmra.mxu1 %vm533_vm7, %v4219_v21  ;;  %5628 = vmatprep.subr.mxu1 %v7869_v24  ;;  %v7654_v21 = vld [vmem:[#allocation11 + $0x68] sm:$0xff] }
0x26d5   :  { %4360 = vmatprep.mubr.f32.mxu1 %v7869_v24  ;;  %5629 = vmatpush3.msra.mxu1 %v7403_v15 }
0x26d6   :  { %5630 = vmatprep.subr.mxu1 %v7869_v24 }
0x26d7   :  { %5631 = vmatpush3.msra.mxu1 %v7406_v63  ;;  %v7629_v63 = vld [vmem:[#allocation11 + $0x18] sm:$0xff] }
0x26d8   :  { %5210 = vmatmul.mubr.msk.f32.gmra.mxu1 %vm533_vm7, %v4220_v0  ;;  %5632 = vmatprep.subr.mxu1 %v7869_v24 }
0x26d9   :  { %4366 = vmatprep.mubr.f32.mxu1 %v7869_v24  ;;  %5633 = vmatpush3.msra.mxu1 %v7409_v35 }
0x26da   :  { %5634 = vmatprep.subr.mxu1 %v7869_v24 }
0x26db   :  { %5635 = vmatpush3.msra.mxu1 %v7413_v50 }
0x26dc   :  { %5211 = vmatmul.mubr.msk.f32.gmra.mxu1 %vm533_vm7, %v4221_v60  ;;  %5636 = vmatprep.subr.mxu1 %v7869_v24 }
0x26dd   :  { %5640 = vmatprep.mubr.msk.f32.mxu1 %vm5935_vm4, %v7869_v24  ;;  %5637 = vmatpush3.msra.mxu1 %v7417_v14 }
0x26de   :  { %5638 = vmatprep.subr.mxu1 %v7869_v24 }
0x26df   :  { %5639 = vmatpush3.msra.mxu1 %v7421_v5  ;;  %v7634_v5 = vld [vmem:[#allocation11 + $0x28] sm:$0xff] }
0x2780   :  { %v7622_v36 = vpop.f32.mrf.mxu1 }
0x2782   :  { %v4328_v56 = vpop.f32.mrf.mxu1 }
0x2783   :  { %v4390_v1 = vmul.f32 %v7624_v7, %v4328_v56  ;;  %v4385_v56 = vld [vmem:[#allocation11 + $0x60] sm:$0xff] }
0x2784   :  { %v7627_v15 = vpop.f32.mrf.mxu1 }
0x2785   :  { %v4406_v35 = vadd.f32 %v4390_v1, %v7517_v25  ;;  %v4383_v1 = vld [vmem:[#allocation11 + $0x50] sm:$0xff] }
0x2786   :  { %v4334_v50 = vpop.f32.mrf.mxu1 }
0x2787   :  { %4422 = vst.msk [vmem:[#allocation2 + $0x8] sm:$0xff] %vm105_vm0, %v4406_v35  ;;  %v4392_v14 = vmul.f32 %v7629_v63, %v4334_v50  ;;  %v4381_v50 = vld [vmem:[#allocation11 + $0x40] sm:$0xff] }
0x2788   :  { %v4338_v3 = vpop.f32.mrf.mxu1 }
0x2789   :  { %v4408_v61 = vadd.f32 %v4392_v14, %v7510_v49 }
0x278a   :  { %v4340_v2 = vpop.f32.mrf.mxu1 }
0x278b   :  { %4424 = vst.msk [vmem:[#allocation2 + $0x18] sm:$0xff] %vm105_vm0, %v4408_v61  ;;  %v4394_v17 = vmul.f32 %v7634_v5, %v4340_v2  ;;  %v4379_v2 = vld [vmem:[#allocation11 + $0x30] sm:$0xff] }
0x278c   :  { %v4344_v42 = vpop.f32.mrf.mxu1 }
0x278d   :  { %v4410_v25 = vadd.f32 %v4394_v17, %v7500_v11 }
0x278e   :  { %v4346_v59 = vpop.f32.mrf.mxu1 }
0x278f   :  { %4426 = vst.msk [vmem:[#allocation2 + $0x28] sm:$0xff] %vm105_vm0, %v4410_v25  ;;  %v4396_v44 = vmul.f32 %v7639_v6, %v4346_v59 }
0x2790   :  { %v4350_v51 = vpop.f32.mrf.mxu1 }
0x2791   :  { %v4412_v49 = vadd.f32 %v4396_v44, %v7489_v4 }
0x2792   :  { %v4352_v19 = vpop.f32.mrf.mxu1 }
0x2793   :  { %4428 = vst.msk [vmem:[#allocation2 + $0x38] sm:$0xff] %vm105_vm0, %v4412_v49  ;;  %v4398_v23 = vmul.f32 %v7644_v52, %v4352_v19  ;;  %v4395_v19 = vmul.f32 %v4379_v2, %v4344_v42  ;;  %v4373_v42 = vld [vmem:[#allocation11] sm:$0xff]  ;;  %v5065_v2 = vrot.slane %v7326_v38, 3 }
0x2794   :  { %v4356_v34 = vpop.f32.mrf.mxu1 }
0x2795   :  { %v4414_v11 = vadd.f32 %v4398_v23, %v7478_v33  ;;  %v4399_v14 = vmul.f32 %v4383_v1, %v4356_v34 }
0x2796   :  { %v4358_v27 = vpop.f32.mrf.mxu1 }
0x2797   :  { %4430 = vst.msk [vmem:[#allocation2 + $0x48] sm:$0xff] %vm105_vm0, %v4414_v11  ;;  %v4400_v40 = vmul.f32 %v7649_v26, %v4358_v27  ;;  %v4415_v23 = vadd.f32 %v4399_v14, %v7472_v8  ;;  %v7926_v14 = vld [vmem:[#allocation17_spill] sm:$0xff] }
0x2798   :  { %v4362_v55 = vpop.f32.mrf.mxu1 }
0x2799   :  { %v4416_v4 = vadd.f32 %v4400_v40, %v7466_v18  ;;  %v4401_v35 = vmul.f32 %v4385_v56, %v4362_v55  ;;  %v4411_v55 = vadd.f32 %v4395_v19, %v7494_v39 }
0x279a   :  { %v4364_v0 = vpop.f32.mrf.mxu1  ;;  %v7687_v40 = vld [vmem:[#allocation2 + $0x38] sm:$0xff] }
0x279b   :  { %4432 = vst.msk [vmem:[#allocation2 + $0x58] sm:$0xff] %vm105_vm0, %v4416_v4  ;;  %v4402_v60 = vmul.f32 %v7654_v21, %v4364_v0  ;;  %v4417_v17 = vadd.f32 %v4401_v35, %v7460_v31  ;;  %v7694_v0 = vld [vmem:[#allocation2 + $0x28] sm:$0xff] }
0x279c   :  { %v4368_v53 = vpop.f32.mrf.mxu1  ;;  %v7925_v35 = vld [vmem:[#allocation21_spill] sm:$0xff] }
0x279d   :  { %v4418_v33 = vadd.f32 %v4402_v60, %v7462_v13  ;;  %v4403_v18 = vmul.f32 %v4387_v57, %v4368_v53  ;;  %v4397_v13 = vmul.f32 %v4381_v50, %v4350_v51  ;;  %v4375_v51 = vld [vmem:[#allocation11 + $0x10] sm:$0xff]  ;;  %v5062_v50 = vrot.slane %v7925_v35, 4 }
0x279e   :  { %v4370_v30 = vpop.f32.mrf.mxu1  ;;  %v4391_v8 = vmul.f32 %v4375_v51, %v7627_v15  ;;  %v7703_v53 = vld [vmem:[#allocation2 + $0x18] sm:$0xff] }
0x279f   :  { %4434 = vst.msk [vmem:[#allocation2 + $0x68] sm:$0xff] %vm105_vm0, %v4418_v33  ;;  %v4404_v29 = vmul.f32 %v7659_v47, %v4370_v30  ;;  %v4419_v61 = vadd.f32 %v4403_v18, %v7456_v12  ;;  %v7679_v12 = vld [vmem:[#allocation2 + $0x48] sm:$0xff]  ;;  %v4413_v27 = vadd.f32 %v4397_v13, %v7486_v16  ;;  %v4389_v16 = vmul.f32 %v4373_v42, %v7622_v36  ;;  %v7924_v18 = vld [vmem:[#allocation31_spill] sm:$0xff] }
0x27a0   :  { %v4407_v39 = vadd.f32 %v4391_v8, %v7513_v9  ;;  %v7709_v33 = vld [vmem:[#allocation2 + $0x8] sm:$0xff]  ;;  %v7922_v9 = vld [vmem:[#allocation27_spill] sm:$0xff]  ;;  %v5059_v1 = vrot.slane %v7924_v18, 5 }
0x27a1   :  { %v4420_v37 = vadd.f32 %v4404_v29, %v7464_v41  ;;  %v4377_v41 = vld [vmem:[#allocation11 + $0x20] sm:$0xff]  ;;  %v7677_v34 = vpack.c.bf16 %v4419_v61, %v4417_v17  ;;  %v7692_v4 = vpack.c.bf16 %v4415_v23, %v4413_v27  ;;  %v7713_v30 = vpack.c.bf16 %v7703_v53, %v7709_v33  ;;  %v7921_v29 = vld [vmem:[#allocation26_spill] sm:$0xff] }
0x27a2   :  { %v7672_v44 = vld [vmem:[#allocation2 + $0x58] sm:$0xff]  ;;  %v4393_v11 = vmul.f32 %v4377_v41, %v4338_v3  ;;  %v7698_v3 = vpack.c.bf16 %v7687_v40, %v7694_v0  ;;  %v4405_v36 = vadd.f32 %v4389_v16, %v7522_v48  ;;  %v4461_v57 = vrot.slane %v7921_v29, 3 }
0x27a3   :  { %4436 = vst.msk [vmem:[#allocation2 + $0x78] sm:$0xff] %vm105_vm0, %v4420_v37  ;;  %v7683_v31 = vpack.c.bf16 %v7672_v44, %v7679_v12  ;;  %v5053_v48 = vrot.slane %v7922_v9, 7  ;;  %v7923_v37 = vld [vmem:[#allocation19_spill] sm:$0xff] }
0x27a4   :  { %v4409_v60 = vadd.f32 %v4393_v11, %v7507_v10  ;;  %v7718_v10 = vpack.c.bf16 %v4407_v39, %v4405_v36  ;;  %v5056_v56 = vrot.slane %v7923_v37, 6 }
0x27a5   :  { %v5073_v61 = vsel %vm558_vm6, %v7926_v14, %v5053_v48 }
0x27a6   :  { %v7668_v25 = vld [vmem:[#allocation2 + $0x68] sm:$0xff]  ;;  %v7707_v15 = vpack.c.bf16 %v4411_v55, %v4409_v60  ;;  %v5075_v13 = vsel %vm5074_vm8, %v5073_v61, %v5056_v56 }
0x27a7   :  { %v5077_v17 = vsel %vm5076_vm9, %v5075_v13, %v5059_v1 }
0x27a8   :  { %v5079_v41 = vsel %vm5078_vm10, %v5077_v17, %v5062_v50 }
0x27a9   :  { %v5081_v19 = vsel %vm5080_vm11, %v5079_v41, %v5065_v2 }
0x27aa   :  { %v7670_v59 = vld [vmem:[#allocation2 + $0x78] sm:$0xff] }
0x27ab   :  { %v4460_v49 = vpack.c.bf16 %v7670_v59, %v7668_v25 }
0x27ad   :  { %4473 = vmatprep.subr.bf16.mxu0 %v4460_v49  ;;  %4686 = vmatprep.subr.bf16.mxu1 %v4460_v49 }
0x27ae   :  { %4474 = vmatpush1.bf16.msra.mxu0 %v7677_v34 }
0x27af   :  { %4475 = vmatprep.subr.bf16.mxu0 %v7683_v31 }
0x27b2   :  { %4476 = vmatpush1.bf16.msra.mxu0 %v7692_v4 }
0x27b3   :  { %4477 = vmatprep.subr.bf16.mxu0 %v7698_v3 }
0x27b6   :  { %4478 = vmatpush1.bf16.msra.mxu0 %v7707_v15 }
0x27b7   :  { %4479 = vmatprep.subr.bf16.mxu0 %v7713_v30 }
0x27ba   :  { %4480 = vmatpush1.bf16.msra.mxu0 %v7718_v10 }
0x27bb   :  { %4642 = vmatprep.subr.bf16.mxu0 %v4460_v49 }
0x27bd   :  { %5212 = vmatmul.mubr.msk.bf16.vlgmr.msra.gmra.mxu0 %vm146_vm1, %v4461_v57 }
0x27be   :  { %4643 = vmatpush1.bf16.msra.mxu0 %v7677_v34  ;;  %4666 = vmatprep.mubr.bf16.mxu0 %v7868_v22 }
0x27bf   :  { %4644 = vmatprep.subr.bf16.mxu0 %v7683_v31 }
0x27c2   :  { %4645 = vmatpush1.bf16.msra.mxu0 %v7692_v4 }
0x27c3   :  { %4646 = vmatprep.subr.bf16.mxu0 %v7698_v3 }
0x27c6   :  { %4647 = vmatpush1.bf16.msra.mxu0 %v7707_v15 }
0x27c7   :  { %4648 = vmatprep.subr.bf16.mxu0 %v7713_v30 }
0x27ca   :  { %4649 = vmatpush1.bf16.msra.mxu0 %v7718_v10 }
0x27cb   :  { %4762 = vmatprep.subr.mxu0 %v7545_v62  ;;  %v5068_v62 = vrot.slane %v7532_v58, 2 }
0x27cd   :  { %v5083_v51 = vsel %vm5082_vm12, %v5081_v19, %v5068_v62 }
0x287d   :  { %v4499_v49 = vpop.f32.mrf.mxu0 }
0x287e   :  { %v5071_v23 = vrot.slane %v4499_v49, 1  ;;  %v4506_v27 = vsel %vm191_vm2, %v4499_v49, -inf }
0x287f   :  { %v4501_v11 = vpop.f32.mrf.mxu0 }
0x2880   :  { %v4507_v42 = vsel %vm193_vm3, %v4501_v11, -inf  ;;  %v5085_v8 = vsel %vm5084_vm13, %v5083_v51, %v5071_v23  ;;  %v5215_v19 = vmul.f32 -1.442695, %v4501_v11 }
0x2881   :  { %v4503_v38 = vpop.f32.mrf.mxu0  ;;  %v4508_v55 = vmax.f32 %v4506_v27, %v4507_v42  ;;  %v5086_v16 = vpack.c.bf16 %v5085_v8, %v5085_v8 }
0x2883   :  { %4509 = vmax.xlane.f32.xlu0 %v4508_v55  ;;  %v4504_v58 = vpop.f32.mrf.mxu0  ;;  %5088 = vst.msk [vmem:[#allocation12] sm:$0xf] %vm5087_vm14, %v5086_v16 }
0x290c   :  { %v4510_v60 = vpop.xlane.xlu0 %4509 }
0x290d   :  { %v4511_v39 = vrot.slane %v4510_v60, 4 }
0x290f   :  { %v4512_v36 = vmax.f32 %v4510_v60, %v4511_v39 }
0x2911   :  { %v4513_v29 = vrot.slane %v4512_v36, 2 }
0x2913   :  { %v4514_v57 = vmax.f32 %v4512_v36, %v4513_v29 }
0x2915   :  { %v4515_v9 = vrot.slane %v4514_v57, 1 }
0x2917   :  { %v4516_v48 = vmax.f32 %v4514_v57, %v4515_v9 }
0x2919   :  { %5659 = vpush %v4516_v48 }
0x294a   :  { %s5660_s25 = spop %5659 }
0x294b   :  { %v4518_v37 = vstv %s5660_s25 }
0x294c   :  { %v4519_v56 = vsub.f32 %v4499_v49, %v4518_v37  ;;  %v4520_v18 = vsub.f32 %v4501_v11, %v4518_v37 }
0x294e   :  { %v4521_v1 = vmul.f32 1.442695, %v4519_v56  ;;  %v4523_v35 = vmul.f32 1.442695, %v4520_v18 }
0x2950   :  { %5786 = vpow2.f32 %v4521_v1 }
0x2951   :  { %5788 = vpow2.f32 %v4523_v35 }
0x2952   :  { %5790 = vpow2.f32 %v5215_v19 }
0x295d   :  { %v5787_v50 = vpop.eup %5786 }
0x295e   :  { %v5789_v14 = vpop.eup %5788 }
0x295f   :  { %v5710_v61 = vpack.i.bf16 %v5789_v14, %v5787_v50 }
0x2961   :  { %5711 = vrot.lane.b32.xlu1 %v5710_v61, %s5936_s4 }
0x29d3   :  { %v5712_v2 = vpop.permute.xlu1 %5711 }
0x29d4   :  { %v5714_v13 = vunpack.i.h.bf16 %v5712_v2  ;;  %v5713_v62 = vunpack.i.l.bf16 %v5712_v2 }
0x29d6   :  { %v4547_v17 = vsel %vm146_vm1, %v5713_v62, %v5714_v13 }
0x29d7   :  { %5641 = vmatmul.mubr.f32.vlgmr.msra.gmra.mxu1 %v4547_v17 }
0x29d8   :  { %4687 = vmatpush1.bf16.msra.mxu1 %v7677_v34  ;;  %4710 = vmatprep.mubr.bf16.mxu1 %v7868_v22  ;;  %v5791_v22 = vpop.eup %5790 }
0x29d9   :  { %4688 = vmatprep.subr.bf16.mxu1 %v7683_v31  ;;  %v4722_v31 = vadd.f32 1.0, %v5791_v22 }
0x29dc   :  { %4689 = vmatpush1.bf16.msra.mxu1 %v7692_v4 }
0x29dd   :  { %4690 = vmatprep.subr.bf16.mxu1 %v7698_v3 }
0x29e0   :  { %4691 = vmatpush1.bf16.msra.mxu1 %v7707_v15 }
0x29e1   :  { %4692 = vmatprep.subr.bf16.mxu1 %v7713_v30 }
0x29e4   :  { %4693 = vmatpush1.bf16.msra.mxu1 %v7718_v10 }
0x2a97   :  { %v4615_v41 = vpop.f32.mrf.mxu1 }
0x2a98   :  { %4620 = vrot.lane.b32.xlu0 %v4615_v41, %s5936_s4 }
0x2a99   :  { %v5642_v49 = vpop.f32.mrf.mxu1 }
0x2b0a   :  { %v4621_v34 = vpop.permute.xlu0 %4620 }
0x2b0b   :  { %5792 = vrcp.f32 %v4621_v34 }
0x2b0c   :  { %5794 = vrcp.f32 %v4722_v31 }
0x2b18   :  { %v5793_v4 = vpop.eup %5792 }
0x2b19   :  { %v4625_v23 = vmul.f32 %v5793_v4, %v5789_v14  ;;  %v4624_v3 = vmul.f32 %v5793_v4, %v5787_v50  ;;  %v5795_v30 = vpop.eup %5794 }
0x2b1b   :  { %v4627_v51 = vpack.c.bf16 %v4625_v23, %v4625_v23  ;;  %v4626_v15 = vpack.c.bf16 %v4624_v3, %v4624_v3 }
0x2b1d   :  { %5214 = vmatmul.mubr.msk.bf16.vlgmr.msra.gmra.mxu1 %vm146_vm1, %v4627_v51  ;;  %4629 = vrot.lane.b32.xlu0 %v4626_v15, %s5936_s4 }
0x2b1e   :  { %4969 = vmatprep.mubr.f32.mxu1 %v7869_v24 }
0x2b21   :  { %4734 = vrot.lane.b32.xlu0 %v5795_v30, %s5936_s4 }
0x2b3f   :  { %4813 = vxpose.xlu0.b32.start.end [1/1] (short) (narrow) %v4625_v23, 64 }
0x2b8f   :  { %v4630_v10 = vpop.permute.xlu0 %4629 }
0x2b90   :  { %5213 = vmatmul.mubr.msk.bf16.vlgmr.msra.gmra.mxu0 %vm146_vm1, %v4630_v10 }
0x2b91   :  { %4763 = vmatpush1.msra.mxu0 %v7552_v46  ;;  %4802 = vmatprep.mubr.f32.mxu0 %v7869_v24 }
0x2b92   :  { %4764 = vmatprep.subr.mxu0 %v7554_v20 }
0x2b93   :  { %4765 = vmatpush1.msra.mxu0 %v7557_v43  ;;  %v4735_v11 = vpop.permute.xlu0 %4734 }
0x2b94   :  { %4766 = vmatprep.subr.mxu0 %v7560_v32 }
0x2b95   :  { %4767 = vmatpush1.msra.mxu0 %v7564_v54 }
0x2b96   :  { %4768 = vmatprep.subr.mxu0 %v7567_v28 }
0x2b97   :  { %4769 = vmatpush1.msra.mxu0 %v7570_v45 }
0x2b98   :  { %5216 = vmatmul.mubr.msk.f32.vlgmr.msra.gmra.mxu0 %vm423_vm5, %v4735_v11 }
0x2b99   :  { %4939 = vmatprep.mubr.f32.mxu0 %v7869_v24 }
0x2bbb   :  { %v4829_v20 = vpop.trf.xlu0 }
0x2bbf   :  { %v4830_v38 = vpop.trf.xlu0 }
0x2bc3   :  { %v4831_v43 = vpop.trf.xlu0 }
0x2bc7   :  { %v4832_v55 = vpop.trf.xlu0 }
0x2bcb   :  { %v4833_v54 = vpop.trf.xlu0 }
0x2bcf   :  { %v4834_v39 = vpop.trf.xlu0 }
0x2bd3   :  { %v4835_v48 = vpop.trf.xlu0 }
0x2bd7   :  { %v4836_v37 = vpop.trf.xlu0 }
0x2bdd   :  { %v4712_v46 = vpop.f32.mrf.mxu1 }
0x2bdf   :  { %v4714_v27 = vpop.f32.mrf.mxu1 }
0x2be1   :  { %v4716_v42 = vpop.f32.mrf.mxu1 }
0x2be3   :  { %v4717_v8 = vpop.f32.mrf.mxu1 }
0x2c50   :  { %v4668_v32 = vpop.f32.mrf.mxu0 }
0x2c51   :  { %v4809_v36 = vsub.f32 %v4668_v32, %v4712_v46 }
0x2c52   :  { %v4670_v16 = vpop.f32.mrf.mxu0 }
0x2c53   :  { %v4810_v45 = vsub.f32 %v4670_v16, %v4714_v27 }
0x2c54   :  { %v4672_v58 = vpop.f32.mrf.mxu0 }
0x2c56   :  { %v4673_v28 = vpop.f32.mrf.mxu0 }
0x2c58   :  { %v4804_v60 = vpop.f32.mrf.mxu0 }
0x2c59   :  { %v4811_v9 = vmul.f32 %v4809_v36, %v4804_v60 }
0x2c5a   :  { %v4806_v29 = vpop.f32.mrf.mxu0 }
0x2c5b   :  { %v4812_v57 = vmul.f32 %v4810_v45, %v4806_v29 }
0x2c5d   :  { %5217 = vmatprep.subr.msk.mxu0 %vm558_vm6, %v4812_v57  ;;  %5643 = vmatprep.subr.msk.mxu1 %vm558_vm6, %v4812_v57 }
0x2c5e   :  { %5218 = vmatpush1.msk.msra.mxu0 %vm558_vm6, %v4811_v9  ;;  %5644 = vmatpush1.msk.msra.mxu1 %vm558_vm6, %v4811_v9 }
0x2c5f   :  { %5219 = vmatmul.mubr.msk.f32.vlgmr.msra.gmra.mxu0 %vm533_vm7, %v4829_v20  ;;  %5224 = vmatmul.mubr.msk.f32.vlgmr.msra.gmra.mxu1 %vm533_vm7, %v4834_v39 }
0x2c60   :  { %4945 = vmatprep.mubr.f32.mxu0 %v7869_v24  ;;  %4975 = vmatprep.mubr.f32.mxu1 %v7869_v24 }
0x2c63   :  { %5220 = vmatmul.mubr.msk.f32.gmra.mxu0 %vm533_vm7, %v4830_v38  ;;  %5225 = vmatmul.mubr.msk.f32.gmra.mxu1 %vm533_vm7, %v4835_v48 }
0x2c64   :  { %4951 = vmatprep.mubr.f32.mxu0 %v7869_v24  ;;  %4981 = vmatprep.mubr.f32.mxu1 %v7869_v24 }
0x2c67   :  { %5221 = vmatmul.mubr.msk.f32.gmra.mxu0 %vm533_vm7, %v4831_v43  ;;  %5226 = vmatmul.mubr.msk.f32.gmra.mxu1 %vm533_vm7, %v4836_v37 }
0x2c68   :  { %4957 = vmatprep.mubr.f32.mxu0 %v7869_v24 }
0x2c6b   :  { %5222 = vmatmul.mubr.msk.f32.gmra.mxu0 %vm533_vm7, %v4832_v55 }
0x2c6c   :  { %4963 = vmatprep.mubr.f32.mxu0 %v7869_v24 }
0x2c6f   :  { %5223 = vmatmul.mubr.msk.f32.gmra.mxu0 %vm533_vm7, %v4833_v54 }
0x2c70   :  { %5907 = shalt.err (!%p5904_p1)
}
0x2c71   :  { %5098 = dma.vmem_to_hbm [thread:$0]  %s5096_s27, 64, %s7818_s5, [#allocation5]  }
0x2d1f   :  { %v4941_v56 = vpop.f32.mrf.mxu0  ;;  %v4971_v18 = vpop.f32.mrf.mxu1 }
0x2d21   :  { %v4943_v1 = vpop.f32.mrf.mxu0  ;;  %v4973_v24 = vpop.f32.mrf.mxu1 }
0x2d22   :  { %v5005_v35 = vmul.f32 %v4943_v1, %v7624_v7  ;;  %v5015_v50 = vmul.f32 %v4973_v24, %v7649_v26 }
0x2d23   :  { %v4947_v14 = vpop.f32.mrf.mxu0  ;;  %v4977_v61 = vpop.f32.mrf.mxu1 }
0x2d24   :  { %v5021_v2 = vadd.f32 %v5005_v35, %v7709_v33  ;;  %v5031_v13 = vadd.f32 %v5015_v50, %v7672_v44 }
0x2d25   :  { %v4949_v62 = vpop.f32.mrf.mxu0  ;;  %v4979_v17 = vpop.f32.mrf.mxu1 }
0x2d26   :  { %5037 = vst.msk [vmem:[#allocation2 + $0x8] sm:$0xff] %vm105_vm0, %v5021_v2  ;;  %5047 = vst.msk [vmem:[#allocation2 + $0x58] sm:$0xff] %vm105_vm0, %v5031_v13  ;;  %v5007_v41 = vmul.f32 %v4949_v62, %v7629_v63  ;;  %v5017_v49 = vmul.f32 %v4979_v17, %v7654_v21 }
0x2d27   :  { %v4953_v19 = vpop.f32.mrf.mxu0  ;;  %v4983_v7 = vpop.f32.mrf.mxu1 }
0x2d28   :  { %v5023_v26 = vadd.f32 %v5007_v41, %v7703_v53  ;;  %v5033_v34 = vadd.f32 %v5017_v49, %v7668_v25 }
0x2d29   :  { %v4955_v22 = vpop.f32.mrf.mxu0  ;;  %v4985_v33 = vpop.f32.mrf.mxu1 }
0x2d2a   :  { %5039 = vst.msk [vmem:[#allocation2 + $0x18] sm:$0xff] %vm105_vm0, %v5023_v26  ;;  %5049 = vst.msk [vmem:[#allocation2 + $0x68] sm:$0xff] %vm105_vm0, %v5033_v34  ;;  %v5009_v44 = vmul.f32 %v4955_v22, %v7634_v5  ;;  %v5019_v31 = vmul.f32 %v4985_v33, %v7659_v47 }
0x2d2b   :  { %v4959_v4 = vpop.f32.mrf.mxu0 }
0x2d2c   :  { %v5025_v63 = vadd.f32 %v5009_v44, %v7694_v0  ;;  %v5035_v21 = vadd.f32 %v5019_v31, %v7670_v59 }
0x2d2d   :  { %v4961_v23 = vpop.f32.mrf.mxu0 }
0x2d2e   :  { %5041 = vst.msk [vmem:[#allocation2 + $0x28] sm:$0xff] %vm105_vm0, %v5025_v63  ;;  %5051 = vst.msk [vmem:[#allocation2 + $0x78] sm:$0xff] %vm105_vm0, %v5035_v21  ;;  %v5011_v25 = vmul.f32 %v4961_v23, %v7639_v6 }
0x2d2f   :  { %v4965_v53 = vpop.f32.mrf.mxu0 }
0x2d30   :  { %v5027_v3 = vadd.f32 %v5011_v25, %v7687_v40 }
0x2d31   :  { %v4967_v51 = vpop.f32.mrf.mxu0 }
0x2d32   :  { %5043 = vst.msk [vmem:[#allocation2 + $0x38] sm:$0xff] %vm105_vm0, %v5027_v3  ;;  %v5013_v5 = vmul.f32 %v4967_v51, %v7644_v52 }
0x2d34   :  { %v5029_v47 = vadd.f32 %v5013_v5, %v7679_v12 }
0x2d36   :  { %5045 = vst.msk [vmem:[#allocation2 + $0x48] sm:$0xff] %vm105_vm0, %v5029_v47 }
0x2d37   :  { %5922 = dma.done.wait [#allocation5], 64  }
0x2d38   :  { %5923 = vsyncadd [#allocation5], 4294967232 }
0x2d39   :  { %5102 = vsyncpa [#allocation4], 1 }
0x2d3a   :  { %5103 = vsyncpa [#allocation7], 1 }
0x2d3b   :  { %5104 = vsyncpa [#allocation10], 1 }
0x2d3c   :  { %5105 = vsyncpa [#allocation5], 1 }

</bundles_post_ra>
